<compile_context>
chip_gen: v6e
topology: v6e:2x2x1
jax: 0.10.0
libtpu: 0.0.40
codegen_flags: <defaults>
</compile_context>

<pallas_src>
import jax
import jax.numpy as jnp
from jax.experimental import pallas as pl
from jax.experimental.pallas import tpu as pltpu


C_IN, C_CONV, KSZ, STRIDE, HID = 101, 196, 15, 4, 128
G3 = 3 * HID
C_PAD = 256                                  # C_CONV 196 -> 256 (MXU aligned)
K_PAD = ((C_IN * KSZ + 127) // 128) * 128    # 1515 -> 1536   (MXU aligned)
OUT_PAD = 128                                # lane-dense padding of 1-wide head
EPS = 1e-3                                   # BatchNorm1d(eps=0.001)


def _vmem_limit_bytes():
    """Generation-conditional VMEM budget (96 MiB on v5e/v6e, ~48 MiB on v7x)."""
    try:
        cap = int(pltpu.get_tpu_info().vmem_capacity_bytes)
    except Exception:
        cap = 64 * 1024 * 1024
    return int(min(96 * 1024 * 1024, max(32 * 1024 * 1024, (cap * 3) // 4)))


VMEM_LIMIT = _vmem_limit_bytes()
TM_CAP = 2048 if VMEM_LIMIT >= 64 * 1024 * 1024 else 1024   # row tile cap


def _batch_tile(b):
    """Batch block for the recurrent kernel: multiple of 8 (or == B)."""
    if b <= 8:
        return b
    half = -(-b // 2)                 # aim for a 2-way megacore split
    return min(256, -(-half // 8) * 8)


# ----------------------------- Pallas kernels ------------------------------

def conv_proj_kernel(p_ref, wc_ref, bc_ref, w1_ref, b1_ref, o_ref):
    """xp1 = relu(patches @ Wc' + bc') @ W1ih^T + b1ih  for one row tile.

    BN0 pre-folded into Wc'/bc'; bf16 MXU operands, f32 accumulation;
    padded (zero) columns/rows are exact no-ops.  Output stored in bf16.
    """
    y = jnp.dot(p_ref[...], wc_ref[...], preferred_element_type=jnp.float32)
    y = jnp.maximum(y + bc_ref[...], 0.0)
    o_ref[...] = (
        jnp.dot(y.astype(jnp.bfloat16), w1_ref[...],
                preferred_element_type=jnp.float32)
        + b1_ref[...]).astype(o_ref.dtype)


def recurrent_kernel(xp1_ref, w1hh_ref, b1hh_ref, w2ih_ref, b2ih_ref,
                     w2hh_ref, b2hh_ref, h2_ref):
    """GRU1 -> (BN1-folded) GRU2 input proj -> GRU2 for one batch block.

    Whole time recurrence in a single invocation (in-kernel fori_loop with a
    fixed partial unroll); hidden states carried in f32; h2 emitted per step
    in bf16.  The Linear+Sigmoid head is deferred to a separate kernel.
    """
    T, B, G = xp1_ref.shape
    H = G // 3
    f32, bf16 = jnp.float32, jnp.bfloat16

    # Hoist weight loads + bias broadcasts out of the time loop
    # (JAX does not CSE broadcast_in_dim inside the loop body).
    w1hh = w1hh_ref[...]
    w2ih = w2ih_ref[...]
    w2hh = w2hh_ref[...]
    b1hh = jnp.broadcast_to(b1hh_ref[...], (B, G))
    b2ih = jnp.broadcast_to(b2ih_ref[...], (B, G))
    b2hh = jnp.broadcast_to(b2hh_ref[...], (B, G))

    def gru_cell(h, gi, whh, bhh):
        # PyTorch GRU gate order [r, z, n]; n uses r * (W_hn h + b_hn).
        gh = jnp.dot(h.astype(bf16), whh, preferred_element_type=f32) + bhh
        r = jax.nn.sigmoid(gi[:, :H] + gh[:, :H])
        z = jax.nn.sigmoid(gi[:, H:2 * H] + gh[:, H:2 * H])
        n = jnp.tanh(gi[:, 2 * H:] + r * gh[:, 2 * H:])
        return (1.0 - z) * n + z * h

    def step(t, carry):
        h1, h2 = carry
        h1 = gru_cell(h1, xp1_ref[t], w1hh, b1hh)           # bf16 gi + f32 gh
        gi2 = jnp.dot(h1.astype(bf16), w2ih,
                      preferred_element_type=f32) + b2ih
        h2 = gru_cell(h2, gi2, w2hh, b2hh)
        h2_ref[t] = h2.astype(h2_ref.dtype)
        return (h1, h2)

    h0 = jnp.zeros((B, H), f32)
    jax.lax.fori_loop(0, T, step, (h0, h0), unroll=min(8, T))


def head_kernel(h2_ref, wl_ref, bl_ref, o_ref):
    """sigmoid(h2 @ wl' + bl') for one (T*B) row tile (BN2 pre-folded)."""
    o = jnp.dot(h2_ref[...], wl_ref[...], preferred_element_type=jnp.float32)
    o_ref[...] = jax.nn.sigmoid(o + bl_ref[...]).astype(o_ref.dtype)


# ------------------------------ wrappers ------------------------------------

def conv_proj(patches, wc, bc, w1, b1):
    R, K = patches.shape
    Cc = wc.shape[1]
    tm = min(R, TM_CAP)
    return pl.pallas_call(
        conv_proj_kernel,
        out_shape=jax.ShapeDtypeStruct((R, G3), jnp.bfloat16),
        grid_spec=pltpu.PrefetchScalarGridSpec(
            num_scalar_prefetch=0,
            grid=(pl.cdiv(R, tm),),
            in_specs=[
                pl.BlockSpec((tm, K), lambda i: (i, 0)),
                pl.BlockSpec((K, Cc), lambda i: (0, 0)),     # resident weights
                pl.BlockSpec((1, Cc), lambda i: (0, 0)),
                pl.BlockSpec((Cc, G3), lambda i: (0, 0)),
                pl.BlockSpec((1, G3), lambda i: (0, 0)),
            ],
            out_specs=pl.BlockSpec((tm, G3), lambda i: (i, 0)),
        ),
        compiler_params=pltpu.CompilerParams(
            dimension_semantics=("parallel",),
            vmem_limit_bytes=VMEM_LIMIT),
    )(patches, wc, bc, w1, b1)


def recurrent_net(xp1, w1hh, b1hh, w2ih, b2ih, w2hh, b2hh):
    T, B, _ = xp1.shape
    tb = _batch_tile(B)
    return pl.pallas_call(
        recurrent_kernel,
        out_shape=jax.ShapeDtypeStruct((T, B, HID), jnp.bfloat16),
        grid_spec=pltpu.PrefetchScalarGridSpec(
            num_scalar_prefetch=0,
            grid=(pl.cdiv(B, tb),),
            in_specs=[
                pl.BlockSpec((T, tb, G3), lambda i: (0, i, 0)),
                pl.BlockSpec((HID, G3), lambda i: (0, 0)),
                pl.BlockSpec((1, G3), lambda i: (0, 0)),
                pl.BlockSpec((HID, G3), lambda i: (0, 0)),
                pl.BlockSpec((1, G3), lambda i: (0, 0)),
                pl.BlockSpec((HID, G3), lambda i: (0, 0)),
                pl.BlockSpec((1, G3), lambda i: (0, 0)),
            ],
            out_specs=pl.BlockSpec((T, tb, HID), lambda i: (0, i, 0)),
        ),
        compiler_params=pltpu.CompilerParams(
            dimension_semantics=("parallel",),        # batch blocks -> megacore
            vmem_limit_bytes=VMEM_LIMIT),
    )(xp1, w1hh, b1hh, w2ih, b2ih, w2hh, b2hh)


def head_net(h2_rows, wl, bl):
    R, H = h2_rows.shape
    tm = min(R, TM_CAP)
    return pl.pallas_call(
        head_kernel,
        out_shape=jax.ShapeDtypeStruct((R, OUT_PAD), jnp.bfloat16),
        grid_spec=pltpu.PrefetchScalarGridSpec(
            num_scalar_prefetch=0,
            grid=(pl.cdiv(R, tm),),
            in_specs=[
                pl.BlockSpec((tm, H), lambda i: (i, 0)),
                pl.BlockSpec((H, OUT_PAD), lambda i: (0, 0)),
                pl.BlockSpec((1, OUT_PAD), lambda i: (0, 0)),
            ],
            out_specs=pl.BlockSpec((tm, OUT_PAD), lambda i: (i, 0)),
        ),
        compiler_params=pltpu.CompilerParams(
            dimension_semantics=("parallel",),
            vmem_limit_bytes=VMEM_LIMIT),
    )(h2_rows, wl, bl)


# ------------------------------ full network --------------------------------

def _bn_affine(g, b, m, v):
    s = g / jnp.sqrt(v + EPS)
    return s, b - m * s


def network_forward(params, x):
    B, Cin, L = x.shape
    T = (L - KSZ) // STRIDE + 1
    bf16, f32 = jnp.bfloat16, jnp.float32

    # im2col in bf16 (cast BEFORE the gather: halves the duplicated HBM
    # traffic), rows ordered (t, b) so everything downstream is time-major.
    xb = x.astype(bf16)
    idx = jnp.arange(T)[:, None] * STRIDE + jnp.arange(KSZ)[None, :]
    patches = xb[:, :, idx].transpose(2, 0, 1, 3).reshape(T * B, Cin * KSZ)
    patches = jnp.pad(patches, ((0, 0), (0, K_PAD - Cin * KSZ)))     # K aligned

    # Fold BN0 into the conv weight/bias; zero-pad ragged dims for clean tiles.
    s0, t0 = _bn_affine(params['bn0_g'], params['bn0_b'],
                        params['bn0_m'], params['bn0_v'])
    wc = (params['conv_w'].reshape(C_CONV, Cin * KSZ) * s0[:, None]).T
    bc = params['conv_b'] * s0 + t0
    wc_p = jnp.zeros((K_PAD, C_PAD), f32).at[:Cin * KSZ, :C_CONV].set(wc)
    bc_p = jnp.zeros((1, C_PAD), f32).at[0, :C_CONV].set(bc)
    w1_p = jnp.zeros((C_PAD, G3), f32).at[:C_CONV, :].set(params['gru1_wih'].T)
    b1ih = params['gru1_bih'][None]

    xp1 = conv_proj(patches, wc_p.astype(bf16), bc_p,
                    w1_p.astype(bf16), b1ih)                  # (T*B, 3H) bf16
    xp1 = xp1.reshape(T, B, G3)                               # free reshape

    # Fold BN1 into the GRU-2 input projection.
    s1, t1 = _bn_affine(params['bn1_g'], params['bn1_b'],
                        params['bn1_m'], params['bn1_v'])
    w2ih = (params['gru2_wih'] * s1[None, :]).T               # (H, 3H)
    b2ih = (params['gru2_bih'] + params['gru2_wih'] @ t1)[None]

    h2 = recurrent_net(
        xp1,
        params['gru1_whh'].T.astype(bf16), params['gru1_bhh'][None],
        w2ih.astype(bf16), b2ih,
        params['gru2_whh'].T.astype(bf16), params['gru2_bhh'][None])  # (T,B,H)

    # Fold BN2 into the time-distributed head; pad 1-wide output to 128 lanes.
    s2, t2 = _bn_affine(params['bn2_g'], params['bn2_b'],
                        params['bn2_m'], params['bn2_v'])
    wl = (params['lin_w'] * s2[None, :]).T                    # (H, 1)
    bl = params['lin_b'] + params['lin_w'] @ t2               # (1,)
    wl_pad = jnp.zeros((HID, OUT_PAD), f32).at[:, :1].set(wl)
    bl_pad = jnp.zeros((1, OUT_PAD), f32).at[0, 0].set(bl[0])

    o_pad = head_net(h2.reshape(T * B, HID),
                     wl_pad.astype(bf16), bl_pad)             # (T*B, 128) bf16

    out = o_pad[:, :1].reshape(T, B, 1).transpose(1, 0, 2)    # (B, T, 1)
    return out.astype(f32)


# --------------------------- pure-JAX reference ------------------------------

def _gru_ref(x_btf, w_ih, w_hh, b_ih, b_hh, H):
    def step(h, x_t):
        gi = x_t @ w_ih.T + b_ih
        gh = h @ w_hh.T + b_hh
        r = jax.nn.sigmoid(gi[:, :H] + gh[:, :H])
        z = jax.nn.sigmoid(gi[:, H:2 * H] + gh[:, H:2 * H])
        n = jnp.tanh(gi[:, 2 * H:] + r * gh[:, 2 * H:])
        h_new = (1.0 - z) * n + z * h
        return h_new, h_new
    B = x_btf.shape[0]
    h0 = jnp.zeros((B, H), jnp.float32)
    _, hs = jax.lax.scan(step, h0, x_btf.transpose(1, 0, 2))
    return hs.transpose(1, 0, 2)


def reference_forward(params, x):
    B, Cin, L = x.shape
    T = (L - KSZ) // STRIDE + 1
    idx = jnp.arange(T)[:, None] * STRIDE + jnp.arange(KSZ)[None, :]
    patches = x[:, :, idx].transpose(0, 2, 1, 3).reshape(B * T, Cin * KSZ)
    y = patches @ params['conv_w'].reshape(C_CONV, Cin * KSZ).T + params['conv_b']
    s0, t0 = _bn_affine(params['bn0_g'], params['bn0_b'],
                        params['bn0_m'], params['bn0_v'])
    y = jnp.maximum(y * s0 + t0, 0.0).reshape(B, T, C_CONV)
    h1 = _gru_ref(y, params['gru1_wih'], params['gru1_whh'],
                  params['gru1_bih'], params['gru1_bhh'], HID)
    s1, t1 = _bn_affine(params['bn1_g'], params['bn1_b'],
                        params['bn1_m'], params['bn1_v'])
    h2 = _gru_ref(h1 * s1 + t1, params['gru2_wih'], params['gru2_whh'],
                  params['gru2_bih'], params['gru2_bhh'], HID)
    s2, t2 = _bn_affine(params['bn2_g'], params['bn2_b'],
                        params['bn2_m'], params['bn2_v'])
    return jax.nn.sigmoid((h2 * s2 + t2) @ params['lin_w'].T + params['lin_b'])


# ------------------------------ parameters -----------------------------------

def init_params(key):
    keys = iter(jax.random.split(key, 32))

    def u(shape, bound):
        return jax.random.uniform(next(keys), shape, jnp.float32, -bound, bound)

    def bn(c):
        g = jax.random.uniform(next(keys), (c,), jnp.float32, 0.5, 1.5)
        b = u((c,), 0.1)
        m = u((c,), 0.1)
        v = jax.random.uniform(next(keys), (c,), jnp.float32, 0.5, 1.5)
        return g, b, m, v

    p = {}
    kc = float(1.0 / (C_IN * KSZ) ** 0.5)
    p['conv_w'] = u((C_CONV, C_IN, KSZ), kc)
    p['conv_b'] = u((C_CONV,), kc)
    p['bn0_g'], p['bn0_b'], p['bn0_m'], p['bn0_v'] = bn(C_CONV)

    kg = float(1.0 / HID ** 0.5)
    p['gru1_wih'] = u((3 * HID, C_CONV), kg)
    p['gru1_whh'] = u((3 * HID, HID), kg)
    p['gru1_bih'] = u((3 * HID,), kg)
    p['gru1_bhh'] = u((3 * HID,), kg)
    p['bn1_g'], p['bn1_b'], p['bn1_m'], p['bn1_v'] = bn(HID)

    p['gru2_wih'] = u((3 * HID, HID), kg)
    p['gru2_whh'] = u((3 * HID, HID), kg)
    p['gru2_bih'] = u((3 * HID,), kg)
    p['gru2_bhh'] = u((3 * HID,), kg)
    p['bn2_g'], p['bn2_b'], p['bn2_m'], p['bn2_v'] = bn(HID)

    p['lin_w'] = u((1, HID), kg)
    p['lin_b'] = u((1,), kg)
    return p


# --------------------------------- main ---------------------------------------

if __name__ == "__main__":
    key = jax.random.PRNGKey(0)
    pk, xk = jax.random.split(key)
    params = init_params(pk)

    B, L = 2, 43                      # L=43 -> T_out = (43-15)//4 + 1 = 8
    x = jax.random.normal(xk, (B, C_IN, L), jnp.float32)

    out = jax.jit(network_forward)(params, x)
    out = jax.block_until_ready(out)

    T = (L - KSZ) // STRIDE + 1
    assert out.shape == (B, T, 1), out.shape

    ref = reference_forward(params, x)
    err = float(jnp.max(jnp.abs(out - ref)))
    assert err < 5e-2, err

    print("KERNEL_OK")
</pallas_src>

<mosaic_0001>
module attributes {stable_mosaic.version = 11 : i64} {
  func.func @conv_proj_kernel(%arg0: i32, %arg1: memref<16x1536xbf16, #tpu.memory_space<vmem>>, %arg2: memref<1536x256xbf16, #tpu.memory_space<vmem>>, %arg3: memref<1x256xf32, #tpu.memory_space<vmem>>, %arg4: memref<256x384xbf16, #tpu.memory_space<vmem>>, %arg5: memref<1x384xf32, #tpu.memory_space<vmem>>, %arg6: memref<16x384xbf16, #tpu.memory_space<vmem>>) attributes {dimension_semantics = [#tpu.dimension_semantics<parallel>], iteration_bounds = array<i64: 1>, scalar_prefetch = 0 : i64, scratch_operands = 0 : i64, tpu.core_type = #tpu.core_type<tc>, window_params = [{transform_indices = @transform_0, window_bounds = array<i64: 16, 1536>}, {pipeline_mode = #tpu.pipeline_mode<synchronous>, transform_indices = @transform_1, window_bounds = array<i64: 1536, 256>}, {pipeline_mode = #tpu.pipeline_mode<synchronous>, transform_indices = @transform_2, window_bounds = array<i64: 1, 256>}, {pipeline_mode = #tpu.pipeline_mode<synchronous>, transform_indices = @transform_3, window_bounds = array<i64: 256, 384>}, {pipeline_mode = #tpu.pipeline_mode<synchronous>, transform_indices = @transform_4, window_bounds = array<i64: 1, 384>}, {transform_indices = @transform_5, window_bounds = array<i64: 16, 384>}]} {
    %c0 = arith.constant 0 : index
    %c0_0 = arith.constant 0 : index
    %0 = vector.load %arg1[%c0, %c0_0] : memref<16x1536xbf16, #tpu.memory_space<vmem>>, vector<16x1536xbf16>
    %c0_1 = arith.constant 0 : index
    %c0_2 = arith.constant 0 : index
    %1 = vector.load %arg2[%c0_1, %c0_2] : memref<1536x256xbf16, #tpu.memory_space<vmem>>, vector<1536x256xbf16>
    %cst = arith.constant dense<0.000000e+00> : vector<16x256xf32>
    %2 = tpu.matmul %0, %1, %cst {dimension_numbers = #tpu.dot_dimension_numbers<[1], [0], [0], [1], [0, 0, 1, 1], [], []>} : vector<16x1536xbf16>, vector<1536x256xbf16>, vector<16x256xf32> -> vector<16x256xf32>
    %c0_3 = arith.constant 0 : index
    %c0_4 = arith.constant 0 : index
    %3 = vector.load %arg3[%c0_3, %c0_4] : memref<1x256xf32, #tpu.memory_space<vmem>>, vector<1x256xf32>
    %4 = vector.broadcast %3 : vector<1x256xf32> to vector<16x256xf32>
    %5 = arith.addf %2, %4 : vector<16x256xf32>
    %cst_5 = arith.constant 0.000000e+00 : f32
    %6 = vector.broadcast %cst_5 : f32 to vector<16x256xf32>
    %7 = arith.maximumf %5, %6 : vector<16x256xf32>
    %8 = arith.truncf %7 : vector<16x256xf32> to vector<16x256xbf16>
    %c0_6 = arith.constant 0 : index
    %c0_7 = arith.constant 0 : index
    %9 = vector.load %arg4[%c0_6, %c0_7] : memref<256x384xbf16, #tpu.memory_space<vmem>>, vector<256x384xbf16>
    %cst_8 = arith.constant dense<0.000000e+00> : vector<16x384xf32>
    %10 = tpu.matmul %8, %9, %cst_8 {dimension_numbers = #tpu.dot_dimension_numbers<[1], [0], [0], [1], [0, 0, 1, 1], [], []>} : vector<16x256xbf16>, vector<256x384xbf16>, vector<16x384xf32> -> vector<16x384xf32>
    %c0_9 = arith.constant 0 : index
    %c0_10 = arith.constant 0 : index
    %11 = vector.load %arg5[%c0_9, %c0_10] : memref<1x384xf32, #tpu.memory_space<vmem>>, vector<1x384xf32>
    %12 = vector.broadcast %11 : vector<1x384xf32> to vector<16x384xf32>
    %13 = arith.addf %10, %12 : vector<16x384xf32>
    %14 = arith.truncf %13 : vector<16x384xf32> to vector<16x384xbf16>
    %c0_11 = arith.constant 0 : index
    %c0_12 = arith.constant 0 : index
    %15 = vector.load %arg6[%c0_11, %c0_12] : memref<16x384xbf16, #tpu.memory_space<vmem>>, vector<16x384xbf16>
    tpu.vector_store %arg6[%c0_11, %c0_12], %14 {strides = array<i32>} : memref<16x384xbf16, #tpu.memory_space<vmem>>, vector<16x384xbf16>,
    return
  }
  func.func @transform_0(%arg0: i32) -> (i32, i32) {
    %c0_i32 = arith.constant 0 : i32
    %c0_i32_0 = arith.constant 0 : i32
    return %arg0, %c0_i32 : i32, i32
  }
  func.func @transform_1(%arg0: i32) -> (i32, i32) {
    %c0_i32 = arith.constant 0 : i32
    %c0_i32_0 = arith.constant 0 : i32
    %c0_i32_1 = arith.constant 0 : i32
    return %c0_i32, %c0_i32_0 : i32, i32
  }
  func.func @transform_2(%arg0: i32) -> (i32, i32) {
    %c0_i32 = arith.constant 0 : i32
    %c0_i32_0 = arith.constant 0 : i32
    %c0_i32_1 = arith.constant 0 : i32
    return %c0_i32, %c0_i32_0 : i32, i32
  }
  func.func @transform_3(%arg0: i32) -> (i32, i32) {
    %c0_i32 = arith.constant 0 : i32
    %c0_i32_0 = arith.constant 0 : i32
    %c0_i32_1 = arith.constant 0 : i32
    return %c0_i32, %c0_i32_0 : i32, i32
  }
  func.func @transform_4(%arg0: i32) -> (i32, i32) {
    %c0_i32 = arith.constant 0 : i32
    %c0_i32_0 = arith.constant 0 : i32
    %c0_i32_1 = arith.constant 0 : i32
    return %c0_i32, %c0_i32_0 : i32, i32
  }
  func.func @transform_5(%arg0: i32) -> (i32, i32) {
    %c0_i32 = arith.constant 0 : i32
    %c0_i32_0 = arith.constant 0 : i32
    return %arg0, %c0_i32 : i32, i32
  }
}

module attributes {stable_mosaic.version = 11 : i64} {
  func.func @recurrent_kernel(%arg0: i32, %arg1: memref<8x2x384xbf16, #tpu.memory_space<vmem>>, %arg2: memref<128x384xbf16, #tpu.memory_space<vmem>>, %arg3: memref<1x384xf32, #tpu.memory_space<vmem>>, %arg4: memref<128x384xbf16, #tpu.memory_space<vmem>>, %arg5: memref<1x384xf32, #tpu.memory_space<vmem>>, %arg6: memref<128x384xbf16, #tpu.memory_space<vmem>>, %arg7: memref<1x384xf32, #tpu.memory_space<vmem>>, %arg8: memref<8x2x128xbf16, #tpu.memory_space<vmem>>) attributes {dimension_semantics = [#tpu.dimension_semantics<parallel>], iteration_bounds = array<i64: 1>, scalar_prefetch = 0 : i64, scratch_operands = 0 : i64, tpu.core_type = #tpu.core_type<tc>, window_params = [{transform_indices = @transform_0, window_bounds = array<i64: 8, 2, 384>}, {pipeline_mode = #tpu.pipeline_mode<synchronous>, transform_indices = @transform_1, window_bounds = array<i64: 128, 384>}, {pipeline_mode = #tpu.pipeline_mode<synchronous>, transform_indices = @transform_2, window_bounds = array<i64: 1, 384>}, {pipeline_mode = #tpu.pipeline_mode<synchronous>, transform_indices = @transform_3, window_bounds = array<i64: 128, 384>}, {pipeline_mode = #tpu.pipeline_mode<synchronous>, transform_indices = @transform_4, window_bounds = array<i64: 1, 384>}, {pipeline_mode = #tpu.pipeline_mode<synchronous>, transform_indices = @transform_5, window_bounds = array<i64: 128, 384>}, {pipeline_mode = #tpu.pipeline_mode<synchronous>, transform_indices = @transform_6, window_bounds = array<i64: 1, 384>}, {transform_indices = @transform_7, window_bounds = array<i64: 8, 2, 128>}]} {
    %c0 = arith.constant 0 : index
    %c0_0 = arith.constant 0 : index
    %0 = vector.load %arg2[%c0, %c0_0] : memref<128x384xbf16, #tpu.memory_space<vmem>>, vector<128x384xbf16>
    %c0_1 = arith.constant 0 : index
    %c0_2 = arith.constant 0 : index
    %1 = vector.load %arg4[%c0_1, %c0_2] : memref<128x384xbf16, #tpu.memory_space<vmem>>, vector<128x384xbf16>
    %c0_3 = arith.constant 0 : index
    %c0_4 = arith.constant 0 : index
    %2 = vector.load %arg6[%c0_3, %c0_4] : memref<128x384xbf16, #tpu.memory_space<vmem>>, vector<128x384xbf16>
    %c0_5 = arith.constant 0 : index
    %c0_6 = arith.constant 0 : index
    %3 = vector.load %arg3[%c0_5, %c0_6] : memref<1x384xf32, #tpu.memory_space<vmem>>, vector<1x384xf32>
    %4 = vector.shape_cast %3 : vector<1x384xf32> to vector<1x384xf32>
    %5 = vector.broadcast %4 : vector<1x384xf32> to vector<2x384xf32>
    %c0_7 = arith.constant 0 : index
    %c0_8 = arith.constant 0 : index
    %6 = vector.load %arg5[%c0_7, %c0_8] : memref<1x384xf32, #tpu.memory_space<vmem>>, vector<1x384xf32>
    %7 = vector.shape_cast %6 : vector<1x384xf32> to vector<1x384xf32>
    %8 = vector.broadcast %7 : vector<1x384xf32> to vector<2x384xf32>
    %c0_9 = arith.constant 0 : index
    %c0_10 = arith.constant 0 : index
    %9 = vector.load %arg7[%c0_9, %c0_10] : memref<1x384xf32, #tpu.memory_space<vmem>>, vector<1x384xf32>
    %10 = vector.shape_cast %9 : vector<1x384xf32> to vector<1x384xf32>
    %11 = vector.broadcast %10 : vector<1x384xf32> to vector<2x384xf32>
    %cst = arith.constant 0.000000e+00 : f32
    %12 = vector.broadcast %cst : f32 to vector<2x128xf32>
    %c0_i32 = arith.constant 0 : i32
    %13 = arith.index_cast %c0_i32 : i32 to index
    %c0_11 = arith.constant 0 : index
    %c0_12 = arith.constant 0 : index
    %14 = vector.load %arg1[%13, %c0_11, %c0_12] : memref<8x2x384xbf16, #tpu.memory_space<vmem>>, vector<1x2x384xbf16>
    %15 = vector.shape_cast %14 : vector<1x2x384xbf16> to vector<2x384xbf16>
    %16 = arith.truncf %12 : vector<2x128xf32> to vector<2x128xbf16>
    %cst_13 = arith.constant dense<0.000000e+00> : vector<2x384xf32>
    %17 = tpu.matmul %16, %0, %cst_13 {dimension_numbers = #tpu.dot_dimension_numbers<[1], [0], [0], [1], [0, 0, 1, 1], [], []>} : vector<2x128xbf16>, vector<128x384xbf16>, vector<2x384xf32> -> vector<2x384xf32>
    %18 = arith.addf %17, %5 : vector<2x384xf32>
    %19 = vector.extract_strided_slice %15 {offsets = [0, 0], sizes = [2, 128], strides = [1, 1]} : vector<2x384xbf16> to vector<2x128xbf16>
    %20 = vector.extract_strided_slice %18 {offsets = [0, 0], sizes = [2, 128], strides = [1, 1]} : vector<2x384xf32> to vector<2x128xf32>
    %21 = arith.extf %19 : vector<2x128xbf16> to vector<2x128xf32>
    %22 = arith.addf %21, %20 : vector<2x128xf32>
    %23 = arith.negf %22 : vector<2x128xf32>
    %24 = math.exp %23 : vector<2x128xf32>
    %cst_14 = arith.constant 1.000000e+00 : f32
    %25 = vector.broadcast %cst_14 : f32 to vector<2x128xf32>
    %26 = arith.addf %25, %24 : vector<2x128xf32>
    %27 = arith.divf %25, %26 : vector<2x128xf32>
    %28 = vector.extract_strided_slice %15 {offsets = [0, 128], sizes = [2, 128], strides = [1, 1]} : vector<2x384xbf16> to vector<2x128xbf16>
    %29 = vector.extract_strided_slice %18 {offsets = [0, 128], sizes = [2, 128], strides = [1, 1]} : vector<2x384xf32> to vector<2x128xf32>
    %30 = arith.extf %28 : vector<2x128xbf16> to vector<2x128xf32>
    %31 = arith.addf %30, %29 : vector<2x128xf32>
    %32 = arith.negf %31 : vector<2x128xf32>
    %33 = math.exp %32 : vector<2x128xf32>
    %cst_15 = arith.constant 1.000000e+00 : f32
    %34 = vector.broadcast %cst_15 : f32 to vector<2x128xf32>
    %35 = arith.addf %34, %33 : vector<2x128xf32>
    %36 = arith.divf %34, %35 : vector<2x128xf32>
    %37 = vector.extract_strided_slice %15 {offsets = [0, 256], sizes = [2, 128], strides = [1, 1]} : vector<2x384xbf16> to vector<2x128xbf16>
    %38 = vector.extract_strided_slice %18 {offsets = [0, 256], sizes = [2, 128], strides = [1, 1]} : vector<2x384xf32> to vector<2x128xf32>
    %39 = arith.mulf %27, %38 : vector<2x128xf32>
    %40 = arith.extf %37 : vector<2x128xbf16> to vector<2x128xf32>
    %41 = arith.addf %40, %39 : vector<2x128xf32>
    %42 = math.tanh %41 : vector<2x128xf32>
    %cst_16 = arith.constant 1.000000e+00 : f32
    %43 = vector.broadcast %cst_16 : f32 to vector<2x128xf32>
    %44 = arith.subf %43, %36 : vector<2x128xf32>
    %45 = arith.mulf %44, %42 : vector<2x128xf32>
    %46 = arith.mulf %36, %12 : vector<2x128xf32>
    %47 = arith.addf %45, %46 : vector<2x128xf32>
    %48 = arith.truncf %47 : vector<2x128xf32> to vector<2x128xbf16>
    %cst_17 = arith.constant dense<0.000000e+00> : vector<2x384xf32>
    %49 = tpu.matmul %48, %1, %cst_17 {dimension_numbers = #tpu.dot_dimension_numbers<[1], [0], [0], [1], [0, 0, 1, 1], [], []>} : vector<2x128xbf16>, vector<128x384xbf16>, vector<2x384xf32> -> vector<2x384xf32>
    %50 = arith.addf %49, %8 : vector<2x384xf32>
    %51 = arith.truncf %12 : vector<2x128xf32> to vector<2x128xbf16>
    %cst_18 = arith.constant dense<0.000000e+00> : vector<2x384xf32>
    %52 = tpu.matmul %51, %2, %cst_18 {dimension_numbers = #tpu.dot_dimension_numbers<[1], [0], [0], [1], [0, 0, 1, 1], [], []>} : vector<2x128xbf16>, vector<128x384xbf16>, vector<2x384xf32> -> vector<2x384xf32>
    %53 = arith.addf %52, %11 : vector<2x384xf32>
    %54 = vector.extract_strided_slice %50 {offsets = [0, 0], sizes = [2, 128], strides = [1, 1]} : vector<2x384xf32> to vector<2x128xf32>
    %55 = vector.extract_strided_slice %53 {offsets = [0, 0], sizes = [2, 128], strides = [1, 1]} : vector<2x384xf32> to vector<2x128xf32>
    %56 = arith.addf %54, %55 : vector<2x128xf32>
    %57 = arith.negf %56 : vector<2x128xf32>
    %58 = math.exp %57 : vector<2x128xf32>
    %cst_19 = arith.constant 1.000000e+00 : f32
    %59 = vector.broadcast %cst_19 : f32 to vector<2x128xf32>
    %60 = arith.addf %59, %58 : vector<2x128xf32>
    %61 = arith.divf %59, %60 : vector<2x128xf32>
    %62 = vector.extract_strided_slice %50 {offsets = [0, 128], sizes = [2, 128], strides = [1, 1]} : vector<2x384xf32> to vector<2x128xf32>
    %63 = vector.extract_strided_slice %53 {offsets = [0, 128], sizes = [2, 128], strides = [1, 1]} : vector<2x384xf32> to vector<2x128xf32>
    %64 = arith.addf %62, %63 : vector<2x128xf32>
    %65 = arith.negf %64 : vector<2x128xf32>
    %66 = math.exp %65 : vector<2x128xf32>
    %cst_20 = arith.constant 1.000000e+00 : f32
    %67 = vector.broadcast %cst_20 : f32 to vector<2x128xf32>
    %68 = arith.addf %67, %66 : vector<2x128xf32>
    %69 = arith.divf %67, %68 : vector<2x128xf32>
    %70 = vector.extract_strided_slice %50 {offsets = [0, 256], sizes = [2, 128], strides = [1, 1]} : vector<2x384xf32> to vector<2x128xf32>
    %71 = vector.extract_strided_slice %53 {offsets = [0, 256], sizes = [2, 128], strides = [1, 1]} : vector<2x384xf32> to vector<2x128xf32>
    %72 = arith.mulf %61, %71 : vector<2x128xf32>
    %73 = arith.addf %70, %72 : vector<2x128xf32>
    %74 = math.tanh %73 : vector<2x128xf32>
    %cst_21 = arith.constant 1.000000e+00 : f32
    %75 = vector.broadcast %cst_21 : f32 to vector<2x128xf32>
    %76 = arith.subf %75, %69 : vector<2x128xf32>
    %77 = arith.mulf %76, %74 : vector<2x128xf32>
    %78 = arith.mulf %69, %12 : vector<2x128xf32>
    %79 = arith.addf %77, %78 : vector<2x128xf32>
    %80 = arith.truncf %79 : vector<2x128xf32> to vector<2x128xbf16>
    %81 = arith.index_cast %c0_i32 : i32 to index
    %c0_22 = arith.constant 0 : index
    %c0_23 = arith.constant 0 : index
    %82 = vector.load %arg8[%81, %c0_22, %c0_23] : memref<8x2x128xbf16, #tpu.memory_space<vmem>>, vector<1x2x128xbf16>
    %83 = vector.shape_cast %82 : vector<1x2x128xbf16> to vector<2x128xbf16>
    %84 = vector.shape_cast %80 : vector<2x128xbf16> to vector<1x2x128xbf16>
    tpu.vector_store %arg8[%81, %c0_22, %c0_23], %84 {strides = array<i32>} : memref<8x2x128xbf16, #tpu.memory_space<vmem>>, vector<1x2x128xbf16>,
    %c1_i32 = arith.constant 1 : i32
    %85 = arith.index_cast %c1_i32 : i32 to index
    %c0_24 = arith.constant 0 : index
    %c0_25 = arith.constant 0 : index
    %86 = vector.load %arg1[%85, %c0_24, %c0_25] : memref<8x2x384xbf16, #tpu.memory_space<vmem>>, vector<1x2x384xbf16>
    %87 = vector.shape_cast %86 : vector<1x2x384xbf16> to vector<2x384xbf16>
    %88 = arith.truncf %47 : vector<2x128xf32> to vector<2x128xbf16>
    %cst_26 = arith.constant dense<0.000000e+00> : vector<2x384xf32>
    %89 = tpu.matmul %88, %0, %cst_26 {dimension_numbers = #tpu.dot_dimension_numbers<[1], [0], [0], [1], [0, 0, 1, 1], [], []>} : vector<2x128xbf16>, vector<128x384xbf16>, vector<2x384xf32> -> vector<2x384xf32>
    %90 = arith.addf %89, %5 : vector<2x384xf32>
    %91 = vector.extract_strided_slice %87 {offsets = [0, 0], sizes = [2, 128], strides = [1, 1]} : vector<2x384xbf16> to vector<2x128xbf16>
    %92 = vector.extract_strided_slice %90 {offsets = [0, 0], sizes = [2, 128], strides = [1, 1]} : vector<2x384xf32> to vector<2x128xf32>
    %93 = arith.extf %91 : vector<2x128xbf16> to vector<2x128xf32>
    %94 = arith.addf %93, %92 : vector<2x128xf32>
    %95 = arith.negf %94 : vector<2x128xf32>
    %96 = math.exp %95 : vector<2x128xf32>
    %cst_27 = arith.constant 1.000000e+00 : f32
    %97 = vector.broadcast %cst_27 : f32 to vector<2x128xf32>
    %98 = arith.addf %97, %96 : vector<2x128xf32>
    %99 = arith.divf %97, %98 : vector<2x128xf32>
    %100 = vector.extract_strided_slice %87 {offsets = [0, 128], sizes = [2, 128], strides = [1, 1]} : vector<2x384xbf16> to vector<2x128xbf16>
    %101 = vector.extract_strided_slice %90 {offsets = [0, 128], sizes = [2, 128], strides = [1, 1]} : vector<2x384xf32> to vector<2x128xf32>
    %102 = arith.extf %100 : vector<2x128xbf16> to vector<2x128xf32>
    %103 = arith.addf %102, %101 : vector<2x128xf32>
    %104 = arith.negf %103 : vector<2x128xf32>
    %105 = math.exp %104 : vector<2x128xf32>
    %cst_28 = arith.constant 1.000000e+00 : f32
    %106 = vector.broadcast %cst_28 : f32 to vector<2x128xf32>
    %107 = arith.addf %106, %105 : vector<2x128xf32>
    %108 = arith.divf %106, %107 : vector<2x128xf32>
    %109 = vector.extract_strided_slice %87 {offsets = [0, 256], sizes = [2, 128], strides = [1, 1]} : vector<2x384xbf16> to vector<2x128xbf16>
    %110 = vector.extract_strided_slice %90 {offsets = [0, 256], sizes = [2, 128], strides = [1, 1]} : vector<2x384xf32> to vector<2x128xf32>
    %111 = arith.mulf %99, %110 : vector<2x128xf32>
    %112 = arith.extf %109 : vector<2x128xbf16> to vector<2x128xf32>
    %113 = arith.addf %112, %111 : vector<2x128xf32>
    %114 = math.tanh %113 : vector<2x128xf32>
    %cst_29 = arith.constant 1.000000e+00 : f32
    %115 = vector.broadcast %cst_29 : f32 to vector<2x128xf32>
    %116 = arith.subf %115, %108 : vector<2x128xf32>
    %117 = arith.mulf %116, %114 : vector<2x128xf32>
    %118 = arith.mulf %108, %47 : vector<2x128xf32>
    %119 = arith.addf %117, %118 : vector<2x128xf32>
    %120 = arith.truncf %119 : vector<2x128xf32> to vector<2x128xbf16>
    %cst_30 = arith.constant dense<0.000000e+00> : vector<2x384xf32>
    %121 = tpu.matmul %120, %1, %cst_30 {dimension_numbers = #tpu.dot_dimension_numbers<[1], [0], [0], [1], [0, 0, 1, 1], [], []>} : vector<2x128xbf16>, vector<128x384xbf16>, vector<2x384xf32> -> vector<2x384xf32>
    %122 = arith.addf %121, %8 : vector<2x384xf32>
    %123 = arith.truncf %79 : vector<2x128xf32> to vector<2x128xbf16>
    %cst_31 = arith.constant dense<0.000000e+00> : vector<2x384xf32>
    %124 = tpu.matmul %123, %2, %cst_31 {dimension_numbers = #tpu.dot_dimension_numbers<[1], [0], [0], [1], [0, 0, 1, 1], [], []>} : vector<2x128xbf16>, vector<128x384xbf16>, vector<2x384xf32> -> vector<2x384xf32>
    %125 = arith.addf %124, %11 : vector<2x384xf32>
    %126 = vector.extract_strided_slice %122 {offsets = [0, 0], sizes = [2, 128], strides = [1, 1]} : vector<2x384xf32> to vector<2x128xf32>
    %127 = vector.extract_strided_slice %125 {offsets = [0, 0], sizes = [2, 128], strides = [1, 1]} : vector<2x384xf32> to vector<2x128xf32>
    %128 = arith.addf %126, %127 : vector<2x128xf32>
    %129 = arith.negf %128 : vector<2x128xf32>
    %130 = math.exp %129 : vector<2x128xf32>
    %cst_32 = arith.constant 1.000000e+00 : f32
    %131 = vector.broadcast %cst_32 : f32 to vector<2x128xf32>
    %132 = arith.addf %131, %130 : vector<2x128xf32>
    %133 = arith.divf %131, %132 : vector<2x128xf32>
    %134 = vector.extract_strided_slice %122 {offsets = [0, 128], sizes = [2, 128], strides = [1, 1]} : vector<2x384xf32> to vector<2x128xf32>
    %135 = vector.extract_strided_slice %125 {offsets = [0, 128], sizes = [2, 128], strides = [1, 1]} : vector<2x384xf32> to vector<2x128xf32>
    %136 = arith.addf %134, %135 : vector<2x128xf32>
    %137 = arith.negf %136 : vector<2x128xf32>
    %138 = math.exp %137 : vector<2x128xf32>
    %cst_33 = arith.constant 1.000000e+00 : f32
    %139 = vector.broadcast %cst_33 : f32 to vector<2x128xf32>
    %140 = arith.addf %139, %138 : vector<2x128xf32>
    %141 = arith.divf %139, %140 : vector<2x128xf32>
    %142 = vector.extract_strided_slice %122 {offsets = [0, 256], sizes = [2, 128], strides = [1, 1]} : vector<2x384xf32> to vector<2x128xf32>
    %143 = vector.extract_strided_slice %125 {offsets = [0, 256], sizes = [2, 128], strides = [1, 1]} : vector<2x384xf32> to vector<2x128xf32>
    %144 = arith.mulf %133, %143 : vector<2x128xf32>
    %145 = arith.addf %142, %144 : vector<2x128xf32>
    %146 = math.tanh %145 : vector<2x128xf32>
    %cst_34 = arith.constant 1.000000e+00 : f32
    %147 = vector.broadcast %cst_34 : f32 to vector<2x128xf32>
    %148 = arith.subf %147, %141 : vector<2x128xf32>
    %149 = arith.mulf %148, %146 : vector<2x128xf32>
    %150 = arith.mulf %141, %79 : vector<2x128xf32>
    %151 = arith.addf %149, %150 : vector<2x128xf32>
    %152 = arith.truncf %151 : vector<2x128xf32> to vector<2x128xbf16>
    %153 = arith.index_cast %c1_i32 : i32 to index
    %c0_35 = arith.constant 0 : index
    %c0_36 = arith.constant 0 : index
    %154 = vector.load %arg8[%153, %c0_35, %c0_36] : memref<8x2x128xbf16, #tpu.memory_space<vmem>>, vector<1x2x128xbf16>
    %155 = vector.shape_cast %154 : vector<1x2x128xbf16> to vector<2x128xbf16>
    %156 = vector.shape_cast %152 : vector<2x128xbf16> to vector<1x2x128xbf16>
    tpu.vector_store %arg8[%153, %c0_35, %c0_36], %156 {strides = array<i32>} : memref<8x2x128xbf16, #tpu.memory_space<vmem>>, vector<1x2x128xbf16>,
    %c2_i32 = arith.constant 2 : i32
    %157 = arith.index_cast %c2_i32 : i32 to index
    %c0_37 = arith.constant 0 : index
    %c0_38 = arith.constant 0 : index
    %158 = vector.load %arg1[%157, %c0_37, %c0_38] : memref<8x2x384xbf16, #tpu.memory_space<vmem>>, vector<1x2x384xbf16>
    %159 = vector.shape_cast %158 : vector<1x2x384xbf16> to vector<2x384xbf16>
    %160 = arith.truncf %119 : vector<2x128xf32> to vector<2x128xbf16>
    %cst_39 = arith.constant dense<0.000000e+00> : vector<2x384xf32>
    %161 = tpu.matmul %160, %0, %cst_39 {dimension_numbers = #tpu.dot_dimension_numbers<[1], [0], [0], [1], [0, 0, 1, 1], [], []>} : vector<2x128xbf16>, vector<128x384xbf16>, vector<2x384xf32> -> vector<2x384xf32>
    %162 = arith.addf %161, %5 : vector<2x384xf32>
    %163 = vector.extract_strided_slice %159 {offsets = [0, 0], sizes = [2, 128], strides = [1, 1]} : vector<2x384xbf16> to vector<2x128xbf16>
    %164 = vector.extract_strided_slice %162 {offsets = [0, 0], sizes = [2, 128], strides = [1, 1]} : vector<2x384xf32> to vector<2x128xf32>
    %165 = arith.extf %163 : vector<2x128xbf16> to vector<2x128xf32>
    %166 = arith.addf %165, %164 : vector<2x128xf32>
    %167 = arith.negf %166 : vector<2x128xf32>
    %168 = math.exp %167 : vector<2x128xf32>
    %cst_40 = arith.constant 1.000000e+00 : f32
    %169 = vector.broadcast %cst_40 : f32 to vector<2x128xf32>
    %170 = arith.addf %169, %168 : vector<2x128xf32>
    %171 = arith.divf %169, %170 : vector<2x128xf32>
    %172 = vector.extract_strided_slice %159 {offsets = [0, 128], sizes = [2, 128], strides = [1, 1]} : vector<2x384xbf16> to vector<2x128xbf16>
    %173 = vector.extract_strided_slice %162 {offsets = [0, 128], sizes = [2, 128], strides = [1, 1]} : vector<2x384xf32> to vector<2x128xf32>
    %174 = arith.extf %172 : vector<2x128xbf16> to vector<2x128xf32>
    %175 = arith.addf %174, %173 : vector<2x128xf32>
    %176 = arith.negf %175 : vector<2x128xf32>
    %177 = math.exp %176 : vector<2x128xf32>
    %cst_41 = arith.constant 1.000000e+00 : f32
    %178 = vector.broadcast %cst_41 : f32 to vector<2x128xf32>
    %179 = arith.addf %178, %177 : vector<2x128xf32>
    %180 = arith.divf %178, %179 : vector<2x128xf32>
    %181 = vector.extract_strided_slice %159 {offsets = [0, 256], sizes = [2, 128], strides = [1, 1]} : vector<2x384xbf16> to vector<2x128xbf16>
    %182 = vector.extract_strided_slice %162 {offsets = [0, 256], sizes = [2, 128], strides = [1, 1]} : vector<2x384xf32> to vector<2x128xf32>
    %183 = arith.mulf %171, %182 : vector<2x128xf32>
    %184 = arith.extf %181 : vector<2x128xbf16> to vector<2x128xf32>
    %185 = arith.addf %184, %183 : vector<2x128xf32>
    %186 = math.tanh %185 : vector<2x128xf32>
    %cst_42 = arith.constant 1.000000e+00 : f32
    %187 = vector.broadcast %cst_42 : f32 to vector<2x128xf32>
    %188 = arith.subf %187, %180 : vector<2x128xf32>
    %189 = arith.mulf %188, %186 : vector<2x128xf32>
    %190 = arith.mulf %180, %119 : vector<2x128xf32>
    %191 = arith.addf %189, %190 : vector<2x128xf32>
    %192 = arith.truncf %191 : vector<2x128xf32> to vector<2x128xbf16>
    %cst_43 = arith.constant dense<0.000000e+00> : vector<2x384xf32>
    %193 = tpu.matmul %192, %1, %cst_43 {dimension_numbers = #tpu.dot_dimension_numbers<[1], [0], [0], [1], [0, 0, 1, 1], [], []>} : vector<2x128xbf16>, vector<128x384xbf16>, vector<2x384xf32> -> vector<2x384xf32>
    %194 = arith.addf %193, %8 : vector<2x384xf32>
    %195 = arith.truncf %151 : vector<2x128xf32> to vector<2x128xbf16>
    %cst_44 = arith.constant dense<0.000000e+00> : vector<2x384xf32>
    %196 = tpu.matmul %195, %2, %cst_44 {dimension_numbers = #tpu.dot_dimension_numbers<[1], [0], [0], [1], [0, 0, 1, 1], [], []>} : vector<2x128xbf16>, vector<128x384xbf16>, vector<2x384xf32> -> vector<2x384xf32>
    %197 = arith.addf %196, %11 : vector<2x384xf32>
    %198 = vector.extract_strided_slice %194 {offsets = [0, 0], sizes = [2, 128], strides = [1, 1]} : vector<2x384xf32> to vector<2x128xf32>
    %199 = vector.extract_strided_slice %197 {offsets = [0, 0], sizes = [2, 128], strides = [1, 1]} : vector<2x384xf32> to vector<2x128xf32>
    %200 = arith.addf %198, %199 : vector<2x128xf32>
    %201 = arith.negf %200 : vector<2x128xf32>
    %202 = math.exp %201 : vector<2x128xf32>
    %cst_45 = arith.constant 1.000000e+00 : f32
    %203 = vector.broadcast %cst_45 : f32 to vector<2x128xf32>
    %204 = arith.addf %203, %202 : vector<2x128xf32>
    %205 = arith.divf %203, %204 : vector<2x128xf32>
    %206 = vector.extract_strided_slice %194 {offsets = [0, 128], sizes = [2, 128], strides = [1, 1]} : vector<2x384xf32> to vector<2x128xf32>
    %207 = vector.extract_strided_slice %197 {offsets = [0, 128], sizes = [2, 128], strides = [1, 1]} : vector<2x384xf32> to vector<2x128xf32>
    %208 = arith.addf %206, %207 : vector<2x128xf32>
    %209 = arith.negf %208 : vector<2x128xf32>
    %210 = math.exp %209 : vector<2x128xf32>
    %cst_46 = arith.constant 1.000000e+00 : f32
    %211 = vector.broadcast %cst_46 : f32 to vector<2x128xf32>
    %212 = arith.addf %211, %210 : vector<2x128xf32>
    %213 = arith.divf %211, %212 : vector<2x128xf32>
    %214 = vector.extract_strided_slice %194 {offsets = [0, 256], sizes = [2, 128], strides = [1, 1]} : vector<2x384xf32> to vector<2x128xf32>
    %215 = vector.extract_strided_slice %197 {offsets = [0, 256], sizes = [2, 128], strides = [1, 1]} : vector<2x384xf32> to vector<2x128xf32>
    %216 = arith.mulf %205, %215 : vector<2x128xf32>
    %217 = arith.addf %214, %216 : vector<2x128xf32>
    %218 = math.tanh %217 : vector<2x128xf32>
    %cst_47 = arith.constant 1.000000e+00 : f32
    %219 = vector.broadcast %cst_47 : f32 to vector<2x128xf32>
    %220 = arith.subf %219, %213 : vector<2x128xf32>
    %221 = arith.mulf %220, %218 : vector<2x128xf32>
    %222 = arith.mulf %213, %151 : vector<2x128xf32>
    %223 = arith.addf %221, %222 : vector<2x128xf32>
    %224 = arith.truncf %223 : vector<2x128xf32> to vector<2x128xbf16>
    %225 = arith.index_cast %c2_i32 : i32 to index
    %c0_48 = arith.constant 0 : index
    %c0_49 = arith.constant 0 : index
    %226 = vector.load %arg8[%225, %c0_48, %c0_49] : memref<8x2x128xbf16, #tpu.memory_space<vmem>>, vector<1x2x128xbf16>
    %227 = vector.shape_cast %226 : vector<1x2x128xbf16> to vector<2x128xbf16>
    %228 = vector.shape_cast %224 : vector<2x128xbf16> to vector<1x2x128xbf16>
    tpu.vector_store %arg8[%225, %c0_48, %c0_49], %228 {strides = array<i32>} : memref<8x2x128xbf16, #tpu.memory_space<vmem>>, vector<1x2x128xbf16>,
    %c3_i32 = arith.constant 3 : i32
    %229 = arith.index_cast %c3_i32 : i32 to index
    %c0_50 = arith.constant 0 : index
    %c0_51 = arith.constant 0 : index
    %230 = vector.load %arg1[%229, %c0_50, %c0_51] : memref<8x2x384xbf16, #tpu.memory_space<vmem>>, vector<1x2x384xbf16>
    %231 = vector.shape_cast %230 : vector<1x2x384xbf16> to vector<2x384xbf16>
    %232 = arith.truncf %191 : vector<2x128xf32> to vector<2x128xbf16>
    %cst_52 = arith.constant dense<0.000000e+00> : vector<2x384xf32>
    %233 = tpu.matmul %232, %0, %cst_52 {dimension_numbers = #tpu.dot_dimension_numbers<[1], [0], [0], [1], [0, 0, 1, 1], [], []>} : vector<2x128xbf16>, vector<128x384xbf16>, vector<2x384xf32> -> vector<2x384xf32>
    %234 = arith.addf %233, %5 : vector<2x384xf32>
    %235 = vector.extract_strided_slice %231 {offsets = [0, 0], sizes = [2, 128], strides = [1, 1]} : vector<2x384xbf16> to vector<2x128xbf16>
    %236 = vector.extract_strided_slice %234 {offsets = [0, 0], sizes = [2, 128], strides = [1, 1]} : vector<2x384xf32> to vector<2x128xf32>
    %237 = arith.extf %235 : vector<2x128xbf16> to vector<2x128xf32>
    %238 = arith.addf %237, %236 : vector<2x128xf32>
    %239 = arith.negf %238 : vector<2x128xf32>
    %240 = math.exp %239 : vector<2x128xf32>
    %cst_53 = arith.constant 1.000000e+00 : f32
    %241 = vector.broadcast %cst_53 : f32 to vector<2x128xf32>
    %242 = arith.addf %241, %240 : vector<2x128xf32>
    %243 = arith.divf %241, %242 : vector<2x128xf32>
    %244 = vector.extract_strided_slice %231 {offsets = [0, 128], sizes = [2, 128], strides = [1, 1]} : vector<2x384xbf16> to vector<2x128xbf16>
    %245 = vector.extract_strided_slice %234 {offsets = [0, 128], sizes = [2, 128], strides = [1, 1]} : vector<2x384xf32> to vector<2x128xf32>
    %246 = arith.extf %244 : vector<2x128xbf16> to vector<2x128xf32>
    %247 = arith.addf %246, %245 : vector<2x128xf32>
    %248 = arith.negf %247 : vector<2x128xf32>
    %249 = math.exp %248 : vector<2x128xf32>
    %cst_54 = arith.constant 1.000000e+00 : f32
    %250 = vector.broadcast %cst_54 : f32 to vector<2x128xf32>
    %251 = arith.addf %250, %249 : vector<2x128xf32>
    %252 = arith.divf %250, %251 : vector<2x128xf32>
    %253 = vector.extract_strided_slice %231 {offsets = [0, 256], sizes = [2, 128], strides = [1, 1]} : vector<2x384xbf16> to vector<2x128xbf16>
    %254 = vector.extract_strided_slice %234 {offsets = [0, 256], sizes = [2, 128], strides = [1, 1]} : vector<2x384xf32> to vector<2x128xf32>
    %255 = arith.mulf %243, %254 : vector<2x128xf32>
    %256 = arith.extf %253 : vector<2x128xbf16> to vector<2x128xf32>
    %257 = arith.addf %256, %255 : vector<2x128xf32>
    %258 = math.tanh %257 : vector<2x128xf32>
    %cst_55 = arith.constant 1.000000e+00 : f32
    %259 = vector.broadcast %cst_55 : f32 to vector<2x128xf32>
    %260 = arith.subf %259, %252 : vector<2x128xf32>
    %261 = arith.mulf %260, %258 : vector<2x128xf32>
    %262 = arith.mulf %252, %191 : vector<2x128xf32>
    %263 = arith.addf %261, %262 : vector<2x128xf32>
    %264 = arith.truncf %263 : vector<2x128xf32> to vector<2x128xbf16>
    %cst_56 = arith.constant dense<0.000000e+00> : vector<2x384xf32>
    %265 = tpu.matmul %264, %1, %cst_56 {dimension_numbers = #tpu.dot_dimension_numbers<[1], [0], [0], [1], [0, 0, 1, 1], [], []>} : vector<2x128xbf16>, vector<128x384xbf16>, vector<2x384xf32> -> vector<2x384xf32>
    %266 = arith.addf %265, %8 : vector<2x384xf32>
    %267 = arith.truncf %223 : vector<2x128xf32> to vector<2x128xbf16>
    %cst_57 = arith.constant dense<0.000000e+00> : vector<2x384xf32>
    %268 = tpu.matmul %267, %2, %cst_57 {dimension_numbers = #tpu.dot_dimension_numbers<[1], [0], [0], [1], [0, 0, 1, 1], [], []>} : vector<2x128xbf16>, vector<128x384xbf16>, vector<2x384xf32> -> vector<2x384xf32>
    %269 = arith.addf %268, %11 : vector<2x384xf32>
    %270 = vector.extract_strided_slice %266 {offsets = [0, 0], sizes = [2, 128], strides = [1, 1]} : vector<2x384xf32> to vector<2x128xf32>
    %271 = vector.extract_strided_slice %269 {offsets = [0, 0], sizes = [2, 128], strides = [1, 1]} : vector<2x384xf32> to vector<2x128xf32>
    %272 = arith.addf %270, %271 : vector<2x128xf32>
    %273 = arith.negf %272 : vector<2x128xf32>
    %274 = math.exp %273 : vector<2x128xf32>
    %cst_58 = arith.constant 1.000000e+00 : f32
    %275 = vector.broadcast %cst_58 : f32 to vector<2x128xf32>
    %276 = arith.addf %275, %274 : vector<2x128xf32>
    %277 = arith.divf %275, %276 : vector<2x128xf32>
    %278 = vector.extract_strided_slice %266 {offsets = [0, 128], sizes = [2, 128], strides = [1, 1]} : vector<2x384xf32> to vector<2x128xf32>
    %279 = vector.extract_strided_slice %269 {offsets = [0, 128], sizes = [2, 128], strides = [1, 1]} : vector<2x384xf32> to vector<2x128xf32>
    %280 = arith.addf %278, %279 : vector<2x128xf32>
    %281 = arith.negf %280 : vector<2x128xf32>
    %282 = math.exp %281 : vector<2x128xf32>
    %cst_59 = arith.constant 1.000000e+00 : f32
    %283 = vector.broadcast %cst_59 : f32 to vector<2x128xf32>
    %284 = arith.addf %283, %282 : vector<2x128xf32>
    %285 = arith.divf %283, %284 : vector<2x128xf32>
    %286 = vector.extract_strided_slice %266 {offsets = [0, 256], sizes = [2, 128], strides = [1, 1]} : vector<2x384xf32> to vector<2x128xf32>
    %287 = vector.extract_strided_slice %269 {offsets = [0, 256], sizes = [2, 128], strides = [1, 1]} : vector<2x384xf32> to vector<2x128xf32>
    %288 = arith.mulf %277, %287 : vector<2x128xf32>
    %289 = arith.addf %286, %288 : vector<2x128xf32>
    %290 = math.tanh %289 : vector<2x128xf32>
    %cst_60 = arith.constant 1.000000e+00 : f32
    %291 = vector.broadcast %cst_60 : f32 to vector<2x128xf32>
    %292 = arith.subf %291, %285 : vector<2x128xf32>
    %293 = arith.mulf %292, %290 : vector<2x128xf32>
    %294 = arith.mulf %285, %223 : vector<2x128xf32>
    %295 = arith.addf %293, %294 : vector<2x128xf32>
    %296 = arith.truncf %295 : vector<2x128xf32> to vector<2x128xbf16>
    %297 = arith.index_cast %c3_i32 : i32 to index
    %c0_61 = arith.constant 0 : index
    %c0_62 = arith.constant 0 : index
    %298 = vector.load %arg8[%297, %c0_61, %c0_62] : memref<8x2x128xbf16, #tpu.memory_space<vmem>>, vector<1x2x128xbf16>
    %299 = vector.shape_cast %298 : vector<1x2x128xbf16> to vector<2x128xbf16>
    %300 = vector.shape_cast %296 : vector<2x128xbf16> to vector<1x2x128xbf16>
    tpu.vector_store %arg8[%297, %c0_61, %c0_62], %300 {strides = array<i32>} : memref<8x2x128xbf16, #tpu.memory_space<vmem>>, vector<1x2x128xbf16>,
    %c4_i32 = arith.constant 4 : i32
    %301 = arith.index_cast %c4_i32 : i32 to index
    %c0_63 = arith.constant 0 : index
    %c0_64 = arith.constant 0 : index
    %302 = vector.load %arg1[%301, %c0_63, %c0_64] : memref<8x2x384xbf16, #tpu.memory_space<vmem>>, vector<1x2x384xbf16>
    %303 = vector.shape_cast %302 : vector<1x2x384xbf16> to vector<2x384xbf16>
    %304 = arith.truncf %263 : vector<2x128xf32> to vector<2x128xbf16>
    %cst_65 = arith.constant dense<0.000000e+00> : vector<2x384xf32>
    %305 = tpu.matmul %304, %0, %cst_65 {dimension_numbers = #tpu.dot_dimension_numbers<[1], [0], [0], [1], [0, 0, 1, 1], [], []>} : vector<2x128xbf16>, vector<128x384xbf16>, vector<2x384xf32> -> vector<2x384xf32>
    %306 = arith.addf %305, %5 : vector<2x384xf32>
    %307 = vector.extract_strided_slice %303 {offsets = [0, 0], sizes = [2, 128], strides = [1, 1]} : vector<2x384xbf16> to vector<2x128xbf16>
    %308 = vector.extract_strided_slice %306 {offsets = [0, 0], sizes = [2, 128], strides = [1, 1]} : vector<2x384xf32> to vector<2x128xf32>
    %309 = arith.extf %307 : vector<2x128xbf16> to vector<2x128xf32>
    %310 = arith.addf %309, %308 : vector<2x128xf32>
    %311 = arith.negf %310 : vector<2x128xf32>
    %312 = math.exp %311 : vector<2x128xf32>
    %cst_66 = arith.constant 1.000000e+00 : f32
    %313 = vector.broadcast %cst_66 : f32 to vector<2x128xf32>
    %314 = arith.addf %313, %312 : vector<2x128xf32>
    %315 = arith.divf %313, %314 : vector<2x128xf32>
    %316 = vector.extract_strided_slice %303 {offsets = [0, 128], sizes = [2, 128], strides = [1, 1]} : vector<2x384xbf16> to vector<2x128xbf16>
    %317 = vector.extract_strided_slice %306 {offsets = [0, 128], sizes = [2, 128], strides = [1, 1]} : vector<2x384xf32> to vector<2x128xf32>
    %318 = arith.extf %316 : vector<2x128xbf16> to vector<2x128xf32>
    %319 = arith.addf %318, %317 : vector<2x128xf32>
    %320 = arith.negf %319 : vector<2x128xf32>
    %321 = math.exp %320 : vector<2x128xf32>
    %cst_67 = arith.constant 1.000000e+00 : f32
    %322 = vector.broadcast %cst_67 : f32 to vector<2x128xf32>
    %323 = arith.addf %322, %321 : vector<2x128xf32>
    %324 = arith.divf %322, %323 : vector<2x128xf32>
    %325 = vector.extract_strided_slice %303 {offsets = [0, 256], sizes = [2, 128], strides = [1, 1]} : vector<2x384xbf16> to vector<2x128xbf16>
    %326 = vector.extract_strided_slice %306 {offsets = [0, 256], sizes = [2, 128], strides = [1, 1]} : vector<2x384xf32> to vector<2x128xf32>
    %327 = arith.mulf %315, %326 : vector<2x128xf32>
    %328 = arith.extf %325 : vector<2x128xbf16> to vector<2x128xf32>
    %329 = arith.addf %328, %327 : vector<2x128xf32>
    %330 = math.tanh %329 : vector<2x128xf32>
    %cst_68 = arith.constant 1.000000e+00 : f32
    %331 = vector.broadcast %cst_68 : f32 to vector<2x128xf32>
    %332 = arith.subf %331, %324 : vector<2x128xf32>
    %333 = arith.mulf %332, %330 : vector<2x128xf32>
    %334 = arith.mulf %324, %263 : vector<2x128xf32>
    %335 = arith.addf %333, %334 : vector<2x128xf32>
    %336 = arith.truncf %335 : vector<2x128xf32> to vector<2x128xbf16>
    %cst_69 = arith.constant dense<0.000000e+00> : vector<2x384xf32>
    %337 = tpu.matmul %336, %1, %cst_69 {dimension_numbers = #tpu.dot_dimension_numbers<[1], [0], [0], [1], [0, 0, 1, 1], [], []>} : vector<2x128xbf16>, vector<128x384xbf16>, vector<2x384xf32> -> vector<2x384xf32>
    %338 = arith.addf %337, %8 : vector<2x384xf32>
    %339 = arith.truncf %295 : vector<2x128xf32> to vector<2x128xbf16>
    %cst_70 = arith.constant dense<0.000000e+00> : vector<2x384xf32>
    %340 = tpu.matmul %339, %2, %cst_70 {dimension_numbers = #tpu.dot_dimension_numbers<[1], [0], [0], [1], [0, 0, 1, 1], [], []>} : vector<2x128xbf16>, vector<128x384xbf16>, vector<2x384xf32> -> vector<2x384xf32>
    %341 = arith.addf %340, %11 : vector<2x384xf32>
    %342 = vector.extract_strided_slice %338 {offsets = [0, 0], sizes = [2, 128], strides = [1, 1]} : vector<2x384xf32> to vector<2x128xf32>
    %343 = vector.extract_strided_slice %341 {offsets = [0, 0], sizes = [2, 128], strides = [1, 1]} : vector<2x384xf32> to vector<2x128xf32>
    %344 = arith.addf %342, %343 : vector<2x128xf32>
    %345 = arith.negf %344 : vector<2x128xf32>
    %346 = math.exp %345 : vector<2x128xf32>
    %cst_71 = arith.constant 1.000000e+00 : f32
    %347 = vector.broadcast %cst_71 : f32 to vector<2x128xf32>
    %348 = arith.addf %347, %346 : vector<2x128xf32>
    %349 = arith.divf %347, %348 : vector<2x128xf32>
    %350 = vector.extract_strided_slice %338 {offsets = [0, 128], sizes = [2, 128], strides = [1, 1]} : vector<2x384xf32> to vector<2x128xf32>
    %351 = vector.extract_strided_slice %341 {offsets = [0, 128], sizes = [2, 128], strides = [1, 1]} : vector<2x384xf32> to vector<2x128xf32>
    %352 = arith.addf %350, %351 : vector<2x128xf32>
    %353 = arith.negf %352 : vector<2x128xf32>
    %354 = math.exp %353 : vector<2x128xf32>
    %cst_72 = arith.constant 1.000000e+00 : f32
    %355 = vector.broadcast %cst_72 : f32 to vector<2x128xf32>
    %356 = arith.addf %355, %354 : vector<2x128xf32>
    %357 = arith.divf %355, %356 : vector<2x128xf32>
    %358 = vector.extract_strided_slice %338 {offsets = [0, 256], sizes = [2, 128], strides = [1, 1]} : vector<2x384xf32> to vector<2x128xf32>
    %359 = vector.extract_strided_slice %341 {offsets = [0, 256], sizes = [2, 128], strides = [1, 1]} : vector<2x384xf32> to vector<2x128xf32>
    %360 = arith.mulf %349, %359 : vector<2x128xf32>
    %361 = arith.addf %358, %360 : vector<2x128xf32>
    %362 = math.tanh %361 : vector<2x128xf32>
    %cst_73 = arith.constant 1.000000e+00 : f32
    %363 = vector.broadcast %cst_73 : f32 to vector<2x128xf32>
    %364 = arith.subf %363, %357 : vector<2x128xf32>
    %365 = arith.mulf %364, %362 : vector<2x128xf32>
    %366 = arith.mulf %357, %295 : vector<2x128xf32>
    %367 = arith.addf %365, %366 : vector<2x128xf32>
    %368 = arith.truncf %367 : vector<2x128xf32> to vector<2x128xbf16>
    %369 = arith.index_cast %c4_i32 : i32 to index
    %c0_74 = arith.constant 0 : index
    %c0_75 = arith.constant 0 : index
    %370 = vector.load %arg8[%369, %c0_74, %c0_75] : memref<8x2x128xbf16, #tpu.memory_space<vmem>>, vector<1x2x128xbf16>
    %371 = vector.shape_cast %370 : vector<1x2x128xbf16> to vector<2x128xbf16>
    %372 = vector.shape_cast %368 : vector<2x128xbf16> to vector<1x2x128xbf16>
    tpu.vector_store %arg8[%369, %c0_74, %c0_75], %372 {strides = array<i32>} : memref<8x2x128xbf16, #tpu.memory_space<vmem>>, vector<1x2x128xbf16>,
    %c5_i32 = arith.constant 5 : i32
    %373 = arith.index_cast %c5_i32 : i32 to index
    %c0_76 = arith.constant 0 : index
    %c0_77 = arith.constant 0 : index
    %374 = vector.load %arg1[%373, %c0_76, %c0_77] : memref<8x2x384xbf16, #tpu.memory_space<vmem>>, vector<1x2x384xbf16>
    %375 = vector.shape_cast %374 : vector<1x2x384xbf16> to vector<2x384xbf16>
    %376 = arith.truncf %335 : vector<2x128xf32> to vector<2x128xbf16>
    %cst_78 = arith.constant dense<0.000000e+00> : vector<2x384xf32>
    %377 = tpu.matmul %376, %0, %cst_78 {dimension_numbers = #tpu.dot_dimension_numbers<[1], [0], [0], [1], [0, 0, 1, 1], [], []>} : vector<2x128xbf16>, vector<128x384xbf16>, vector<2x384xf32> -> vector<2x384xf32>
    %378 = arith.addf %377, %5 : vector<2x384xf32>
    %379 = vector.extract_strided_slice %375 {offsets = [0, 0], sizes = [2, 128], strides = [1, 1]} : vector<2x384xbf16> to vector<2x128xbf16>
    %380 = vector.extract_strided_slice %378 {offsets = [0, 0], sizes = [2, 128], strides = [1, 1]} : vector<2x384xf32> to vector<2x128xf32>
    %381 = arith.extf %379 : vector<2x128xbf16> to vector<2x128xf32>
    %382 = arith.addf %381, %380 : vector<2x128xf32>
    %383 = arith.negf %382 : vector<2x128xf32>
    %384 = math.exp %383 : vector<2x128xf32>
    %cst_79 = arith.constant 1.000000e+00 : f32
    %385 = vector.broadcast %cst_79 : f32 to vector<2x128xf32>
    %386 = arith.addf %385, %384 : vector<2x128xf32>
    %387 = arith.divf %385, %386 : vector<2x128xf32>
    %388 = vector.extract_strided_slice %375 {offsets = [0, 128], sizes = [2, 128], strides = [1, 1]} : vector<2x384xbf16> to vector<2x128xbf16>
    %389 = vector.extract_strided_slice %378 {offsets = [0, 128], sizes = [2, 128], strides = [1, 1]} : vector<2x384xf32> to vector<2x128xf32>
    %390 = arith.extf %388 : vector<2x128xbf16> to vector<2x128xf32>
    %391 = arith.addf %390, %389 : vector<2x128xf32>
    %392 = arith.negf %391 : vector<2x128xf32>
    %393 = math.exp %392 : vector<2x128xf32>
    %cst_80 = arith.constant 1.000000e+00 : f32
    %394 = vector.broadcast %cst_80 : f32 to vector<2x128xf32>
    %395 = arith.addf %394, %393 : vector<2x128xf32>
    %396 = arith.divf %394, %395 : vector<2x128xf32>
    %397 = vector.extract_strided_slice %375 {offsets = [0, 256], sizes = [2, 128], strides = [1, 1]} : vector<2x384xbf16> to vector<2x128xbf16>
    %398 = vector.extract_strided_slice %378 {offsets = [0, 256], sizes = [2, 128], strides = [1, 1]} : vector<2x384xf32> to vector<2x128xf32>
    %399 = arith.mulf %387, %398 : vector<2x128xf32>
    %400 = arith.extf %397 : vector<2x128xbf16> to vector<2x128xf32>
    %401 = arith.addf %400, %399 : vector<2x128xf32>
    %402 = math.tanh %401 : vector<2x128xf32>
    %cst_81 = arith.constant 1.000000e+00 : f32
    %403 = vector.broadcast %cst_81 : f32 to vector<2x128xf32>
    %404 = arith.subf %403, %396 : vector<2x128xf32>
    %405 = arith.mulf %404, %402 : vector<2x128xf32>
    %406 = arith.mulf %396, %335 : vector<2x128xf32>
    %407 = arith.addf %405, %406 : vector<2x128xf32>
    %408 = arith.truncf %407 : vector<2x128xf32> to vector<2x128xbf16>
    %cst_82 = arith.constant dense<0.000000e+00> : vector<2x384xf32>
    %409 = tpu.matmul %408, %1, %cst_82 {dimension_numbers = #tpu.dot_dimension_numbers<[1], [0], [0], [1], [0, 0, 1, 1], [], []>} : vector<2x128xbf16>, vector<128x384xbf16>, vector<2x384xf32> -> vector<2x384xf32>
    %410 = arith.addf %409, %8 : vector<2x384xf32>
    %411 = arith.truncf %367 : vector<2x128xf32> to vector<2x128xbf16>
    %cst_83 = arith.constant dense<0.000000e+00> : vector<2x384xf32>
    %412 = tpu.matmul %411, %2, %cst_83 {dimension_numbers = #tpu.dot_dimension_numbers<[1], [0], [0], [1], [0, 0, 1, 1], [], []>} : vector<2x128xbf16>, vector<128x384xbf16>, vector<2x384xf32> -> vector<2x384xf32>
    %413 = arith.addf %412, %11 : vector<2x384xf32>
    %414 = vector.extract_strided_slice %410 {offsets = [0, 0], sizes = [2, 128], strides = [1, 1]} : vector<2x384xf32> to vector<2x128xf32>
    %415 = vector.extract_strided_slice %413 {offsets = [0, 0], sizes = [2, 128], strides = [1, 1]} : vector<2x384xf32> to vector<2x128xf32>
    %416 = arith.addf %414, %415 : vector<2x128xf32>
    %417 = arith.negf %416 : vector<2x128xf32>
    %418 = math.exp %417 : vector<2x128xf32>
    %cst_84 = arith.constant 1.000000e+00 : f32
    %419 = vector.broadcast %cst_84 : f32 to vector<2x128xf32>
    %420 = arith.addf %419, %418 : vector<2x128xf32>
    %421 = arith.divf %419, %420 : vector<2x128xf32>
    %422 = vector.extract_strided_slice %410 {offsets = [0, 128], sizes = [2, 128], strides = [1, 1]} : vector<2x384xf32> to vector<2x128xf32>
    %423 = vector.extract_strided_slice %413 {offsets = [0, 128], sizes = [2, 128], strides = [1, 1]} : vector<2x384xf32> to vector<2x128xf32>
    %424 = arith.addf %422, %423 : vector<2x128xf32>
    %425 = arith.negf %424 : vector<2x128xf32>
    %426 = math.exp %425 : vector<2x128xf32>
    %cst_85 = arith.constant 1.000000e+00 : f32
    %427 = vector.broadcast %cst_85 : f32 to vector<2x128xf32>
    %428 = arith.addf %427, %426 : vector<2x128xf32>
    %429 = arith.divf %427, %428 : vector<2x128xf32>
    %430 = vector.extract_strided_slice %410 {offsets = [0, 256], sizes = [2, 128], strides = [1, 1]} : vector<2x384xf32> to vector<2x128xf32>
    %431 = vector.extract_strided_slice %413 {offsets = [0, 256], sizes = [2, 128], strides = [1, 1]} : vector<2x384xf32> to vector<2x128xf32>
    %432 = arith.mulf %421, %431 : vector<2x128xf32>
    %433 = arith.addf %430, %432 : vector<2x128xf32>
    %434 = math.tanh %433 : vector<2x128xf32>
    %cst_86 = arith.constant 1.000000e+00 : f32
    %435 = vector.broadcast %cst_86 : f32 to vector<2x128xf32>
    %436 = arith.subf %435, %429 : vector<2x128xf32>
    %437 = arith.mulf %436, %434 : vector<2x128xf32>
    %438 = arith.mulf %429, %367 : vector<2x128xf32>
    %439 = arith.addf %437, %438 : vector<2x128xf32>
    %440 = arith.truncf %439 : vector<2x128xf32> to vector<2x128xbf16>
    %441 = arith.index_cast %c5_i32 : i32 to index
    %c0_87 = arith.constant 0 : index
    %c0_88 = arith.constant 0 : index
    %442 = vector.load %arg8[%441, %c0_87, %c0_88] : memref<8x2x128xbf16, #tpu.memory_space<vmem>>, vector<1x2x128xbf16>
    %443 = vector.shape_cast %442 : vector<1x2x128xbf16> to vector<2x128xbf16>
    %444 = vector.shape_cast %440 : vector<2x128xbf16> to vector<1x2x128xbf16>
    tpu.vector_store %arg8[%441, %c0_87, %c0_88], %444 {strides = array<i32>} : memref<8x2x128xbf16, #tpu.memory_space<vmem>>, vector<1x2x128xbf16>,
    %c6_i32 = arith.constant 6 : i32
    %445 = arith.index_cast %c6_i32 : i32 to index
    %c0_89 = arith.constant 0 : index
    %c0_90 = arith.constant 0 : index
    %446 = vector.load %arg1[%445, %c0_89, %c0_90] : memref<8x2x384xbf16, #tpu.memory_space<vmem>>, vector<1x2x384xbf16>
    %447 = vector.shape_cast %446 : vector<1x2x384xbf16> to vector<2x384xbf16>
    %448 = arith.truncf %407 : vector<2x128xf32> to vector<2x128xbf16>
    %cst_91 = arith.constant dense<0.000000e+00> : vector<2x384xf32>
    %449 = tpu.matmul %448, %0, %cst_91 {dimension_numbers = #tpu.dot_dimension_numbers<[1], [0], [0], [1], [0, 0, 1, 1], [], []>} : vector<2x128xbf16>, vector<128x384xbf16>, vector<2x384xf32> -> vector<2x384xf32>
    %450 = arith.addf %449, %5 : vector<2x384xf32>
    %451 = vector.extract_strided_slice %447 {offsets = [0, 0], sizes = [2, 128], strides = [1, 1]} : vector<2x384xbf16> to vector<2x128xbf16>
    %452 = vector.extract_strided_slice %450 {offsets = [0, 0], sizes = [2, 128], strides = [1, 1]} : vector<2x384xf32> to vector<2x128xf32>
    %453 = arith.extf %451 : vector<2x128xbf16> to vector<2x128xf32>
    %454 = arith.addf %453, %452 : vector<2x128xf32>
    %455 = arith.negf %454 : vector<2x128xf32>
    %456 = math.exp %455 : vector<2x128xf32>
    %cst_92 = arith.constant 1.000000e+00 : f32
    %457 = vector.broadcast %cst_92 : f32 to vector<2x128xf32>
    %458 = arith.addf %457, %456 : vector<2x128xf32>
    %459 = arith.divf %457, %458 : vector<2x128xf32>
    %460 = vector.extract_strided_slice %447 {offsets = [0, 128], sizes = [2, 128], strides = [1, 1]} : vector<2x384xbf16> to vector<2x128xbf16>
    %461 = vector.extract_strided_slice %450 {offsets = [0, 128], sizes = [2, 128], strides = [1, 1]} : vector<2x384xf32> to vector<2x128xf32>
    %462 = arith.extf %460 : vector<2x128xbf16> to vector<2x128xf32>
    %463 = arith.addf %462, %461 : vector<2x128xf32>
    %464 = arith.negf %463 : vector<2x128xf32>
    %465 = math.exp %464 : vector<2x128xf32>
    %cst_93 = arith.constant 1.000000e+00 : f32
    %466 = vector.broadcast %cst_93 : f32 to vector<2x128xf32>
    %467 = arith.addf %466, %465 : vector<2x128xf32>
    %468 = arith.divf %466, %467 : vector<2x128xf32>
    %469 = vector.extract_strided_slice %447 {offsets = [0, 256], sizes = [2, 128], strides = [1, 1]} : vector<2x384xbf16> to vector<2x128xbf16>
    %470 = vector.extract_strided_slice %450 {offsets = [0, 256], sizes = [2, 128], strides = [1, 1]} : vector<2x384xf32> to vector<2x128xf32>
    %471 = arith.mulf %459, %470 : vector<2x128xf32>
    %472 = arith.extf %469 : vector<2x128xbf16> to vector<2x128xf32>
    %473 = arith.addf %472, %471 : vector<2x128xf32>
    %474 = math.tanh %473 : vector<2x128xf32>
    %cst_94 = arith.constant 1.000000e+00 : f32
    %475 = vector.broadcast %cst_94 : f32 to vector<2x128xf32>
    %476 = arith.subf %475, %468 : vector<2x128xf32>
    %477 = arith.mulf %476, %474 : vector<2x128xf32>
    %478 = arith.mulf %468, %407 : vector<2x128xf32>
    %479 = arith.addf %477, %478 : vector<2x128xf32>
    %480 = arith.truncf %479 : vector<2x128xf32> to vector<2x128xbf16>
    %cst_95 = arith.constant dense<0.000000e+00> : vector<2x384xf32>
    %481 = tpu.matmul %480, %1, %cst_95 {dimension_numbers = #tpu.dot_dimension_numbers<[1], [0], [0], [1], [0, 0, 1, 1], [], []>} : vector<2x128xbf16>, vector<128x384xbf16>, vector<2x384xf32> -> vector<2x384xf32>
    %482 = arith.addf %481, %8 : vector<2x384xf32>
    %483 = arith.truncf %439 : vector<2x128xf32> to vector<2x128xbf16>
    %cst_96 = arith.constant dense<0.000000e+00> : vector<2x384xf32>
    %484 = tpu.matmul %483, %2, %cst_96 {dimension_numbers = #tpu.dot_dimension_numbers<[1], [0], [0], [1], [0, 0, 1, 1], [], []>} : vector<2x128xbf16>, vector<128x384xbf16>, vector<2x384xf32> -> vector<2x384xf32>
    %485 = arith.addf %484, %11 : vector<2x384xf32>
    %486 = vector.extract_strided_slice %482 {offsets = [0, 0], sizes = [2, 128], strides = [1, 1]} : vector<2x384xf32> to vector<2x128xf32>
    %487 = vector.extract_strided_slice %485 {offsets = [0, 0], sizes = [2, 128], strides = [1, 1]} : vector<2x384xf32> to vector<2x128xf32>
    %488 = arith.addf %486, %487 : vector<2x128xf32>
    %489 = arith.negf %488 : vector<2x128xf32>
    %490 = math.exp %489 : vector<2x128xf32>
    %cst_97 = arith.constant 1.000000e+00 : f32
    %491 = vector.broadcast %cst_97 : f32 to vector<2x128xf32>
    %492 = arith.addf %491, %490 : vector<2x128xf32>
    %493 = arith.divf %491, %492 : vector<2x128xf32>
    %494 = vector.extract_strided_slice %482 {offsets = [0, 128], sizes = [2, 128], strides = [1, 1]} : vector<2x384xf32> to vector<2x128xf32>
    %495 = vector.extract_strided_slice %485 {offsets = [0, 128], sizes = [2, 128], strides = [1, 1]} : vector<2x384xf32> to vector<2x128xf32>
    %496 = arith.addf %494, %495 : vector<2x128xf32>
    %497 = arith.negf %496 : vector<2x128xf32>
    %498 = math.exp %497 : vector<2x128xf32>
    %cst_98 = arith.constant 1.000000e+00 : f32
    %499 = vector.broadcast %cst_98 : f32 to vector<2x128xf32>
    %500 = arith.addf %499, %498 : vector<2x128xf32>
    %501 = arith.divf %499, %500 : vector<2x128xf32>
    %502 = vector.extract_strided_slice %482 {offsets = [0, 256], sizes = [2, 128], strides = [1, 1]} : vector<2x384xf32> to vector<2x128xf32>
    %503 = vector.extract_strided_slice %485 {offsets = [0, 256], sizes = [2, 128], strides = [1, 1]} : vector<2x384xf32> to vector<2x128xf32>
    %504 = arith.mulf %493, %503 : vector<2x128xf32>
    %505 = arith.addf %502, %504 : vector<2x128xf32>
    %506 = math.tanh %505 : vector<2x128xf32>
    %cst_99 = arith.constant 1.000000e+00 : f32
    %507 = vector.broadcast %cst_99 : f32 to vector<2x128xf32>
    %508 = arith.subf %507, %501 : vector<2x128xf32>
    %509 = arith.mulf %508, %506 : vector<2x128xf32>
    %510 = arith.mulf %501, %439 : vector<2x128xf32>
    %511 = arith.addf %509, %510 : vector<2x128xf32>
    %512 = arith.truncf %511 : vector<2x128xf32> to vector<2x128xbf16>
    %513 = arith.index_cast %c6_i32 : i32 to index
    %c0_100 = arith.constant 0 : index
    %c0_101 = arith.constant 0 : index
    %514 = vector.load %arg8[%513, %c0_100, %c0_101] : memref<8x2x128xbf16, #tpu.memory_space<vmem>>, vector<1x2x128xbf16>
    %515 = vector.shape_cast %514 : vector<1x2x128xbf16> to vector<2x128xbf16>
    %516 = vector.shape_cast %512 : vector<2x128xbf16> to vector<1x2x128xbf16>
    tpu.vector_store %arg8[%513, %c0_100, %c0_101], %516 {strides = array<i32>} : memref<8x2x128xbf16, #tpu.memory_space<vmem>>, vector<1x2x128xbf16>,
    %c7_i32 = arith.constant 7 : i32
    %517 = arith.index_cast %c7_i32 : i32 to index
    %c0_102 = arith.constant 0 : index
    %c0_103 = arith.constant 0 : index
    %518 = vector.load %arg1[%517, %c0_102, %c0_103] : memref<8x2x384xbf16, #tpu.memory_space<vmem>>, vector<1x2x384xbf16>
    %519 = vector.shape_cast %518 : vector<1x2x384xbf16> to vector<2x384xbf16>
    %520 = arith.truncf %479 : vector<2x128xf32> to vector<2x128xbf16>
    %cst_104 = arith.constant dense<0.000000e+00> : vector<2x384xf32>
    %521 = tpu.matmul %520, %0, %cst_104 {dimension_numbers = #tpu.dot_dimension_numbers<[1], [0], [0], [1], [0, 0, 1, 1], [], []>} : vector<2x128xbf16>, vector<128x384xbf16>, vector<2x384xf32> -> vector<2x384xf32>
    %522 = arith.addf %521, %5 : vector<2x384xf32>
    %523 = vector.extract_strided_slice %519 {offsets = [0, 0], sizes = [2, 128], strides = [1, 1]} : vector<2x384xbf16> to vector<2x128xbf16>
    %524 = vector.extract_strided_slice %522 {offsets = [0, 0], sizes = [2, 128], strides = [1, 1]} : vector<2x384xf32> to vector<2x128xf32>
    %525 = arith.extf %523 : vector<2x128xbf16> to vector<2x128xf32>
    %526 = arith.addf %525, %524 : vector<2x128xf32>
    %527 = arith.negf %526 : vector<2x128xf32>
    %528 = math.exp %527 : vector<2x128xf32>
    %cst_105 = arith.constant 1.000000e+00 : f32
    %529 = vector.broadcast %cst_105 : f32 to vector<2x128xf32>
    %530 = arith.addf %529, %528 : vector<2x128xf32>
    %531 = arith.divf %529, %530 : vector<2x128xf32>
    %532 = vector.extract_strided_slice %519 {offsets = [0, 128], sizes = [2, 128], strides = [1, 1]} : vector<2x384xbf16> to vector<2x128xbf16>
    %533 = vector.extract_strided_slice %522 {offsets = [0, 128], sizes = [2, 128], strides = [1, 1]} : vector<2x384xf32> to vector<2x128xf32>
    %534 = arith.extf %532 : vector<2x128xbf16> to vector<2x128xf32>
    %535 = arith.addf %534, %533 : vector<2x128xf32>
    %536 = arith.negf %535 : vector<2x128xf32>
    %537 = math.exp %536 : vector<2x128xf32>
    %cst_106 = arith.constant 1.000000e+00 : f32
    %538 = vector.broadcast %cst_106 : f32 to vector<2x128xf32>
    %539 = arith.addf %538, %537 : vector<2x128xf32>
    %540 = arith.divf %538, %539 : vector<2x128xf32>
    %541 = vector.extract_strided_slice %519 {offsets = [0, 256], sizes = [2, 128], strides = [1, 1]} : vector<2x384xbf16> to vector<2x128xbf16>
    %542 = vector.extract_strided_slice %522 {offsets = [0, 256], sizes = [2, 128], strides = [1, 1]} : vector<2x384xf32> to vector<2x128xf32>
    %543 = arith.mulf %531, %542 : vector<2x128xf32>
    %544 = arith.extf %541 : vector<2x128xbf16> to vector<2x128xf32>
    %545 = arith.addf %544, %543 : vector<2x128xf32>
    %546 = math.tanh %545 : vector<2x128xf32>
    %cst_107 = arith.constant 1.000000e+00 : f32
    %547 = vector.broadcast %cst_107 : f32 to vector<2x128xf32>
    %548 = arith.subf %547, %540 : vector<2x128xf32>
    %549 = arith.mulf %548, %546 : vector<2x128xf32>
    %550 = arith.mulf %540, %479 : vector<2x128xf32>
    %551 = arith.addf %549, %550 : vector<2x128xf32>
    %552 = arith.truncf %551 : vector<2x128xf32> to vector<2x128xbf16>
    %cst_108 = arith.constant dense<0.000000e+00> : vector<2x384xf32>
    %553 = tpu.matmul %552, %1, %cst_108 {dimension_numbers = #tpu.dot_dimension_numbers<[1], [0], [0], [1], [0, 0, 1, 1], [], []>} : vector<2x128xbf16>, vector<128x384xbf16>, vector<2x384xf32> -> vector<2x384xf32>
    %554 = arith.addf %553, %8 : vector<2x384xf32>
    %555 = arith.truncf %511 : vector<2x128xf32> to vector<2x128xbf16>
    %cst_109 = arith.constant dense<0.000000e+00> : vector<2x384xf32>
    %556 = tpu.matmul %555, %2, %cst_109 {dimension_numbers = #tpu.dot_dimension_numbers<[1], [0], [0], [1], [0, 0, 1, 1], [], []>} : vector<2x128xbf16>, vector<128x384xbf16>, vector<2x384xf32> -> vector<2x384xf32>
    %557 = arith.addf %556, %11 : vector<2x384xf32>
    %558 = vector.extract_strided_slice %554 {offsets = [0, 0], sizes = [2, 128], strides = [1, 1]} : vector<2x384xf32> to vector<2x128xf32>
    %559 = vector.extract_strided_slice %557 {offsets = [0, 0], sizes = [2, 128], strides = [1, 1]} : vector<2x384xf32> to vector<2x128xf32>
    %560 = arith.addf %558, %559 : vector<2x128xf32>
    %561 = arith.negf %560 : vector<2x128xf32>
    %562 = math.exp %561 : vector<2x128xf32>
    %cst_110 = arith.constant 1.000000e+00 : f32
    %563 = vector.broadcast %cst_110 : f32 to vector<2x128xf32>
    %564 = arith.addf %563, %562 : vector<2x128xf32>
    %565 = arith.divf %563, %564 : vector<2x128xf32>
    %566 = vector.extract_strided_slice %554 {offsets = [0, 128], sizes = [2, 128], strides = [1, 1]} : vector<2x384xf32> to vector<2x128xf32>
    %567 = vector.extract_strided_slice %557 {offsets = [0, 128], sizes = [2, 128], strides = [1, 1]} : vector<2x384xf32> to vector<2x128xf32>
    %568 = arith.addf %566, %567 : vector<2x128xf32>
    %569 = arith.negf %568 : vector<2x128xf32>
    %570 = math.exp %569 : vector<2x128xf32>
    %cst_111 = arith.constant 1.000000e+00 : f32
    %571 = vector.broadcast %cst_111 : f32 to vector<2x128xf32>
    %572 = arith.addf %571, %570 : vector<2x128xf32>
    %573 = arith.divf %571, %572 : vector<2x128xf32>
    %574 = vector.extract_strided_slice %554 {offsets = [0, 256], sizes = [2, 128], strides = [1, 1]} : vector<2x384xf32> to vector<2x128xf32>
    %575 = vector.extract_strided_slice %557 {offsets = [0, 256], sizes = [2, 128], strides = [1, 1]} : vector<2x384xf32> to vector<2x128xf32>
    %576 = arith.mulf %565, %575 : vector<2x128xf32>
    %577 = arith.addf %574, %576 : vector<2x128xf32>
    %578 = math.tanh %577 : vector<2x128xf32>
    %cst_112 = arith.constant 1.000000e+00 : f32
    %579 = vector.broadcast %cst_112 : f32 to vector<2x128xf32>
    %580 = arith.subf %579, %573 : vector<2x128xf32>
    %581 = arith.mulf %580, %578 : vector<2x128xf32>
    %582 = arith.mulf %573, %511 : vector<2x128xf32>
    %583 = arith.addf %581, %582 : vector<2x128xf32>
    %584 = arith.truncf %583 : vector<2x128xf32> to vector<2x128xbf16>
    %585 = arith.index_cast %c7_i32 : i32 to index
    %c0_113 = arith.constant 0 : index
    %c0_114 = arith.constant 0 : index
    %586 = vector.load %arg8[%585, %c0_113, %c0_114] : memref<8x2x128xbf16, #tpu.memory_space<vmem>>, vector<1x2x128xbf16>
    %587 = vector.shape_cast %586 : vector<1x2x128xbf16> to vector<2x128xbf16>
    %588 = vector.shape_cast %584 : vector<2x128xbf16> to vector<1x2x128xbf16>
    tpu.vector_store %arg8[%585, %c0_113, %c0_114], %588 {strides = array<i32>} : memref<8x2x128xbf16, #tpu.memory_space<vmem>>, vector<1x2x128xbf16>,
    %c8_i32 = arith.constant 8 : i32
    return
  }
  func.func @transform_0(%arg0: i32) -> (i32, i32, i32) {
    %c0_i32 = arith.constant 0 : i32
    %c0_i32_0 = arith.constant 0 : i32
    %c0_i32_1 = arith.constant 0 : i32
    return %c0_i32, %arg0, %c0_i32_0 : i32, i32, i32
  }
  func.func @transform_1(%arg0: i32) -> (i32, i32) {
    %c0_i32 = arith.constant 0 : i32
    %c0_i32_0 = arith.constant 0 : i32
    %c0_i32_1 = arith.constant 0 : i32
    return %c0_i32, %c0_i32_0 : i32, i32
  }
  func.func @transform_2(%arg0: i32) -> (i32, i32) {
    %c0_i32 = arith.constant 0 : i32
    %c0_i32_0 = arith.constant 0 : i32
    %c0_i32_1 = arith.constant 0 : i32
    return %c0_i32, %c0_i32_0 : i32, i32
  }
  func.func @transform_3(%arg0: i32) -> (i32, i32) {
    %c0_i32 = arith.constant 0 : i32
    %c0_i32_0 = arith.constant 0 : i32
    %c0_i32_1 = arith.constant 0 : i32
    return %c0_i32, %c0_i32_0 : i32, i32
  }
  func.func @transform_4(%arg0: i32) -> (i32, i32) {
    %c0_i32 = arith.constant 0 : i32
    %c0_i32_0 = arith.constant 0 : i32
    %c0_i32_1 = arith.constant 0 : i32
    return %c0_i32, %c0_i32_0 : i32, i32
  }
  func.func @transform_5(%arg0: i32) -> (i32, i32) {
    %c0_i32 = arith.constant 0 : i32
    %c0_i32_0 = arith.constant 0 : i32
    %c0_i32_1 = arith.constant 0 : i32
    return %c0_i32, %c0_i32_0 : i32, i32
  }
  func.func @transform_6(%arg0: i32) -> (i32, i32) {
    %c0_i32 = arith.constant 0 : i32
    %c0_i32_0 = arith.constant 0 : i32
    %c0_i32_1 = arith.constant 0 : i32
    return %c0_i32, %c0_i32_0 : i32, i32
  }
  func.func @transform_7(%arg0: i32) -> (i32, i32, i32) {
    %c0_i32 = arith.constant 0 : i32
    %c0_i32_0 = arith.constant 0 : i32
    %c0_i32_1 = arith.constant 0 : i32
    return %c0_i32, %arg0, %c0_i32_0 : i32, i32, i32
  }
}

module attributes {stable_mosaic.version = 11 : i64} {
  func.func @head_kernel(%arg0: i32, %arg1: memref<16x128xbf16, #tpu.memory_space<vmem>>, %arg2: memref<128x128xbf16, #tpu.memory_space<vmem>>, %arg3: memref<1x128xf32, #tpu.memory_space<vmem>>, %arg4: memref<16x128xbf16, #tpu.memory_space<vmem>>) attributes {dimension_semantics = [#tpu.dimension_semantics<parallel>], iteration_bounds = array<i64: 1>, scalar_prefetch = 0 : i64, scratch_operands = 0 : i64, tpu.core_type = #tpu.core_type<tc>, window_params = [{transform_indices = @transform_0, window_bounds = array<i64: 16, 128>}, {pipeline_mode = #tpu.pipeline_mode<synchronous>, transform_indices = @transform_1, window_bounds = array<i64: 128, 128>}, {pipeline_mode = #tpu.pipeline_mode<synchronous>, transform_indices = @transform_2, window_bounds = array<i64: 1, 128>}, {transform_indices = @transform_3, window_bounds = array<i64: 16, 128>}]} {
    %c0 = arith.constant 0 : index
    %c0_0 = arith.constant 0 : index
    %0 = vector.load %arg1[%c0, %c0_0] : memref<16x128xbf16, #tpu.memory_space<vmem>>, vector<16x128xbf16>
    %c0_1 = arith.constant 0 : index
    %c0_2 = arith.constant 0 : index
    %1 = vector.load %arg2[%c0_1, %c0_2] : memref<128x128xbf16, #tpu.memory_space<vmem>>, vector<128x128xbf16>
    %cst = arith.constant dense<0.000000e+00> : vector<16x128xf32>
    %2 = tpu.matmul %0, %1, %cst {dimension_numbers = #tpu.dot_dimension_numbers<[1], [0], [0], [1], [0, 0, 1, 1], [], []>} : vector<16x128xbf16>, vector<128x128xbf16>, vector<16x128xf32> -> vector<16x128xf32>
    %c0_3 = arith.constant 0 : index
    %c0_4 = arith.constant 0 : index
    %3 = vector.load %arg3[%c0_3, %c0_4] : memref<1x128xf32, #tpu.memory_space<vmem>>, vector<1x128xf32>
    %4 = vector.broadcast %3 : vector<1x128xf32> to vector<16x128xf32>
    %5 = arith.addf %2, %4 : vector<16x128xf32>
    %6 = arith.negf %5 : vector<16x128xf32>
    %7 = math.exp %6 : vector<16x128xf32>
    %cst_5 = arith.constant 1.000000e+00 : f32
    %8 = vector.broadcast %cst_5 : f32 to vector<16x128xf32>
    %9 = arith.addf %8, %7 : vector<16x128xf32>
    %10 = arith.divf %8, %9 : vector<16x128xf32>
    %11 = arith.truncf %10 : vector<16x128xf32> to vector<16x128xbf16>
    %c0_6 = arith.constant 0 : index
    %c0_7 = arith.constant 0 : index
    %12 = vector.load %arg4[%c0_6, %c0_7] : memref<16x128xbf16, #tpu.memory_space<vmem>>, vector<16x128xbf16>
    tpu.vector_store %arg4[%c0_6, %c0_7], %11 {strides = array<i32>} : memref<16x128xbf16, #tpu.memory_space<vmem>>, vector<16x128xbf16>,
    return
  }
  func.func @transform_0(%arg0: i32) -> (i32, i32) {
    %c0_i32 = arith.constant 0 : i32
    %c0_i32_0 = arith.constant 0 : i32
    return %arg0, %c0_i32 : i32, i32
  }
  func.func @transform_1(%arg0: i32) -> (i32, i32) {
    %c0_i32 = arith.constant 0 : i32
    %c0_i32_0 = arith.constant 0 : i32
    %c0_i32_1 = arith.constant 0 : i32
    return %c0_i32, %c0_i32_0 : i32, i32
  }
  func.func @transform_2(%arg0: i32) -> (i32, i32) {
    %c0_i32 = arith.constant 0 : i32
    %c0_i32_0 = arith.constant 0 : i32
    %c0_i32_1 = arith.constant 0 : i32
    return %c0_i32, %c0_i32_0 : i32, i32
  }
  func.func @transform_3(%arg0: i32) -> (i32, i32) {
    %c0_i32 = arith.constant 0 : i32
    %c0_i32_0 = arith.constant 0 : i32
    return %arg0, %c0_i32 : i32, i32
  }
}

</mosaic_0001>

<bundles_post_ra>
// kernel: network_forward.5
= control target key start
LH: loop header
LB: loop body
LE: loop exit
PB: predicated region body
PF: predicated region fallthrough
CT: control target
= control target key end

     0   :  { %v230_v0 = vmov 0.0   ;;  %vm231_vm0 = vmmov 0   ;;  %s285_s1 = inlined_call_operand.vmem [shape: bf16[128,128], index: 1, kind: input, shape index: {}]   ;;  %s286_s0 = inlined_call_operand.vmem [shape: bf16[16,128], index: 0, kind: input, shape index: {}]   ;;  %s287_s2 = inlined_call_operand.vmem [shape: f32[1,128], index: 2, kind: input, shape index: {}]   ;;  %s288_s3 = inlined_call_operand.vmem [shape: bf16[16,128], index: 3, kind: output, shape index: {}]  }
   0x1   :  { %191 = vmatprep.subr.bf16.mxu0 %v230_v0  ;;  %v213_v1 = vld [vmem:[%s285_s1 + $0x38] sm:$0xff]   ;;  %207 = vmatprep.mubr.msk.bf16.mxu0 %vm231_vm0, %v230_v0  ;;  %v214_v2 = vld [vmem:[%s285_s1 + $0x30] sm:$0xff]   ;;  %v215_v3 = vld [vmem:[%s285_s1 + $0x28] sm:$0xff]  }
   0x2   :  { %192 = vmatpush3.bf16.msra.mxu0 %v213_v1  ;;  %v216_v4 = vld [vmem:[%s285_s1 + $0x20] sm:$0xff]   ;;  %v217_v5 = vld [vmem:[%s285_s1 + $0x18] sm:$0xff]   ;;  %v218_v6 = vld [vmem:[%s285_s1 + $0x10] sm:$0xff]  }
   0x3   :  { %193 = vmatprep.subr.bf16.mxu0 %v230_v0  ;;  %v219_v7 = vld [vmem:[%s285_s1 + $0x8] sm:$0xff]   ;;  %v220_v8 = vld [vmem:[%s285_s1] sm:$0xff]  }
   0x4   :  { %v221_v9 = vld [vmem:[%s286_s0] sm:$0xff]  }
   0x5   :  { %v161_v10 = vld [vmem:[%s287_s2] ss:$0 sm:$0xff] }
   0x6   :  { %194 = vmatpush3.bf16.msra.mxu0 %v214_v2 }
   0x7   :  { %195 = vmatprep.subr.bf16.mxu0 %v230_v0 }
   0xa   :  { %196 = vmatpush3.bf16.msra.mxu0 %v215_v3 }
   0xb   :  { %197 = vmatprep.subr.bf16.mxu0 %v230_v0 }
   0xe   :  { %198 = vmatpush3.bf16.msra.mxu0 %v216_v4 }
   0xf   :  { %199 = vmatprep.subr.bf16.mxu0 %v230_v0 }
  0x12   :  { %200 = vmatpush3.bf16.msra.mxu0 %v217_v5 }
  0x13   :  { %201 = vmatprep.subr.bf16.mxu0 %v230_v0 }
  0x16   :  { %202 = vmatpush3.bf16.msra.mxu0 %v218_v6 }
  0x17   :  { %203 = vmatprep.subr.bf16.mxu0 %v230_v0 }
  0x1a   :  { %204 = vmatpush3.bf16.msra.mxu0 %v219_v7 }
  0x1b   :  { %205 = vmatprep.subr.bf16.mxu0 %v230_v0 }
  0x1e   :  { %206 = vmatpush3.bf16.msra.mxu0 %v220_v8 }
  0x21   :  { %208 = vmatmul.mubr.bf16.vlgmr.msra.gmra.mxu0 %v221_v9 }
  0xe1   :  { %v128_v11 = vpop.f32.mrf.mxu0 }
  0xe2   :  { %v129_v12 = vadd.f32 %v161_v10, %v128_v11 }
  0xe3   :  { %v209_v13 = vpop.f32.mrf.mxu0 }
  0xe4   :  { %v171_v14 = vmul.f32 -1.442695, %v129_v12 }
  0xe5   :  { %v131_v15 = vpop.f32.mrf.mxu0 }
  0xe6   :  { %222 = vpow2.f32 %v171_v14  ;;  %v132_v16 = vadd.f32 %v161_v10, %v131_v15 }
  0xe7   :  { %v210_v17 = vpop.f32.mrf.mxu0 }
  0xe8   :  { %v172_v18 = vmul.f32 -1.442695, %v132_v16 }
  0xea   :  { %224 = vpow2.f32 %v172_v18 }
  0xf3   :  { %v223_v19 = vpop.eup %222 }
  0xf4   :  { %v141_v20 = vadd.f32 1.0, %v223_v19 }
  0xf6   :  { %226 = vrcp.f32 %v141_v20 }
  0xf7   :  { %v225_v21 = vpop.eup %224 }
  0xf8   :  { %v142_v22 = vadd.f32 1.0, %v225_v21 }
  0xfa   :  { %228 = vrcp.f32 %v142_v22 }
 0x103   :  { %v227_v23 = vpop.eup %226 }
 0x107   :  { %v229_v24 = vpop.eup %228 }
 0x108   :  { %v180_v25 = vpack.c.bf16 %v229_v24, %v227_v23 }
 0x10a   :  { %181 = vst [vmem:[%s288_s3] sm:$0xff] %v180_v25  }

// kernel: network_forward.3
= control target key start
LH: loop header
LB: loop body
LE: loop exit
PB: predicated region body
PF: predicated region fallthrough
CT: control target
= control target key end

     0   :  { %s3431_s1 = inlined_call_operand.vmem [shape: bf16[1536,256], index: 1, kind: input, shape index: {}]   ;;  %s3432_s0 = inlined_call_operand.vmem [shape: bf16[16,1536], index: 0, kind: input, shape index: {}]   ;;  %s3433_s3 = inlined_call_operand.vmem [shape: bf16[256,384], index: 3, kind: input, shape index: {}]   ;;  %s3434_s2 = inlined_call_operand.vmem [shape: f32[1,256], index: 2, kind: input, shape index: {}]   ;;  %s3435_s4 = inlined_call_operand.vmem [shape: f32[1,384], index: 4, kind: input, shape index: {}]   ;;  %s3436_s5 = inlined_call_operand.vmem [shape: bf16[16,384], index: 5, kind: output, shape index: {}]  }
   0x1   :  { %v2252_v0 = vld [vmem:[%s3431_s1 + $0x74] ss:$8 sps:$4 sm:$0xff]   ;;  %v2256_v2 = vld [vmem:[%s3431_s1 + $0x70] ss:$8 sps:$4 sm:$0xff]   ;;  %v2258_v4 = vld [vmem:[%s3431_s1 + $0x64] ss:$8 sps:$4 sm:$0xff]  }
   0x2   :  { %v2254_v1 = vld [vmem:[%s3431_s1 + $0x174] ss:$8 sps:$4 sm:$0xff]   ;;  %1257 = vmatprep.subr.bf16.mxu0 %v2252_v0  ;;  %v2257_v3 = vld [vmem:[%s3431_s1 + $0x170] ss:$8 sps:$4 sm:$0xff]   ;;  %v2260_v5 = vld [vmem:[%s3431_s1 + $0x164] ss:$8 sps:$4 sm:$0xff]  }
   0x3   :  { %1300 = vmatprep.subr.bf16.mxu1 %v2254_v1  ;;  %1258 = vmatpush1.bf16.msra.mxu0 %v2256_v2  ;;  %v2262_v6 = vld [vmem:[%s3431_s1 + $0x60] ss:$8 sps:$4 sm:$0xff]   ;;  %v2264_v8 = vld [vmem:[%s3431_s1 + $0x54] ss:$8 sps:$4 sm:$0xff]   ;;  %v2268_v10 = vld [vmem:[%s3431_s1 + $0x50] ss:$8 sps:$4 sm:$0xff]  }
   0x4   :  { %1301 = vmatpush1.bf16.msra.mxu1 %v2257_v3  ;;  %1259 = vmatprep.subr.bf16.mxu0 %v2258_v4  ;;  %v2263_v7 = vld [vmem:[%s3431_s1 + $0x160] ss:$8 sps:$4 sm:$0xff]   ;;  %v2266_v9 = vld [vmem:[%s3431_s1 + $0x154] ss:$8 sps:$4 sm:$0xff]   ;;  %v2269_v11 = vld [vmem:[%s3431_s1 + $0x150] ss:$8 sps:$4 sm:$0xff]  }
   0x5   :  { %1302 = vmatprep.subr.bf16.mxu1 %v2260_v5  ;;  %v2270_v12 = vld [vmem:[%s3431_s1 + $0x44] ss:$8 sps:$4 sm:$0xff]   ;;  %v2274_v14 = vld [vmem:[%s3431_s1 + $0x40] ss:$8 sps:$4 sm:$0xff]   ;;  %v2276_v16 = vld [vmem:[%s3431_s1 + $0x34] ss:$8 sps:$4 sm:$0xff]  }
   0x6   :  { %v2272_v13 = vld [vmem:[%s3431_s1 + $0x144] ss:$8 sps:$4 sm:$0xff]   ;;  %v2275_v15 = vld [vmem:[%s3431_s1 + $0x140] ss:$8 sps:$4 sm:$0xff]   ;;  %v2278_v17 = vld [vmem:[%s3431_s1 + $0x134] ss:$8 sps:$4 sm:$0xff]  }
   0x7   :  { %1260 = vmatpush1.bf16.msra.mxu0 %v2262_v6  ;;  %v2280_v18 = vld [vmem:[%s3431_s1 + $0x30] ss:$8 sps:$4 sm:$0xff]   ;;  %v2282_v20 = vld [vmem:[%s3431_s1 + $0x24] ss:$8 sps:$4 sm:$0xff]   ;;  %v2286_v22 = vld [vmem:[%s3431_s1 + $0x20] ss:$8 sps:$4 sm:$0xff]  }
   0x8   :  { %1303 = vmatpush1.bf16.msra.mxu1 %v2263_v7  ;;  %1261 = vmatprep.subr.bf16.mxu0 %v2264_v8  ;;  %v2281_v19 = vld [vmem:[%s3431_s1 + $0x130] ss:$8 sps:$4 sm:$0xff]   ;;  %v2284_v21 = vld [vmem:[%s3431_s1 + $0x124] ss:$8 sps:$4 sm:$0xff]   ;;  %v2287_v23 = vld [vmem:[%s3431_s1 + $0x120] ss:$8 sps:$4 sm:$0xff]  }
   0x9   :  { %1304 = vmatprep.subr.bf16.mxu1 %v2266_v9  ;;  %v2288_v24 = vld [vmem:[%s3431_s1 + $0x14] ss:$8 sps:$4 sm:$0xff]   ;;  %v2292_v26 = vld [vmem:[%s3431_s1 + $0x10] ss:$8 sps:$4 sm:$0xff]   ;;  %v2294_v28 = vld [vmem:[%s3431_s1 + $0x4] ss:$8 sps:$4 sm:$0xff]  }
   0xa   :  { %v2290_v25 = vld [vmem:[%s3431_s1 + $0x114] ss:$8 sps:$4 sm:$0xff]   ;;  %v2293_v27 = vld [vmem:[%s3431_s1 + $0x110] ss:$8 sps:$4 sm:$0xff]   ;;  %v2296_v29 = vld [vmem:[%s3431_s1 + $0x104] ss:$8 sps:$4 sm:$0xff]  }
   0xb   :  { %1262 = vmatpush1.bf16.msra.mxu0 %v2268_v10  ;;  %v2298_v30 = vld [vmem:[%s3431_s1] ss:$8 sps:$4 sm:$0xff]   ;;  %v2300_v32 = vld [vmem:[%s3431_s1 + $0xf4] ss:$8 sps:$4 sm:$0xff]   ;;  %v2304_v34 = vld [vmem:[%s3431_s1 + $0xf0] ss:$8 sps:$4 sm:$0xff]  }
   0xc   :  { %1305 = vmatpush1.bf16.msra.mxu1 %v2269_v11  ;;  %1263 = vmatprep.subr.bf16.mxu0 %v2270_v12  ;;  %v2299_v31 = vld [vmem:[%s3431_s1 + $0x100] ss:$8 sps:$4 sm:$0xff]   ;;  %v2302_v33 = vld [vmem:[%s3431_s1 + $0x1f4] ss:$8 sps:$4 sm:$0xff]   ;;  %v2305_v35 = vld [vmem:[%s3431_s1 + $0x1f0] ss:$8 sps:$4 sm:$0xff]  }
   0xd   :  { %1306 = vmatprep.subr.bf16.mxu1 %v2272_v13  ;;  %v2306_v36 = vld [vmem:[%s3431_s1 + $0xe4] ss:$8 sps:$4 sm:$0xff]   ;;  %v2310_v38 = vld [vmem:[%s3431_s1 + $0xe0] ss:$8 sps:$4 sm:$0xff]   ;;  %v2312_v40 = vld [vmem:[%s3431_s1 + $0xd4] ss:$8 sps:$4 sm:$0xff]  }
   0xe   :  { %v2308_v37 = vld [vmem:[%s3431_s1 + $0x1e4] ss:$8 sps:$4 sm:$0xff]   ;;  %v2311_v39 = vld [vmem:[%s3431_s1 + $0x1e0] ss:$8 sps:$4 sm:$0xff]   ;;  %v2314_v41 = vld [vmem:[%s3431_s1 + $0x1d4] ss:$8 sps:$4 sm:$0xff]  }
   0xf   :  { %1264 = vmatpush1.bf16.msra.mxu0 %v2274_v14  ;;  %v2316_v42 = vld [vmem:[%s3431_s1 + $0xd0] ss:$8 sps:$4 sm:$0xff]   ;;  %v2318_v44 = vld [vmem:[%s3431_s1 + $0xc4] ss:$8 sps:$4 sm:$0xff]   ;;  %v2322_v46 = vld [vmem:[%s3431_s1 + $0xc0] ss:$8 sps:$4 sm:$0xff]  }
  0x10   :  { %1307 = vmatpush1.bf16.msra.mxu1 %v2275_v15  ;;  %1265 = vmatprep.subr.bf16.mxu0 %v2276_v16  ;;  %v2317_v43 = vld [vmem:[%s3431_s1 + $0x1d0] ss:$8 sps:$4 sm:$0xff]   ;;  %v2320_v45 = vld [vmem:[%s3431_s1 + $0x1c4] ss:$8 sps:$4 sm:$0xff]   ;;  %v2323_v47 = vld [vmem:[%s3431_s1 + $0x1c0] ss:$8 sps:$4 sm:$0xff]  }
  0x11   :  { %1308 = vmatprep.subr.bf16.mxu1 %v2278_v17  ;;  %v2324_v48 = vld [vmem:[%s3431_s1 + $0xb4] ss:$8 sps:$4 sm:$0xff]   ;;  %v2328_v52 = vld [vmem:[%s3431_s1 + $0xb0] ss:$8 sps:$4 sm:$0xff]   ;;  %v2330_v54 = vld [vmem:[%s3431_s1 + $0xa4] ss:$8 sps:$4 sm:$0xff]  }
  0x12   :  { %v2350_v49 = vld [vmem:[%s3432_s0 + $0x4] ss:$48 sps:$4 sm:$0xff]   ;;  %v2353_v51 = vld [vmem:[%s3432_s0 + $0xc] ss:$48 sps:$4 sm:$0xff]   ;;  %v2329_v53 = vld [vmem:[%s3431_s1 + $0x1b0] ss:$8 sps:$4 sm:$0xff]  }
  0x13   :  { %1266 = vmatpush1.bf16.msra.mxu0 %v2280_v18  ;;  %v2326_v50 = vld [vmem:[%s3431_s1 + $0x1b4] ss:$8 sps:$4 sm:$0xff]   ;;  %1289 = vmatprep.mubr.bf16.mxu0 %v2350_v49  ;;  %v2332_v55 = vld [vmem:[%s3431_s1 + $0x1a4] ss:$8 sps:$4 sm:$0xff]   ;;  %v2334_v56 = vld [vmem:[%s3431_s1 + $0xa0] ss:$8 sps:$4 sm:$0xff]  }
  0x14   :  { %1309 = vmatpush1.bf16.msra.mxu1 %v2281_v19  ;;  %1267 = vmatprep.subr.bf16.mxu0 %v2282_v20  ;;  %v2335_v57 = vld [vmem:[%s3431_s1 + $0x1a0] ss:$8 sps:$4 sm:$0xff]   ;;  %v2336_v58 = vld [vmem:[%s3431_s1 + $0x94] ss:$8 sps:$4 sm:$0xff]   ;;  %v2340_v60 = vld [vmem:[%s3431_s1 + $0x90] ss:$8 sps:$4 sm:$0xff]  }
  0x15   :  { %1310 = vmatprep.subr.bf16.mxu1 %v2284_v21  ;;  %1332 = vmatprep.mubr.bf16.mxu1 %v2353_v51  ;;  %v2338_v59 = vld [vmem:[%s3431_s1 + $0x194] ss:$8 sps:$4 sm:$0xff]   ;;  %v2341_v61 = vld [vmem:[%s3431_s1 + $0x190] ss:$8 sps:$4 sm:$0xff]   ;;  %v2342_v62 = vld [vmem:[%s3431_s1 + $0x84] ss:$8 sps:$4 sm:$0xff]  }
  0x16   :  { %v2344_v63 = vld [vmem:[%s3431_s1 + $0x184] ss:$8 sps:$4 sm:$0xff]   ;;  %v2346_v0 = vld [vmem:[%s3431_s1 + $0x80] ss:$8 sps:$4 sm:$0xff]   ;;  %v2356_v2 = vld [vmem:[%s3431_s1 + $0x274] ss:$8 sps:$4 sm:$0xff]  }
  0x17   :  { %1268 = vmatpush1.bf16.msra.mxu0 %v2286_v22  ;;  %v2347_v1 = vld [vmem:[%s3431_s1 + $0x180] ss:$8 sps:$4 sm:$0xff]   ;;  %v2359_v3 = vld [vmem:[%s3431_s1 + $0x374] ss:$8 sps:$4 sm:$0xff]   ;;  %v2354_v6 = vld [vmem:[%s3431_s1 + $0x270] ss:$8 sps:$4 sm:$0xff]  }
  0x18   :  { %1311 = vmatpush1.bf16.msra.mxu1 %v2287_v23  ;;  %1269 = vmatprep.subr.bf16.mxu0 %v2288_v24  ;;  %v2348_v4 = vld [vmem:[%s3432_s0] ss:$48 sps:$4 sm:$0xff]   ;;  %v2351_v5 = vld [vmem:[%s3432_s0 + $0x8] ss:$48 sps:$4 sm:$0xff]   ;;  %v2362_v8 = vld [vmem:[%s3431_s1 + $0x264] ss:$8 sps:$4 sm:$0xff]  }
  0x19   :  { %1312 = vmatprep.subr.bf16.mxu1 %v2290_v25  ;;  %v2357_v7 = vld [vmem:[%s3431_s1 + $0x370] ss:$8 sps:$4 sm:$0xff]   ;;  %v2365_v9 = vld [vmem:[%s3431_s1 + $0x364] ss:$8 sps:$4 sm:$0xff]   ;;  %v2360_v10 = vld [vmem:[%s3431_s1 + $0x260] ss:$8 sps:$4 sm:$0xff]  }
  0x1a   :  { %v2363_v11 = vld [vmem:[%s3431_s1 + $0x360] ss:$8 sps:$4 sm:$0xff]   ;;  %v2368_v12 = vld [vmem:[%s3431_s1 + $0x254] ss:$8 sps:$4 sm:$0xff]   ;;  %v2366_v14 = vld [vmem:[%s3431_s1 + $0x250] ss:$8 sps:$4 sm:$0xff]  }
  0x1b   :  { %1270 = vmatpush1.bf16.msra.mxu0 %v2292_v26  ;;  %v2371_v13 = vld [vmem:[%s3431_s1 + $0x354] ss:$8 sps:$4 sm:$0xff]   ;;  %v2369_v15 = vld [vmem:[%s3431_s1 + $0x350] ss:$8 sps:$4 sm:$0xff]   ;;  %v2374_v16 = vld [vmem:[%s3431_s1 + $0x244] ss:$8 sps:$4 sm:$0xff]  }
  0x1c   :  { %1313 = vmatpush1.bf16.msra.mxu1 %v2293_v27  ;;  %1271 = vmatprep.subr.bf16.mxu0 %v2294_v28  ;;  %v2377_v17 = vld [vmem:[%s3431_s1 + $0x344] ss:$8 sps:$4 sm:$0xff]   ;;  %v2372_v18 = vld [vmem:[%s3431_s1 + $0x240] ss:$8 sps:$4 sm:$0xff]   ;;  %v2380_v20 = vld [vmem:[%s3431_s1 + $0x234] ss:$8 sps:$4 sm:$0xff]  }
  0x1d   :  { %1314 = vmatprep.subr.bf16.mxu1 %v2296_v29  ;;  %v2375_v19 = vld [vmem:[%s3431_s1 + $0x340] ss:$8 sps:$4 sm:$0xff]   ;;  %v2383_v21 = vld [vmem:[%s3431_s1 + $0x334] ss:$8 sps:$4 sm:$0xff]   ;;  %v2378_v22 = vld [vmem:[%s3431_s1 + $0x230] ss:$8 sps:$4 sm:$0xff]  }
  0x1e   :  { %v2381_v23 = vld [vmem:[%s3431_s1 + $0x330] ss:$8 sps:$4 sm:$0xff]   ;;  %v2386_v24 = vld [vmem:[%s3431_s1 + $0x224] ss:$8 sps:$4 sm:$0xff]   ;;  %v2384_v26 = vld [vmem:[%s3431_s1 + $0x220] ss:$8 sps:$4 sm:$0xff]  }
  0x1f   :  { %1272 = vmatpush1.bf16.msra.mxu0 %v2298_v30  ;;  %v2389_v25 = vld [vmem:[%s3431_s1 + $0x324] ss:$8 sps:$4 sm:$0xff]   ;;  %v2387_v27 = vld [vmem:[%s3431_s1 + $0x320] ss:$8 sps:$4 sm:$0xff]   ;;  %v2392_v28 = vld [vmem:[%s3431_s1 + $0x214] ss:$8 sps:$4 sm:$0xff]  }
  0x20   :  { %1315 = vmatpush1.bf16.msra.mxu1 %v2299_v31  ;;  %1273 = vmatprep.subr.bf16.mxu0 %v2300_v32  ;;  %v2395_v29 = vld [vmem:[%s3431_s1 + $0x314] ss:$8 sps:$4 sm:$0xff]   ;;  %v2390_v30 = vld [vmem:[%s3431_s1 + $0x210] ss:$8 sps:$4 sm:$0xff]   ;;  %v2398_v32 = vld [vmem:[%s3431_s1 + $0x204] ss:$8 sps:$4 sm:$0xff]  }
  0x21   :  { %1316 = vmatprep.subr.bf16.mxu1 %v2302_v33  ;;  %v2393_v31 = vld [vmem:[%s3431_s1 + $0x310] ss:$8 sps:$4 sm:$0xff]   ;;  %v2401_v33 = vld [vmem:[%s3431_s1 + $0x304] ss:$8 sps:$4 sm:$0xff]  }
  0x22   :  { %v2417_v49 = vld [vmem:[%s3431_s1 + $0x3d0] ss:$8 sps:$4 sm:$0xff]   ;;  %v2425_v51 = vld [vmem:[%s3431_s1 + $0x3c4] ss:$8 sps:$4 sm:$0xff]  }
  0x23   :  { %1274 = vmatpush2.bf16.msra.mxu0 %v2304_v34  ;;  %v2452_v34 = vld [vmem:[%s3432_s0 + $0x14] ss:$48 sps:$4 sm:$0xff]  }
  0x24   :  { %1317 = vmatpush2.bf16.msra.mxu1 %v2305_v35  ;;  %1275 = vmatprep.subr.bf16.mxu0 %v2306_v36  ;;  %v2455_v35 = vld [vmem:[%s3432_s0 + $0x1c] ss:$48 sps:$4 sm:$0xff]   ;;  %v2396_v36 = vld [vmem:[%s3431_s1 + $0x200] ss:$8 sps:$4 sm:$0xff]  }
  0x25   :  { %1318 = vmatprep.subr.bf16.mxu1 %v2308_v37  ;;  %v2399_v37 = vld [vmem:[%s3431_s1 + $0x300] ss:$8 sps:$4 sm:$0xff]  }
  0x27   :  { %1276 = vmatpush2.bf16.msra.mxu0 %v2310_v38  ;;  %v2404_v38 = vld [vmem:[%s3431_s1 + $0x2f4] ss:$8 sps:$4 sm:$0xff]  }
  0x28   :  { %1319 = vmatpush2.bf16.msra.mxu1 %v2311_v39  ;;  %1277 = vmatprep.subr.bf16.mxu0 %v2312_v40  ;;  %v2407_v39 = vld [vmem:[%s3431_s1 + $0x3f4] ss:$8 sps:$4 sm:$0xff]   ;;  %v2402_v40 = vld [vmem:[%s3431_s1 + $0x2f0] ss:$8 sps:$4 sm:$0xff]  }
  0x29   :  { %1320 = vmatprep.subr.bf16.mxu1 %v2314_v41  ;;  %v2405_v41 = vld [vmem:[%s3431_s1 + $0x3f0] ss:$8 sps:$4 sm:$0xff]  }
  0x2b   :  { %1278 = vmatpush2.bf16.msra.mxu0 %v2316_v42  ;;  %v2410_v42 = vld [vmem:[%s3431_s1 + $0x2e4] ss:$8 sps:$4 sm:$0xff]  }
  0x2c   :  { %1321 = vmatpush2.bf16.msra.mxu1 %v2317_v43  ;;  %1279 = vmatprep.subr.bf16.mxu0 %v2318_v44  ;;  %v2413_v43 = vld [vmem:[%s3431_s1 + $0x3e4] ss:$8 sps:$4 sm:$0xff]   ;;  %v2408_v44 = vld [vmem:[%s3431_s1 + $0x2e0] ss:$8 sps:$4 sm:$0xff]  }
  0x2d   :  { %1322 = vmatprep.subr.bf16.mxu1 %v2320_v45  ;;  %v2411_v45 = vld [vmem:[%s3431_s1 + $0x3e0] ss:$8 sps:$4 sm:$0xff]  }
  0x2f   :  { %1280 = vmatpush2.bf16.msra.mxu0 %v2322_v46  ;;  %v2416_v46 = vld [vmem:[%s3431_s1 + $0x2d4] ss:$8 sps:$4 sm:$0xff]  }
  0x30   :  { %1323 = vmatpush2.bf16.msra.mxu1 %v2323_v47  ;;  %1281 = vmatprep.subr.bf16.mxu0 %v2324_v48  ;;  %v2419_v47 = vld [vmem:[%s3431_s1 + $0x3d4] ss:$8 sps:$4 sm:$0xff]   ;;  %v2414_v48 = vld [vmem:[%s3431_s1 + $0x2d0] ss:$8 sps:$4 sm:$0xff]  }
  0x31   :  { %1324 = vmatprep.subr.bf16.mxu1 %v2326_v50  ;;  %v2422_v50 = vld [vmem:[%s3431_s1 + $0x2c4] ss:$8 sps:$4 sm:$0xff]  }
  0x33   :  { %1282 = vmatpush2.bf16.msra.mxu0 %v2328_v52  ;;  %v2420_v52 = vld [vmem:[%s3431_s1 + $0x2c0] ss:$8 sps:$4 sm:$0xff]  }
  0x34   :  { %1325 = vmatpush2.bf16.msra.mxu1 %v2329_v53  ;;  %1283 = vmatprep.subr.bf16.mxu0 %v2330_v54  ;;  %v2423_v53 = vld [vmem:[%s3431_s1 + $0x3c0] ss:$8 sps:$4 sm:$0xff]   ;;  %v2428_v54 = vld [vmem:[%s3431_s1 + $0x2b4] ss:$8 sps:$4 sm:$0xff]  }
  0x35   :  { %1326 = vmatprep.subr.bf16.mxu1 %v2332_v55  ;;  %v2431_v55 = vld [vmem:[%s3431_s1 + $0x3b4] ss:$8 sps:$4 sm:$0xff]  }
  0x37   :  { %1284 = vmatpush2.bf16.msra.mxu0 %v2334_v56  ;;  %v2426_v56 = vld [vmem:[%s3431_s1 + $0x2b0] ss:$8 sps:$4 sm:$0xff]  }
  0x38   :  { %1327 = vmatpush2.bf16.msra.mxu1 %v2335_v57  ;;  %1285 = vmatprep.subr.bf16.mxu0 %v2336_v58  ;;  %v2429_v57 = vld [vmem:[%s3431_s1 + $0x3b0] ss:$8 sps:$4 sm:$0xff]   ;;  %v2434_v58 = vld [vmem:[%s3431_s1 + $0x2a4] ss:$8 sps:$4 sm:$0xff]  }
  0x39   :  { %1328 = vmatprep.subr.bf16.mxu1 %v2338_v59  ;;  %v2437_v59 = vld [vmem:[%s3431_s1 + $0x3a4] ss:$8 sps:$4 sm:$0xff]  }
  0x3b   :  { %1286 = vmatpush2.bf16.msra.mxu0 %v2340_v60  ;;  %v2432_v60 = vld [vmem:[%s3431_s1 + $0x2a0] ss:$8 sps:$4 sm:$0xff]  }
  0x3c   :  { %1329 = vmatpush2.bf16.msra.mxu1 %v2341_v61  ;;  %1287 = vmatprep.subr.bf16.mxu0 %v2342_v62  ;;  %v2435_v61 = vld [vmem:[%s3431_s1 + $0x3a0] ss:$8 sps:$4 sm:$0xff]   ;;  %v2440_v62 = vld [vmem:[%s3431_s1 + $0x294] ss:$8 sps:$4 sm:$0xff]  }
  0x3d   :  { %1330 = vmatprep.subr.bf16.mxu1 %v2344_v63  ;;  %v2443_v63 = vld [vmem:[%s3431_s1 + $0x394] ss:$8 sps:$4 sm:$0xff]  }
  0x3f   :  { %1288 = vmatpush2.bf16.msra.mxu0 %v2346_v0  ;;  %v2438_v0 = vld [vmem:[%s3431_s1 + $0x290] ss:$8 sps:$4 sm:$0xff]  }
  0x40   :  { %1331 = vmatpush2.bf16.msra.mxu1 %v2347_v1  ;;  %1343 = vmatprep.subr.bf16.mxu0 %v2356_v2  ;;  %v2441_v1 = vld [vmem:[%s3431_s1 + $0x390] ss:$8 sps:$4 sm:$0xff]   ;;  %v2446_v2 = vld [vmem:[%s3431_s1 + $0x284] ss:$8 sps:$4 sm:$0xff]  }
  0x41   :  { %1386 = vmatprep.subr.bf16.mxu1 %v2359_v3  ;;  %v2449_v3 = vld [vmem:[%s3431_s1 + $0x384] ss:$8 sps:$4 sm:$0xff]  }
  0x42   :  { %1290 = vmatmul.mubr.bf16.vlgmr.msra.gmra.mxu0 %v2348_v4  ;;  %v2444_v4 = vld [vmem:[%s3431_s1 + $0x280] ss:$8 sps:$4 sm:$0xff]  }
  0x43   :  { %1333 = vmatmul.mubr.bf16.vlgmr.msra.gmra.mxu1 %v2351_v5  ;;  %1344 = vmatpush1.bf16.msra.mxu0 %v2354_v6  ;;  %v2447_v5 = vld [vmem:[%s3431_s1 + $0x380] ss:$8 sps:$4 sm:$0xff]   ;;  %v2458_v6 = vld [vmem:[%s3431_s1 + $0x474] ss:$8 sps:$4 sm:$0xff]  }
  0x44   :  { %1387 = vmatpush1.bf16.msra.mxu1 %v2357_v7  ;;  %1345 = vmatprep.subr.bf16.mxu0 %v2362_v8  ;;  %v2461_v7 = vld [vmem:[%s3431_s1 + $0x574] ss:$8 sps:$4 sm:$0xff]   ;;  %v2450_v8 = vld [vmem:[%s3432_s0 + $0x10] ss:$48 sps:$4 sm:$0xff]  }
  0x45   :  { %1388 = vmatprep.subr.bf16.mxu1 %v2365_v9  ;;  %1375 = vmatprep.mubr.bf16.mxu0 %v2452_v34  ;;  %v2453_v9 = vld [vmem:[%s3432_s0 + $0x18] ss:$48 sps:$4 sm:$0xff]   ;;  %v2494_v34 = vld [vmem:[%s3431_s1 + $0x414] ss:$8 sps:$4 sm:$0xff]  }
  0x46   :  { %1418 = vmatprep.mubr.bf16.mxu1 %v2455_v35  ;;  %v2497_v35 = vld [vmem:[%s3431_s1 + $0x514] ss:$8 sps:$4 sm:$0xff]  }
  0x47   :  { %1346 = vmatpush1.bf16.msra.mxu0 %v2360_v10  ;;  %v2456_v10 = vld [vmem:[%s3431_s1 + $0x470] ss:$8 sps:$4 sm:$0xff]  }
  0x48   :  { %1389 = vmatpush1.bf16.msra.mxu1 %v2363_v11  ;;  %1347 = vmatprep.subr.bf16.mxu0 %v2368_v12  ;;  %v2459_v11 = vld [vmem:[%s3431_s1 + $0x570] ss:$8 sps:$4 sm:$0xff]   ;;  %v2464_v12 = vld [vmem:[%s3431_s1 + $0x464] ss:$8 sps:$4 sm:$0xff]  }
  0x49   :  { %1390 = vmatprep.subr.bf16.mxu1 %v2371_v13  ;;  %v2467_v13 = vld [vmem:[%s3431_s1 + $0x564] ss:$8 sps:$4 sm:$0xff]  }
  0x4b   :  { %1348 = vmatpush1.bf16.msra.mxu0 %v2366_v14  ;;  %v2462_v14 = vld [vmem:[%s3431_s1 + $0x460] ss:$8 sps:$4 sm:$0xff]  }
  0x4c   :  { %1391 = vmatpush1.bf16.msra.mxu1 %v2369_v15  ;;  %1349 = vmatprep.subr.bf16.mxu0 %v2374_v16  ;;  %v2465_v15 = vld [vmem:[%s3431_s1 + $0x560] ss:$8 sps:$4 sm:$0xff]   ;;  %v2470_v16 = vld [vmem:[%s3431_s1 + $0x454] ss:$8 sps:$4 sm:$0xff]  }
  0x4d   :  { %1392 = vmatprep.subr.bf16.mxu1 %v2377_v17  ;;  %v2473_v17 = vld [vmem:[%s3431_s1 + $0x554] ss:$8 sps:$4 sm:$0xff]  }
  0x4f   :  { %1350 = vmatpush1.bf16.msra.mxu0 %v2372_v18  ;;  %v2554_v18 = vld [vmem:[%s3432_s0 + $0x24] ss:$48 sps:$4 sm:$0xff]  }
  0x50   :  { %1393 = vmatpush1.bf16.msra.mxu1 %v2375_v19  ;;  %1351 = vmatprep.subr.bf16.mxu0 %v2380_v20  ;;  %v2557_v19 = vld [vmem:[%s3432_s0 + $0x2c] ss:$48 sps:$4 sm:$0xff]   ;;  %v2468_v20 = vld [vmem:[%s3431_s1 + $0x450] ss:$8 sps:$4 sm:$0xff]  }
  0x51   :  { %1394 = vmatprep.subr.bf16.mxu1 %v2383_v21  ;;  %v2471_v21 = vld [vmem:[%s3431_s1 + $0x550] ss:$8 sps:$4 sm:$0xff]  }
  0x53   :  { %1352 = vmatpush1.bf16.msra.mxu0 %v2378_v22  ;;  %v2476_v22 = vld [vmem:[%s3431_s1 + $0x444] ss:$8 sps:$4 sm:$0xff]  }
  0x54   :  { %1395 = vmatpush1.bf16.msra.mxu1 %v2381_v23  ;;  %1353 = vmatprep.subr.bf16.mxu0 %v2386_v24  ;;  %v2479_v23 = vld [vmem:[%s3431_s1 + $0x544] ss:$8 sps:$4 sm:$0xff]   ;;  %v2474_v24 = vld [vmem:[%s3431_s1 + $0x440] ss:$8 sps:$4 sm:$0xff]  }
  0x55   :  { %1396 = vmatprep.subr.bf16.mxu1 %v2389_v25  ;;  %v2477_v25 = vld [vmem:[%s3431_s1 + $0x540] ss:$8 sps:$4 sm:$0xff]  }
  0x57   :  { %1354 = vmatpush1.bf16.msra.mxu0 %v2384_v26  ;;  %v2482_v26 = vld [vmem:[%s3431_s1 + $0x434] ss:$8 sps:$4 sm:$0xff]  }
  0x58   :  { %1397 = vmatpush1.bf16.msra.mxu1 %v2387_v27  ;;  %1355 = vmatprep.subr.bf16.mxu0 %v2392_v28  ;;  %v2485_v27 = vld [vmem:[%s3431_s1 + $0x534] ss:$8 sps:$4 sm:$0xff]   ;;  %v2480_v28 = vld [vmem:[%s3431_s1 + $0x430] ss:$8 sps:$4 sm:$0xff]  }
  0x59   :  { %1398 = vmatprep.subr.bf16.mxu1 %v2395_v29  ;;  %v2483_v29 = vld [vmem:[%s3431_s1 + $0x530] ss:$8 sps:$4 sm:$0xff]  }
  0x5b   :  { %1356 = vmatpush1.bf16.msra.mxu0 %v2390_v30  ;;  %v2488_v30 = vld [vmem:[%s3431_s1 + $0x424] ss:$8 sps:$4 sm:$0xff]  }
  0x5c   :  { %1399 = vmatpush1.bf16.msra.mxu1 %v2393_v31  ;;  %1357 = vmatprep.subr.bf16.mxu0 %v2398_v32  ;;  %v2491_v31 = vld [vmem:[%s3431_s1 + $0x524] ss:$8 sps:$4 sm:$0xff]   ;;  %v2486_v32 = vld [vmem:[%s3431_s1 + $0x420] ss:$8 sps:$4 sm:$0xff]  }
  0x5d   :  { %1400 = vmatprep.subr.bf16.mxu1 %v2401_v33  ;;  %v2489_v33 = vld [vmem:[%s3431_s1 + $0x520] ss:$8 sps:$4 sm:$0xff]  }
  0x5f   :  { %1358 = vmatpush1.bf16.msra.mxu0 %v2396_v36  ;;  %v2492_v36 = vld [vmem:[%s3431_s1 + $0x410] ss:$8 sps:$4 sm:$0xff]  }
  0x60   :  { %1401 = vmatpush1.bf16.msra.mxu1 %v2399_v37  ;;  %1359 = vmatprep.subr.bf16.mxu0 %v2404_v38  ;;  %v2495_v37 = vld [vmem:[%s3431_s1 + $0x510] ss:$8 sps:$4 sm:$0xff]   ;;  %v2500_v38 = vld [vmem:[%s3431_s1 + $0x404] ss:$8 sps:$4 sm:$0xff]  }
  0x61   :  { %1402 = vmatprep.subr.bf16.mxu1 %v2407_v39  ;;  %v2503_v39 = vld [vmem:[%s3431_s1 + $0x504] ss:$8 sps:$4 sm:$0xff]  }
  0x63   :  { %1360 = vmatpush2.bf16.msra.mxu0 %v2402_v40  ;;  %v2498_v40 = vld [vmem:[%s3431_s1 + $0x400] ss:$8 sps:$4 sm:$0xff]  }
  0x64   :  { %1403 = vmatpush2.bf16.msra.mxu1 %v2405_v41  ;;  %1361 = vmatprep.subr.bf16.mxu0 %v2410_v42  ;;  %v2501_v41 = vld [vmem:[%s3431_s1 + $0x500] ss:$8 sps:$4 sm:$0xff]   ;;  %v2506_v42 = vld [vmem:[%s3431_s1 + $0x4f4] ss:$8 sps:$4 sm:$0xff]  }
  0x65   :  { %1404 = vmatprep.subr.bf16.mxu1 %v2413_v43  ;;  %v2509_v43 = vld [vmem:[%s3431_s1 + $0x5f4] ss:$8 sps:$4 sm:$0xff]  }
  0x67   :  { %1362 = vmatpush2.bf16.msra.mxu0 %v2408_v44  ;;  %v2504_v44 = vld [vmem:[%s3431_s1 + $0x4f0] ss:$8 sps:$4 sm:$0xff]  }
  0x68   :  { %1405 = vmatpush2.bf16.msra.mxu1 %v2411_v45  ;;  %1363 = vmatprep.subr.bf16.mxu0 %v2416_v46  ;;  %v2507_v45 = vld [vmem:[%s3431_s1 + $0x5f0] ss:$8 sps:$4 sm:$0xff]   ;;  %v2512_v46 = vld [vmem:[%s3431_s1 + $0x4e4] ss:$8 sps:$4 sm:$0xff]  }
  0x69   :  { %1406 = vmatprep.subr.bf16.mxu1 %v2419_v47  ;;  %v2515_v47 = vld [vmem:[%s3431_s1 + $0x5e4] ss:$8 sps:$4 sm:$0xff]  }
  0x6b   :  { %1364 = vmatpush2.bf16.msra.mxu0 %v2414_v48  ;;  %v2510_v48 = vld [vmem:[%s3431_s1 + $0x4e0] ss:$8 sps:$4 sm:$0xff]  }
  0x6c   :  { %1407 = vmatpush2.bf16.msra.mxu1 %v2417_v49  ;;  %1365 = vmatprep.subr.bf16.mxu0 %v2422_v50  ;;  %v2513_v49 = vld [vmem:[%s3431_s1 + $0x5e0] ss:$8 sps:$4 sm:$0xff]   ;;  %v2518_v50 = vld [vmem:[%s3431_s1 + $0x4d4] ss:$8 sps:$4 sm:$0xff]  }
  0x6d   :  { %1408 = vmatprep.subr.bf16.mxu1 %v2425_v51  ;;  %v2521_v51 = vld [vmem:[%s3431_s1 + $0x5d4] ss:$8 sps:$4 sm:$0xff]  }
  0x6f   :  { %1366 = vmatpush2.bf16.msra.mxu0 %v2420_v52  ;;  %v2516_v52 = vld [vmem:[%s3431_s1 + $0x4d0] ss:$8 sps:$4 sm:$0xff]  }
  0x70   :  { %1409 = vmatpush2.bf16.msra.mxu1 %v2423_v53  ;;  %1367 = vmatprep.subr.bf16.mxu0 %v2428_v54  ;;  %v2519_v53 = vld [vmem:[%s3431_s1 + $0x5d0] ss:$8 sps:$4 sm:$0xff]   ;;  %v2524_v54 = vld [vmem:[%s3431_s1 + $0x4c4] ss:$8 sps:$4 sm:$0xff]  }
  0x71   :  { %1410 = vmatprep.subr.bf16.mxu1 %v2431_v55  ;;  %v2527_v55 = vld [vmem:[%s3431_s1 + $0x5c4] ss:$8 sps:$4 sm:$0xff]  }
  0x73   :  { %1368 = vmatpush2.bf16.msra.mxu0 %v2426_v56  ;;  %v2522_v56 = vld [vmem:[%s3431_s1 + $0x4c0] ss:$8 sps:$4 sm:$0xff]  }
  0x74   :  { %1411 = vmatpush2.bf16.msra.mxu1 %v2429_v57  ;;  %1369 = vmatprep.subr.bf16.mxu0 %v2434_v58  ;;  %v2525_v57 = vld [vmem:[%s3431_s1 + $0x5c0] ss:$8 sps:$4 sm:$0xff]   ;;  %v2530_v58 = vld [vmem:[%s3431_s1 + $0x4b4] ss:$8 sps:$4 sm:$0xff]  }
  0x75   :  { %1412 = vmatprep.subr.bf16.mxu1 %v2437_v59  ;;  %v2533_v59 = vld [vmem:[%s3431_s1 + $0x5b4] ss:$8 sps:$4 sm:$0xff]  }
  0x77   :  { %1370 = vmatpush2.bf16.msra.mxu0 %v2432_v60  ;;  %v2528_v60 = vld [vmem:[%s3431_s1 + $0x4b0] ss:$8 sps:$4 sm:$0xff]  }
  0x78   :  { %1413 = vmatpush2.bf16.msra.mxu1 %v2435_v61  ;;  %1371 = vmatprep.subr.bf16.mxu0 %v2440_v62  ;;  %v2531_v61 = vld [vmem:[%s3431_s1 + $0x5b0] ss:$8 sps:$4 sm:$0xff]   ;;  %v2536_v62 = vld [vmem:[%s3431_s1 + $0x4a4] ss:$8 sps:$4 sm:$0xff]  }
  0x79   :  { %1414 = vmatprep.subr.bf16.mxu1 %v2443_v63  ;;  %v2539_v63 = vld [vmem:[%s3431_s1 + $0x5a4] ss:$8 sps:$4 sm:$0xff]  }
  0x7b   :  { %1372 = vmatpush2.bf16.msra.mxu0 %v2438_v0  ;;  %v2534_v0 = vld [vmem:[%s3431_s1 + $0x4a0] ss:$8 sps:$4 sm:$0xff]  }
  0x7c   :  { %1415 = vmatpush2.bf16.msra.mxu1 %v2441_v1  ;;  %1373 = vmatprep.subr.bf16.mxu0 %v2446_v2  ;;  %v2537_v1 = vld [vmem:[%s3431_s1 + $0x5a0] ss:$8 sps:$4 sm:$0xff]   ;;  %v2542_v2 = vld [vmem:[%s3431_s1 + $0x494] ss:$8 sps:$4 sm:$0xff]  }
  0x7d   :  { %1416 = vmatprep.subr.bf16.mxu1 %v2449_v3  ;;  %v2545_v3 = vld [vmem:[%s3431_s1 + $0x594] ss:$8 sps:$4 sm:$0xff]  }
  0x7f   :  { %1374 = vmatpush2.bf16.msra.mxu0 %v2444_v4  ;;  %v2540_v4 = vld [vmem:[%s3431_s1 + $0x490] ss:$8 sps:$4 sm:$0xff]  }
  0x80   :  { %1417 = vmatpush2.bf16.msra.mxu1 %v2447_v5  ;;  %1429 = vmatprep.subr.bf16.mxu0 %v2458_v6  ;;  %v2543_v5 = vld [vmem:[%s3431_s1 + $0x590] ss:$8 sps:$4 sm:$0xff]   ;;  %v2548_v6 = vld [vmem:[%s3431_s1 + $0x484] ss:$8 sps:$4 sm:$0xff]  }
  0x81   :  { %1472 = vmatprep.subr.bf16.mxu1 %v2461_v7  ;;  %v2551_v7 = vld [vmem:[%s3431_s1 + $0x584] ss:$8 sps:$4 sm:$0xff]  }
  0x82   :  { %1376 = vmatmul.mubr.bf16.vlgmr.msra.gmra.mxu0 %v2450_v8  ;;  %v2546_v8 = vld [vmem:[%s3431_s1 + $0x480] ss:$8 sps:$4 sm:$0xff]  }
  0x83   :  { %1419 = vmatmul.mubr.bf16.vlgmr.msra.gmra.mxu1 %v2453_v9  ;;  %1430 = vmatpush1.bf16.msra.mxu0 %v2456_v10  ;;  %v2549_v9 = vld [vmem:[%s3431_s1 + $0x580] ss:$8 sps:$4 sm:$0xff]  }
  0x84   :  { %1473 = vmatpush1.bf16.msra.mxu1 %v2459_v11  ;;  %1431 = vmatprep.subr.bf16.mxu0 %v2464_v12  ;;  %v2552_v10 = vld [vmem:[%s3432_s0 + $0x20] ss:$48 sps:$4 sm:$0xff]   ;;  %v2555_v11 = vld [vmem:[%s3432_s0 + $0x28] ss:$48 sps:$4 sm:$0xff]  }
  0x85   :  { %1474 = vmatprep.subr.bf16.mxu1 %v2467_v13  ;;  %1461 = vmatprep.mubr.bf16.mxu0 %v2554_v18  ;;  %v2558_v12 = vld [vmem:[%s3433_s3 + $0xa8] ss:$12 sps:$4 sm:$0xff]   ;;  %v2560_v13 = vld [vmem:[%s3433_s3 + $0xac] ss:$12 sps:$4 sm:$0xff]   ;;  %v2569_v18 = vld [vmem:[%s3433_s3 + $0x64] ss:$12 sps:$4 sm:$0xff]  }
  0x86   :  { %1504 = vmatprep.mubr.bf16.mxu1 %v2557_v19  ;;  %v2567_v19 = vld [vmem:[%s3433_s3 + $0x60] ss:$12 sps:$4 sm:$0xff]  }
  0x87   :  { %1432 = vmatpush1.bf16.msra.mxu0 %v2462_v14  ;;  %v2563_v14 = vld [vmem:[%s3433_s3 + $0x94] ss:$12 sps:$4 sm:$0xff]  }
  0x88   :  { %1475 = vmatpush1.bf16.msra.mxu1 %v2465_v15  ;;  %1433 = vmatprep.subr.bf16.mxu0 %v2470_v16  ;;  %v2561_v15 = vld [vmem:[%s3433_s3 + $0x90] ss:$12 sps:$4 sm:$0xff]  }
  0x89   :  { %1476 = vmatprep.subr.bf16.mxu1 %v2473_v17  ;;  %v2566_v16 = vld [vmem:[%s3433_s3 + $0x7c] ss:$12 sps:$4 sm:$0xff]   ;;  %v2564_v17 = vld [vmem:[%s3433_s3 + $0x78] ss:$12 sps:$4 sm:$0xff]  }
  0x8b   :  { %1434 = vmatpush1.bf16.msra.mxu0 %v2468_v20  ;;  %v2572_v20 = vld [vmem:[%s3433_s3 + $0x4c] ss:$12 sps:$4 sm:$0xff]  }
  0x8c   :  { %1477 = vmatpush1.bf16.msra.mxu1 %v2471_v21  ;;  %1435 = vmatprep.subr.bf16.mxu0 %v2476_v22  ;;  %v2585_v21 = vld [vmem:[%s3433_s3 + $0x170] ss:$12 sps:$4 sm:$0xff]  }
  0x8d   :  { %1478 = vmatprep.subr.bf16.mxu1 %v2479_v23  ;;  %v2586_v22 = vld [vmem:[%s3433_s3 + $0xb0] ss:$12 sps:$4 sm:$0xff]   ;;  %v2570_v23 = vld [vmem:[%s3433_s3 + $0x48] ss:$12 sps:$4 sm:$0xff]  }
  0x8f   :  { %1436 = vmatpush1.bf16.msra.mxu0 %v2474_v24  ;;  %v2575_v24 = vld [vmem:[%s3433_s3 + $0x34] ss:$12 sps:$4 sm:$0xff]  }
  0x90   :  { %1479 = vmatpush1.bf16.msra.mxu1 %v2477_v25  ;;  %1437 = vmatprep.subr.bf16.mxu0 %v2482_v26  ;;  %v2590_v25 = vld [vmem:[%s3433_s3 + $0x158] ss:$12 sps:$4 sm:$0xff]  }
  0x91   :  { %1480 = vmatprep.subr.bf16.mxu1 %v2485_v27  ;;  %v2591_v26 = vld [vmem:[%s3433_s3 + $0x98] ss:$12 sps:$4 sm:$0xff]   ;;  %v2573_v27 = vld [vmem:[%s3433_s3 + $0x30] ss:$12 sps:$4 sm:$0xff]  }
  0x93   :  { %1438 = vmatpush1.bf16.msra.mxu0 %v2480_v28  ;;  %v2595_v28 = vld [vmem:[%s3433_s3 + $0x140] ss:$12 sps:$4 sm:$0xff]  }
  0x94   :  { %1481 = vmatpush1.bf16.msra.mxu1 %v2483_v29  ;;  %1439 = vmatprep.subr.bf16.mxu0 %v2488_v30  ;;  %v2596_v29 = vld [vmem:[%s3433_s3 + $0x80] ss:$12 sps:$4 sm:$0xff]   ;;  %v2578_v30 = vld [vmem:[%s3433_s3 + $0x1c] ss:$12 sps:$4 sm:$0xff]  }
  0x95   :  { %1482 = vmatprep.subr.bf16.mxu1 %v2491_v31  ;;  %v2576_v31 = vld [vmem:[%s3433_s3 + $0x18] ss:$12 sps:$4 sm:$0xff]  }
  0x97   :  { %1440 = vmatpush1.bf16.msra.mxu0 %v2486_v32  ;;  %v2600_v32 = vld [vmem:[%s3433_s3 + $0x128] ss:$12 sps:$4 sm:$0xff]  }
  0x98   :  { %1483 = vmatpush1.bf16.msra.mxu1 %v2489_v33  ;;  %1441 = vmatprep.subr.bf16.mxu0 %v2494_v34  ;;  %v2581_v33 = vld [vmem:[%s3433_s3 + $0x4] ss:$12 sps:$4 sm:$0xff]   ;;  %v2601_v34 = vld [vmem:[%s3433_s3 + $0x68] ss:$12 sps:$4 sm:$0xff]  }
  0x99   :  { %1484 = vmatprep.subr.bf16.mxu1 %v2497_v35  ;;  %v2579_v35 = vld [vmem:[%s3433_s3] ss:$12 sps:$4 sm:$0xff]  }
  0x9b   :  { %1442 = vmatpush1.bf16.msra.mxu0 %v2492_v36  ;;  %v2584_v36 = vld [vmem:[%s3433_s3 + $0x16c] ss:$12 sps:$4 sm:$0xff]  }
  0x9c   :  { %1485 = vmatpush1.bf16.msra.mxu1 %v2495_v37  ;;  %1443 = vmatprep.subr.bf16.mxu0 %v2500_v38  ;;  %v2582_v37 = vld [vmem:[%s3433_s3 + $0x168] ss:$12 sps:$4 sm:$0xff]  }
  0x9d   :  { %1486 = vmatprep.subr.bf16.mxu1 %v2503_v39  ;;  %v2589_v38 = vld [vmem:[%s3433_s3 + $0x154] ss:$12 sps:$4 sm:$0xff]   ;;  %v2587_v39 = vld [vmem:[%s3433_s3 + $0x150] ss:$12 sps:$4 sm:$0xff]  }
  0x9f   :  { %1444 = vmatpush1.bf16.msra.mxu0 %v2498_v40  ;;  %v2594_v40 = vld [vmem:[%s3433_s3 + $0x13c] ss:$12 sps:$4 sm:$0xff]  }
  0xa0   :  { %1487 = vmatpush1.bf16.msra.mxu1 %v2501_v41  ;;  %1445 = vmatprep.subr.bf16.mxu0 %v2506_v42  ;;  %v2592_v41 = vld [vmem:[%s3433_s3 + $0x138] ss:$12 sps:$4 sm:$0xff]  }
  0xa1   :  { %1488 = vmatprep.subr.bf16.mxu1 %v2509_v43  ;;  %v2599_v42 = vld [vmem:[%s3433_s3 + $0x124] ss:$12 sps:$4 sm:$0xff]   ;;  %v2597_v43 = vld [vmem:[%s3433_s3 + $0x120] ss:$12 sps:$4 sm:$0xff]  }
  0xa3   :  { %1446 = vmatpush2.bf16.msra.mxu0 %v2504_v44  ;;  %v2604_v44 = vld [vmem:[%s3433_s3 + $0x10c] ss:$12 sps:$4 sm:$0xff]  }
  0xa4   :  { %1489 = vmatpush2.bf16.msra.mxu1 %v2507_v45  ;;  %1447 = vmatprep.subr.bf16.mxu0 %v2512_v46  ;;  %v2605_v45 = vld [vmem:[%s3433_s3 + $0x110] ss:$12 sps:$4 sm:$0xff]   ;;  %v2602_v46 = vld [vmem:[%s3433_s3 + $0x108] ss:$12 sps:$4 sm:$0xff]  }
  0xa5   :  { %1490 = vmatprep.subr.bf16.mxu1 %v2515_v47  ;;  %v2606_v47 = vld [vmem:[%s3433_s3 + $0x50] ss:$12 sps:$4 sm:$0xff]  }
  0xa7   :  { %1448 = vmatpush2.bf16.msra.mxu0 %v2510_v48  ;;  %v2609_v48 = vld [vmem:[%s3433_s3 + $0xf4] ss:$12 sps:$4 sm:$0xff]  }
  0xa8   :  { %1491 = vmatpush2.bf16.msra.mxu1 %v2513_v49  ;;  %1449 = vmatprep.subr.bf16.mxu0 %v2518_v50  ;;  %v2610_v49 = vld [vmem:[%s3433_s3 + $0xf8] ss:$12 sps:$4 sm:$0xff]   ;;  %v2607_v50 = vld [vmem:[%s3433_s3 + $0xf0] ss:$12 sps:$4 sm:$0xff]  }
  0xa9   :  { %1492 = vmatprep.subr.bf16.mxu1 %v2521_v51  ;;  %v2611_v51 = vld [vmem:[%s3433_s3 + $0x38] ss:$12 sps:$4 sm:$0xff]  }
  0xab   :  { %1450 = vmatpush2.bf16.msra.mxu0 %v2516_v52  ;;  %v2614_v52 = vld [vmem:[%s3433_s3 + $0xdc] ss:$12 sps:$4 sm:$0xff]  }
  0xac   :  { %1493 = vmatpush2.bf16.msra.mxu1 %v2519_v53  ;;  %1451 = vmatprep.subr.bf16.mxu0 %v2524_v54  ;;  %v2615_v53 = vld [vmem:[%s3433_s3 + $0xe0] ss:$12 sps:$4 sm:$0xff]   ;;  %v2612_v54 = vld [vmem:[%s3433_s3 + $0xd8] ss:$12 sps:$4 sm:$0xff]  }
  0xad   :  { %1494 = vmatprep.subr.bf16.mxu1 %v2527_v55  ;;  %v2616_v55 = vld [vmem:[%s3433_s3 + $0x20] ss:$12 sps:$4 sm:$0xff]  }
  0xaf   :  { %1452 = vmatpush2.bf16.msra.mxu0 %v2522_v56  ;;  %v2619_v56 = vld [vmem:[%s3433_s3 + $0xc4] ss:$12 sps:$4 sm:$0xff]  }
  0xb0   :  { %1495 = vmatpush2.bf16.msra.mxu1 %v2525_v57  ;;  %1453 = vmatprep.subr.bf16.mxu0 %v2530_v58  ;;  %v2620_v57 = vld [vmem:[%s3433_s3 + $0xc8] ss:$12 sps:$4 sm:$0xff]   ;;  %v2617_v58 = vld [vmem:[%s3433_s3 + $0xc0] ss:$12 sps:$4 sm:$0xff]  }
  0xb1   :  { %1496 = vmatprep.subr.bf16.mxu1 %v2533_v59  ;;  %v2621_v59 = vld [vmem:[%s3433_s3 + $0x8] ss:$12 sps:$4 sm:$0xff]  }
  0xb3   :  { %1454 = vmatpush2.bf16.msra.mxu0 %v2528_v60 }
  0xb4   :  { %1497 = vmatpush2.bf16.msra.mxu1 %v2531_v61  ;;  %1455 = vmatprep.subr.bf16.mxu0 %v2536_v62  ;;  %v227_v62 = vlaneseq }
  0xb5   :  { %1498 = vmatprep.subr.bf16.mxu1 %v2539_v63 }
  0xb7   :  { %1456 = vmatpush2.bf16.msra.mxu0 %v2534_v0 }
  0xb8   :  { %1499 = vmatpush2.bf16.msra.mxu1 %v2537_v1  ;;  %1457 = vmatprep.subr.bf16.mxu0 %v2542_v2  ;;  %v3408_v1 = vshrl.u32 %v227_v62, 7 }
  0xb9   :  { %1500 = vmatprep.subr.bf16.mxu1 %v2545_v3 }
  0xbb   :  { %1458 = vmatpush2.bf16.msra.mxu0 %v2540_v4  ;;  %v233_v4 = vsub.s32 1, %v3408_v1 }
  0xbc   :  { %1501 = vmatpush2.bf16.msra.mxu1 %v2543_v5  ;;  %1459 = vmatprep.subr.bf16.mxu0 %v2548_v6  ;;  %v225_v5 = vld [vmem:[%s3434_s2] sm:$0x3]  ;;  %v229_v6 = vsub.s32 0, %v3408_v1 }
  0xbd   :  { %1502 = vmatprep.subr.bf16.mxu1 %v2551_v7 }
  0xbf   :  { %1460 = vmatpush2.bf16.msra.mxu0 %v2546_v8 }
  0xc0   :  { %1503 = vmatpush2.bf16.msra.mxu1 %v2549_v9  ;;  %1858 = vmatprep.subr.bf16.mxu0 %v2560_v13 }
  0xc1   :  { %2230 = vmatprep.subr.bf16.mxu1 %v2585_v21 }
  0xc2   :  { %1462 = vmatmul.mubr.bf16.vlgmr.msra.gmra.mxu0 %v2552_v10 }
  0xc3   :  { %1505 = vmatmul.mubr.bf16.vlgmr.msra.gmra.mxu1 %v2555_v11  ;;  %1859 = vmatpush1.bf16.msra.mxu0 %v2558_v12  ;;  %v234_v11 = vrot.slane %v225_v5, %v233_v4  ;;  %v230_v12 = vrot.slane %v225_v5, %v229_v6 }
  0xc4   :  { %1860 = vmatprep.subr.bf16.mxu0 %v2563_v14  ;;  %2231 = vmatpush3.bf16.msra.mxu1 %v2586_v22 }
  0xc5   :  { %2232 = vmatprep.subr.bf16.mxu1 %v2590_v25 }
  0xc7   :  { %1861 = vmatpush1.bf16.msra.mxu0 %v2561_v15 }
  0xc8   :  { %1862 = vmatprep.subr.bf16.mxu0 %v2566_v16  ;;  %2233 = vmatpush3.bf16.msra.mxu1 %v2591_v26 }
  0xc9   :  { %2234 = vmatprep.subr.bf16.mxu1 %v2595_v28 }
  0xcb   :  { %1863 = vmatpush1.bf16.msra.mxu0 %v2564_v17 }
  0xcc   :  { %1864 = vmatprep.subr.bf16.mxu0 %v2569_v18  ;;  %2235 = vmatpush3.bf16.msra.mxu1 %v2596_v29 }
  0xcd   :  { %2236 = vmatprep.subr.bf16.mxu1 %v2600_v32 }
  0xcf   :  { %1865 = vmatpush1.bf16.msra.mxu0 %v2567_v19 }
  0xd0   :  { %1866 = vmatprep.subr.bf16.mxu0 %v2572_v20  ;;  %2237 = vmatpush3.bf16.msra.mxu1 %v2601_v34 }
  0xd1   :  { %2238 = vmatprep.subr.bf16.mxu1 %v2605_v45 }
  0xd3   :  { %1867 = vmatpush1.bf16.msra.mxu0 %v2570_v23 }
  0xd4   :  { %1868 = vmatprep.subr.bf16.mxu0 %v2575_v24  ;;  %2239 = vmatpush3.bf16.msra.mxu1 %v2606_v47 }
  0xd5   :  { %2240 = vmatprep.subr.bf16.mxu1 %v2610_v49 }
  0xd7   :  { %1869 = vmatpush1.bf16.msra.mxu0 %v2573_v27 }
  0xd8   :  { %1870 = vmatprep.subr.bf16.mxu0 %v2578_v30  ;;  %2241 = vmatpush3.bf16.msra.mxu1 %v2611_v51 }
  0xd9   :  { %2242 = vmatprep.subr.bf16.mxu1 %v2615_v53 }
  0xdb   :  { %1871 = vmatpush1.bf16.msra.mxu0 %v2576_v31 }
  0xdc   :  { %1872 = vmatprep.subr.bf16.mxu0 %v2581_v33  ;;  %2243 = vmatpush3.bf16.msra.mxu1 %v2616_v55 }
  0xdd   :  { %2244 = vmatprep.subr.bf16.mxu1 %v2620_v57  ;;  %v1585_v57 = vld [vmem:[%s3435_s4] sm:$0x7] }
  0xdf   :  { %1873 = vmatpush1.bf16.msra.mxu0 %v2579_v35 }
  0xe0   :  { %1874 = vmatprep.subr.bf16.mxu0 %v2584_v36  ;;  %2245 = vmatpush3.bf16.msra.mxu1 %v2621_v59  ;;  %v1590_v59 = vrot.slane %v1585_v57, %v229_v6 }
  0xe3   :  { %1875 = vmatpush2.bf16.msra.mxu0 %v2582_v37 }
  0xe4   :  { %1876 = vmatprep.subr.bf16.mxu0 %v2589_v38 }
  0xe7   :  { %1877 = vmatpush2.bf16.msra.mxu0 %v2587_v39 }
  0xe8   :  { %1878 = vmatprep.subr.bf16.mxu0 %v2594_v40 }
  0xeb   :  { %1879 = vmatpush2.bf16.msra.mxu0 %v2592_v41 }
  0xec   :  { %1880 = vmatprep.subr.bf16.mxu0 %v2599_v42 }
  0xef   :  { %1881 = vmatpush2.bf16.msra.mxu0 %v2597_v43 }
  0xf0   :  { %1882 = vmatprep.subr.bf16.mxu0 %v2604_v44 }
  0xf3   :  { %1883 = vmatpush2.bf16.msra.mxu0 %v2602_v46 }
  0xf4   :  { %1884 = vmatprep.subr.bf16.mxu0 %v2609_v48 }
  0xf7   :  { %1885 = vmatpush2.bf16.msra.mxu0 %v2607_v50 }
  0xf8   :  { %1886 = vmatprep.subr.bf16.mxu0 %v2614_v52 }
  0xfb   :  { %1887 = vmatpush2.bf16.msra.mxu0 %v2612_v54 }
  0xfc   :  { %1888 = vmatprep.subr.bf16.mxu0 %v2619_v56 }
  0xff   :  { %1889 = vmatpush2.bf16.msra.mxu0 %v2617_v58  ;;  %v1597_v58 = vsub.s32 2, %v3408_v1 }
 0x102   :  { %v1291_v60 = vpop.f32.mrf.mxu0 }
 0x103   :  { %v1334_v61 = vpop.f32.mrf.mxu1  ;;  %v1292_v16 = vadd.f32 %v1291_v60, %v230_v12  ;;  %v1594_v60 = vrot.slane %v1585_v57, %v233_v4 }
 0x104   :  { %v1293_v63 = vpop.f32.mrf.mxu0 }
 0x105   :  { %v1336_v0 = vpop.f32.mrf.mxu1  ;;  %v1294_v15 = vadd.f32 %v1293_v63, %v234_v11  ;;  %v1335_v22 = vadd.f32 %v1334_v61, %v1292_v16  ;;  %v1598_v63 = vrot.slane %v1585_v57, %v1597_v58 }
 0x106   :  { %v1295_v2 = vpop.f32.mrf.mxu0 }
 0x107   :  { %v1338_v3 = vpop.f32.mrf.mxu1  ;;  %v1296_v17 = vadd.f32 %v1295_v2, %v230_v12  ;;  %v1337_v20 = vadd.f32 %v1336_v0, %v1294_v15 }
 0x108   :  { %v1297_v7 = vpop.f32.mrf.mxu0 }
 0x109   :  { %v1340_v8 = vpop.f32.mrf.mxu1  ;;  %v1298_v21 = vadd.f32 %v1297_v7, %v234_v11  ;;  %v1339_v23 = vadd.f32 %v1338_v3, %v1296_v17 }
 0x10b   :  { %v1341_v28 = vadd.f32 %v1340_v8, %v1298_v21 }
 0x142   :  { %v1377_v9 = vpop.f32.mrf.mxu0 }
 0x143   :  { %v1420_v10 = vpop.f32.mrf.mxu1  ;;  %v1378_v25 = vadd.f32 %v1377_v9, %v1335_v22 }
 0x144   :  { %v1379_v13 = vpop.f32.mrf.mxu0 }
 0x145   :  { %v1422_v14 = vpop.f32.mrf.mxu1  ;;  %v1380_v24 = vadd.f32 %v1379_v13, %v1337_v20  ;;  %v1421_v34 = vadd.f32 %v1420_v10, %v1378_v25 }
 0x146   :  { %v1381_v18 = vpop.f32.mrf.mxu0 }
 0x147   :  { %v1424_v19 = vpop.f32.mrf.mxu1  ;;  %v1382_v29 = vadd.f32 %v1381_v18, %v1339_v23  ;;  %v1423_v32 = vadd.f32 %v1422_v14, %v1380_v24 }
 0x148   :  { %v1383_v26 = vpop.f32.mrf.mxu0 }
 0x149   :  { %v1426_v27 = vpop.f32.mrf.mxu1  ;;  %v1384_v33 = vadd.f32 %v1383_v26, %v1341_v28  ;;  %v1425_v37 = vadd.f32 %v1424_v19, %v1382_v29 }
 0x14b   :  { %v1427_v42 = vadd.f32 %v1426_v27, %v1384_v33 }
 0x182   :  { %v1463_v30 = vpop.f32.mrf.mxu0 }
 0x183   :  { %v1506_v31 = vpop.f32.mrf.mxu1  ;;  %v1464_v39 = vadd.f32 %v1463_v30, %v1421_v34 }
 0x184   :  { %v1465_v35 = vpop.f32.mrf.mxu0 }
 0x185   :  { %v1508_v36 = vpop.f32.mrf.mxu1  ;;  %v1466_v38 = vadd.f32 %v1465_v35, %v1423_v32  ;;  %v1507_v48 = vadd.f32 %v1506_v31, %v1464_v39 }
 0x186   :  { %v1467_v40 = vpop.f32.mrf.mxu0 }
 0x187   :  { %v1510_v41 = vpop.f32.mrf.mxu1  ;;  %v1468_v43 = vadd.f32 %v1467_v40, %v1425_v37  ;;  %v1509_v45 = vadd.f32 %v1508_v36, %v1466_v38  ;;  %v1515_v54 = vmax.f32 %v1507_v48, 0.0 }
 0x188   :  { %v1469_v44 = vpop.f32.mrf.mxu0 }
 0x189   :  { %v1511_v46 = vadd.f32 %v1510_v41, %v1468_v43  ;;  %v1470_v47 = vadd.f32 %v1469_v44, %v1427_v42  ;;  %v1512_v49 = vpop.f32.mrf.mxu1  ;;  %v1516_v52 = vmax.f32 %v1509_v45, 0.0 }
 0x18b   :  { %v1513_v50 = vadd.f32 %v1512_v49, %v1470_v47  ;;  %v1517_v51 = vmax.f32 %v1511_v46, 0.0 }
 0x18d   :  { %v1518_v53 = vmax.f32 %v1513_v50, 0.0  ;;  %v1519_v56 = vpack.c.bf16 %v1517_v51, %v1515_v54 }
 0x18f   :  { %v1520_v55 = vpack.c.bf16 %v1518_v53, %v1516_v52 }
 0x191   :  { %1890 = vmatprep.mubr.bf16.mxu0 %v1520_v55  ;;  %1933 = vmatprep.mubr.bf16.mxu1 %v1520_v55 }
 0x192   :  { %1891 = vmatmul.mubr.bf16.vlgmr.msra.gmra.mxu0 %v1519_v56  ;;  %1934 = vmatmul.mubr.bf16.vlgmr.msra.gmra.mxu1 %v1519_v56 }
 0x252   :  { %v1892_v61 = vpop.f32.mrf.mxu0  ;;  %v2246_v62 = vpop.f32.mrf.mxu1 }
 0x253   :  { %v1893_v3 = vadd.f32 %v1892_v61, %v1590_v59 }
 0x254   :  { %v1894_v0 = vpop.f32.mrf.mxu0  ;;  %v2247_v2 = vpop.f32.mrf.mxu1 }
 0x255   :  { %v1895_v5 = vadd.f32 %v1894_v0, %v1594_v60  ;;  %v2248_v7 = vadd.f32 %v2247_v2, %v2246_v62 }
 0x256   :  { %v1896_v8 = vpop.f32.mrf.mxu0  ;;  %v2249_v9 = vpop.f32.mrf.mxu1 }
 0x257   :  { %v2226_v10 = vpack.c.bf16 %v1895_v5, %v1893_v3  ;;  %v1936_v11 = vadd.f32 %v2248_v7, %v1598_v63  ;;  %v1897_v4 = vadd.f32 %v1896_v8, %v1590_v59 }
 0x258   :  { %v1898_v12 = vpop.f32.mrf.mxu0  ;;  %v2250_v13 = vpop.f32.mrf.mxu1 }
 0x259   :  { %1962 = vst [vmem:[%s3436_s5] sm:$0xff] %v2226_v10  ;;  %v2227_v1 = vpack.c.bf16 %v1936_v11, %v1936_v11  ;;  %v1899_v6 = vadd.f32 %v1898_v12, %v1594_v60  ;;  %v2251_v14 = vadd.f32 %v2250_v13, %v2249_v9 }
 0x25b   :  { %1963 = vst [vmem:[%s3436_s5 + $0x8] sm:$0xf] %v2227_v1  ;;  %v2228_v15 = vpack.c.bf16 %v1899_v6, %v1897_v4  ;;  %v1939_v16 = vadd.f32 %v2251_v14, %v1598_v63 }
 0x25d   :  { %1964 = vst [vmem:[%s3436_s5 + $0xc] sm:$0xff] %v2228_v15  ;;  %v2229_v17 = vpack.c.bf16 %v1939_v16, %v1939_v16 }
 0x25f   :  { %1965 = vst [vmem:[%s3436_s5 + $0x14] sm:$0xf] %v2229_v17 }

// kernel: network_forward.4
= control target key start
LH: loop header
LB: loop body
LE: loop exit
PB: predicated region body
PF: predicated region fallthrough
CT: control target
= control target key end

     0   :  { %v6430_v1 = vmov 0.0   ;;  %v6428_v2 = vmov 0   ;;  %vm4171_vm0 = vmmov 0   ;;  %v125_v51 = vlaneseq  ;;  %s6420_s1 = inlined_call_operand.vmem [shape: bf16[128,384], index: 1, kind: input, shape index: {}]   ;;  %s6421_s3 = inlined_call_operand.vmem [shape: bf16[128,384], index: 3, kind: input, shape index: {}]   ;;  %s6422_s5 = inlined_call_operand.vmem [shape: bf16[128,384], index: 5, kind: input, shape index: {}]   ;;  %s6423_s2 = inlined_call_operand.vmem [shape: f32[1,384], index: 2, kind: input, shape index: {}]   ;;  %s6424_s0 = inlined_call_operand.vmem [shape: bf16[8,2,384], index: 0, kind: input, shape index: {}]   ;;  %s6425_s4 = inlined_call_operand.vmem [shape: f32[1,384], index: 4, kind: input, shape index: {}]   ;;  %s6426_s6 = inlined_call_operand.vmem [shape: f32[1,384], index: 6, kind: input, shape index: {}]   ;;  %s6427_s7 = inlined_call_operand.vmem [shape: bf16[8,2,128], index: 7, kind: output, shape index: {}]  }
   0x1   :  { %v4215_v0 = vld [vmem:[%s6420_s1 + $0xac] ss:$12 sps:$4 sm:$0xff]   ;;  %3286 = vmatprep.subr.bf16.mxu1 %v6430_v1  ;;  %335 = vmatprep.mubr.bf16.mxu0 %v6428_v2  ;;  %v4222_v3 = vld [vmem:[%s6420_s1 + $0xa8] ss:$12 sps:$4 sm:$0xff]   ;;  %v4236_v5 = vld [vmem:[%s6420_s1 + $0x90] ss:$12 sps:$4 sm:$0xff]  }
   0x2   :  { %3302 = vmatprep.mubr.msk.bf16.mxu1 %vm4171_vm0, %v6430_v1  ;;  %303 = vmatprep.subr.bf16.mxu0 %v4215_v0  ;;  %v4230_v4 = vld [vmem:[%s6420_s1 + $0x94] ss:$12 sps:$4 sm:$0xff]   ;;  %v4242_v6 = vld [vmem:[%s6420_s1 + $0x7c] ss:$12 sps:$4 sm:$0xff]   ;;  %v4248_v7 = vld [vmem:[%s6420_s1 + $0x78] ss:$12 sps:$4 sm:$0xff]  }
   0x3   :  { %304 = vmatpush1.bf16.msra.mxu0 %v4222_v3  ;;  %v4254_v8 = vld [vmem:[%s6420_s1 + $0x64] ss:$12 sps:$4 sm:$0xff]   ;;  %v4259_v9 = vld [vmem:[%s6420_s1 + $0x60] ss:$12 sps:$4 sm:$0xff]   ;;  %v4284_v13 = vld [vmem:[%s6420_s1 + $0x48] ss:$12 sps:$4 sm:$0xff]  }
   0x4   :  { %305 = vmatprep.subr.bf16.mxu0 %v4230_v4  ;;  %v4265_v10 = vld [vmem:[%s6420_s1 + $0xb0] ss:$12 sps:$4 sm:$0xff]   ;;  %v4271_v11 = vld [vmem:[%s6420_s1 + $0x4c] ss:$12 sps:$4 sm:$0xff]   ;;  %v4290_v14 = vld [vmem:[%s6420_s1 + $0x34] ss:$12 sps:$4 sm:$0xff]  }
   0x5   :  { %3287 = vmatpush3.bf16.msra.mxu1 %v4265_v10  ;;  %v4277_v12 = vld [vmem:[%s6420_s1 + $0x98] ss:$12 sps:$4 sm:$0xff]   ;;  %v4296_v15 = vld [vmem:[%s6420_s1 + $0x80] ss:$12 sps:$4 sm:$0xff]   ;;  %v4303_v16 = vld [vmem:[%s6420_s1 + $0x30] ss:$12 sps:$4 sm:$0xff]  }
   0x6   :  { %3288 = vmatprep.subr.bf16.mxu1 %v6430_v1  ;;  %v4309_v17 = vld [vmem:[%s6420_s1 + $0x1c] ss:$12 sps:$4 sm:$0xff]   ;;  %v4322_v19 = vld [vmem:[%s6420_s1 + $0x18] ss:$12 sps:$4 sm:$0xff]   ;;  %v4341_v22 = vld [vmem:[%s6420_s1] ss:$12 sps:$4 sm:$0xff]  }
   0x7   :  { %306 = vmatpush1.bf16.msra.mxu0 %v4236_v5  ;;  %v4315_v18 = vld [vmem:[%s6420_s1 + $0x68] ss:$12 sps:$4 sm:$0xff]   ;;  %v4328_v20 = vld [vmem:[%s6420_s1 + $0x4] ss:$12 sps:$4 sm:$0xff]   ;;  %v4356_v24 = vld [vmem:[%s6420_s1 + $0x20] ss:$12 sps:$4 sm:$0xff]  }
   0x8   :  { %307 = vmatprep.subr.bf16.mxu0 %v4242_v6  ;;  %v4334_v21 = vld [vmem:[%s6420_s1 + $0x50] ss:$12 sps:$4 sm:$0xff]   ;;  %v4348_v23 = vld [vmem:[%s6420_s1 + $0x38] ss:$12 sps:$4 sm:$0xff]   ;;  %v4365_v25 = vld [vmem:[%s6420_s1 + $0x8] ss:$12 sps:$4 sm:$0xff]  }
   0x9   :  { %3289 = vmatpush3.bf16.msra.mxu1 %v4277_v12  ;;  %v4376_v26 = vld [vmem:[%s6421_s3 + $0xac] ss:$12 sps:$4 sm:$0xff]   ;;  %v4381_v27 = vld [vmem:[%s6421_s3 + $0xa8] ss:$12 sps:$4 sm:$0xff]   ;;  %v4387_v28 = vld [vmem:[%s6421_s3 + $0xb0] ss:$12 sps:$4 sm:$0xff]  }
   0xa   :  { %3290 = vmatprep.subr.bf16.mxu1 %v6430_v1  ;;  %6566 = vst [vmem:[#allocation2_spill] sm:$0xff] %v4381_v27  ;;  %6567 = vst [vmem:[#allocation3_spill] sm:$0xff] %v4387_v28  ;;  %v4394_v29 = vld [vmem:[%s6421_s3 + $0x94] ss:$12 sps:$4 sm:$0xff]   ;;  %v4400_v30 = vld [vmem:[%s6421_s3 + $0x90] ss:$12 sps:$4 sm:$0xff]  }
   0xb   :  { %308 = vmatpush1.bf16.msra.mxu0 %v4248_v7  ;;  %6568 = vst [vmem:[#allocation4_spill] sm:$0xff] %v4394_v29  ;;  %6569 = vst [vmem:[#allocation5_spill] sm:$0xff] %v4400_v30  ;;  %v4405_v31 = vld [vmem:[%s6421_s3 + $0x98] ss:$12 sps:$4 sm:$0xff]   ;;  %v4413_v32 = vld [vmem:[%s6421_s3 + $0x7c] ss:$12 sps:$4 sm:$0xff]  }
   0xc   :  { %309 = vmatprep.subr.bf16.mxu0 %v4254_v8  ;;  %6570 = vst [vmem:[#allocation6_spill] sm:$0xff] %v4405_v31  ;;  %6571 = vst [vmem:[#allocation7_spill] sm:$0xff] %v4413_v32  ;;  %v4419_v33 = vld [vmem:[%s6421_s3 + $0x78] ss:$12 sps:$4 sm:$0xff]   ;;  %v4424_v34 = vld [vmem:[%s6421_s3 + $0x80] ss:$12 sps:$4 sm:$0xff]  }
   0xd   :  { %3291 = vmatpush3.bf16.msra.mxu1 %v4296_v15  ;;  %6572 = vst [vmem:[#allocation8_spill] sm:$0xff] %v4419_v33  ;;  %6573 = vst [vmem:[#allocation9_spill] sm:$0xff] %v4424_v34  ;;  %v4432_v35 = vld [vmem:[%s6421_s3 + $0x64] ss:$12 sps:$4 sm:$0xff]   ;;  %v4438_v36 = vld [vmem:[%s6421_s3 + $0x60] ss:$12 sps:$4 sm:$0xff]  }
   0xe   :  { %3292 = vmatprep.subr.bf16.mxu1 %v6430_v1  ;;  %6574 = vst [vmem:[#allocation10_spill] sm:$0xff] %v4432_v35  ;;  %6575 = vst [vmem:[#allocation11_spill] sm:$0xff] %v4438_v36  ;;  %v4443_v37 = vld [vmem:[%s6421_s3 + $0x68] ss:$12 sps:$4 sm:$0xff]   ;;  %v4450_v38 = vld [vmem:[%s6421_s3 + $0x4c] ss:$12 sps:$4 sm:$0xff]  }
   0xf   :  { %310 = vmatpush1.bf16.msra.mxu0 %v4259_v9  ;;  %6576 = vst [vmem:[#allocation12_spill] sm:$0xff] %v4443_v37  ;;  %6577 = vst [vmem:[#allocation13_spill] sm:$0xff] %v4450_v38  ;;  %v4455_v39 = vld [vmem:[%s6421_s3 + $0x48] ss:$12 sps:$4 sm:$0xff]   ;;  %v4461_v40 = vld [vmem:[%s6421_s3 + $0x50] ss:$12 sps:$4 sm:$0xff]  }
  0x10   :  { %311 = vmatprep.subr.bf16.mxu0 %v4271_v11  ;;  %6578 = vst [vmem:[#allocation14_spill] sm:$0xff] %v4455_v39  ;;  %6579 = vst [vmem:[#allocation15_spill] sm:$0xff] %v4461_v40  ;;  %v4466_v41 = vld [vmem:[%s6421_s3 + $0x34] ss:$12 sps:$4 sm:$0xff]   ;;  %v4473_v42 = vld [vmem:[%s6421_s3 + $0x30] ss:$12 sps:$4 sm:$0xff]  }
  0x11   :  { %3293 = vmatpush3.bf16.msra.mxu1 %v4315_v18  ;;  %6580 = vst [vmem:[#allocation16_spill] sm:$0xff] %v4466_v41  ;;  %6581 = vst [vmem:[#allocation17_spill] sm:$0xff] %v4473_v42  ;;  %v4478_v43 = vld [vmem:[%s6421_s3 + $0x38] ss:$12 sps:$4 sm:$0xff]   ;;  %v4484_v44 = vld [vmem:[%s6421_s3 + $0x1c] ss:$12 sps:$4 sm:$0xff]  }
  0x12   :  { %3294 = vmatprep.subr.bf16.mxu1 %v6430_v1  ;;  %6582 = vst [vmem:[#allocation18_spill] sm:$0xff] %v4478_v43  ;;  %6583 = vst [vmem:[#allocation19_spill] sm:$0xff] %v4484_v44  ;;  %v4492_v45 = vld [vmem:[%s6421_s3 + $0x18] ss:$12 sps:$4 sm:$0xff]   ;;  %v4497_v46 = vld [vmem:[%s6421_s3 + $0x20] ss:$12 sps:$4 sm:$0xff]  }
  0x13   :  { %312 = vmatpush1.bf16.msra.mxu0 %v4284_v13  ;;  %6584 = vst [vmem:[#allocation20_spill] sm:$0xff] %v4492_v45  ;;  %6585 = vst [vmem:[#allocation21_spill] sm:$0xff] %v4497_v46  ;;  %v4502_v47 = vld [vmem:[%s6421_s3 + $0x4] ss:$12 sps:$4 sm:$0xff]   ;;  %v4511_v48 = vld [vmem:[%s6421_s3] ss:$12 sps:$4 sm:$0xff]  }
  0x14   :  { %313 = vmatprep.subr.bf16.mxu0 %v4290_v14  ;;  %6586 = vst [vmem:[#allocation22_spill] sm:$0xff] %v4502_v47  ;;  %6587 = vst [vmem:[#allocation23_spill] sm:$0xff] %v4511_v48  ;;  %v4516_v49 = vld [vmem:[%s6421_s3 + $0x8] ss:$12 sps:$4 sm:$0xff]   ;;  %v4521_v50 = vld [vmem:[%s6422_s5 + $0xac] ss:$12 sps:$4 sm:$0xff]  }
  0x15   :  { %3295 = vmatpush3.bf16.msra.mxu1 %v4334_v21  ;;  %6588 = vst [vmem:[#allocation24_spill] sm:$0xff] %v4516_v49  ;;  %6589 = vst [vmem:[#allocation25_spill] sm:$0xff] %v4521_v50  ;;  %v126_v52 = vshrl.u32 %v125_v51, 7  ;;  %v123_v54 = vld [vmem:[%s6423_s2] sm:$0x7] }
  0x16   :  { %3296 = vmatprep.subr.bf16.mxu1 %v6430_v1  ;;  %v174_v55 = vld [vmem:[%s6424_s0] sm:$0x7] }
  0x17   :  { %314 = vmatpush1.bf16.msra.mxu0 %v4303_v16  ;;  %v4531_v53 = vsub.s32 0, %v126_v52  ;;  %v4542_v57 = vsub.s32 1, %v126_v52  ;;  %v384_v58 = vunpack.c.l.bf16 %v174_v55  ;;  %v393_v62 = vrot.slane %v174_v55, 1 }
  0x18   :  { %315 = vmatprep.subr.bf16.mxu0 %v4309_v17 }
  0x19   :  { %3297 = vmatpush3.bf16.msra.mxu1 %v4348_v23  ;;  %6590 = vst [vmem:[#allocation26_spill] sm:$0xff] %v4531_v53  ;;  %v4540_v56 = vrot.slane %v123_v54, %v4531_v53  ;;  %6592 = vst [vmem:[#allocation28_spill] sm:$0xff] %v4542_v57  ;;  %v4546_v61 = vrot.slane %v123_v54, %v4542_v57  ;;  %v4549_v57 = vsub.s32 2, %v126_v52 }
  0x1a   :  { %3298 = vmatprep.subr.bf16.mxu1 %v6430_v1 }
  0x1b   :  { %316 = vmatpush1.bf16.msra.mxu0 %v4322_v19  ;;  %6591 = vst [vmem:[#allocation27_spill] sm:$0xff] %v4540_v56 }
  0x1c   :  { %317 = vmatprep.subr.bf16.mxu0 %v4328_v20 }
  0x1d   :  { %3299 = vmatpush3.bf16.msra.mxu1 %v4356_v24 }
  0x1e   :  { %3300 = vmatprep.subr.bf16.mxu1 %v6430_v1 }
  0x1f   :  { %318 = vmatpush1.bf16.msra.mxu0 %v4341_v22 }
  0x20   :  { %542 = vmatprep.subr.bf16.mxu0 %v4376_v26 }
  0x21   :  { %3301 = vmatpush3.bf16.msra.mxu1 %v4365_v25 }
  0x22   :  { %336 = vmatmul.mubr.bf16.vlgmr.msra.gmra.mxu0 %v6428_v2  ;;  %3306 = vmatprep.subr.bf16.mxu1 %v6430_v1 }
  0x23   :  { %574 = vmatprep.mubr.bf16.mxu0 %v6428_v2  ;;  %543 = vmatpush1.bf16.msra.mxu0 %v4381_v27 }
  0x24   :  { %3303 = vmatmul.mubr.bf16.vlgmr.msra.gmra.mxu1 %v6428_v2  ;;  %544 = vmatprep.subr.bf16.mxu0 %v4394_v29 }
  0x25   :  { %3322 = vmatprep.mubr.msk.bf16.mxu1 %vm4171_vm0, %v6430_v1  ;;  %3307 = vmatpush3.bf16.msra.mxu1 %v4387_v28 }
  0x26   :  { %3308 = vmatprep.subr.bf16.mxu1 %v6430_v1 }
  0x27   :  { %545 = vmatpush1.bf16.msra.mxu0 %v4400_v30 }
  0x28   :  { %546 = vmatprep.subr.bf16.mxu0 %v4413_v32 }
  0x29   :  { %3309 = vmatpush3.bf16.msra.mxu1 %v4405_v31 }
  0x2a   :  { %3310 = vmatprep.subr.bf16.mxu1 %v6430_v1 }
  0x2b   :  { %547 = vmatpush1.bf16.msra.mxu0 %v4419_v33 }
  0x2c   :  { %548 = vmatprep.subr.bf16.mxu0 %v4432_v35 }
  0x2d   :  { %3311 = vmatpush3.bf16.msra.mxu1 %v4424_v34 }
  0x2e   :  { %3312 = vmatprep.subr.bf16.mxu1 %v6430_v1 }
  0x2f   :  { %549 = vmatpush1.bf16.msra.mxu0 %v4438_v36 }
  0x30   :  { %550 = vmatprep.subr.bf16.mxu0 %v4450_v38 }
  0x31   :  { %3313 = vmatpush3.bf16.msra.mxu1 %v4443_v37 }
  0x32   :  { %3314 = vmatprep.subr.bf16.mxu1 %v6430_v1 }
  0x33   :  { %551 = vmatpush1.bf16.msra.mxu0 %v4455_v39 }
  0x34   :  { %552 = vmatprep.subr.bf16.mxu0 %v4466_v41 }
  0x35   :  { %3315 = vmatpush3.bf16.msra.mxu1 %v4461_v40 }
  0x36   :  { %3316 = vmatprep.subr.bf16.mxu1 %v6430_v1 }
  0x37   :  { %553 = vmatpush1.bf16.msra.mxu0 %v4473_v42 }
  0x38   :  { %554 = vmatprep.subr.bf16.mxu0 %v4484_v44 }
  0x39   :  { %3317 = vmatpush3.bf16.msra.mxu1 %v4478_v43 }
  0x3a   :  { %3318 = vmatprep.subr.bf16.mxu1 %v6430_v1 }
  0x3b   :  { %555 = vmatpush1.bf16.msra.mxu0 %v4492_v45 }
  0x3c   :  { %556 = vmatprep.subr.bf16.mxu0 %v4502_v47 }
  0x3d   :  { %3319 = vmatpush3.bf16.msra.mxu1 %v4497_v46 }
  0x3e   :  { %3320 = vmatprep.subr.bf16.mxu1 %v6430_v1 }
  0x3f   :  { %557 = vmatpush1.bf16.msra.mxu0 %v4511_v48 }
  0x40   :  { %751 = vmatprep.subr.bf16.mxu0 %v4521_v50 }
  0x41   :  { %3321 = vmatpush3.bf16.msra.mxu1 %v4516_v49  ;;  %v395_v49 = vunpack.c.l.bf16 %v393_v62 }
  0x42   :  { %3326 = vmatprep.subr.bf16.mxu1 %v6430_v1 }
  0xe2   :  { %v337_v59 = vpop.f32.mrf.mxu0 }
  0xe3   :  { %v338_v60 = vadd.f32 %v337_v59, %v4540_v56 }
  0xe4   :  { %v339_v63 = vpop.f32.mrf.mxu0  ;;  %v378_v47 = vpop.f32.mrf.mxu1 }
  0xe5   :  { %v385_v51 = vadd.f32 %v384_v58, %v338_v60  ;;  %v340_v50 = vadd.f32 %v339_v63, %v4546_v61  ;;  %v404_v60 = vrot.slane %v174_v55, 2  ;;  %v4574_v63 = vld [vmem:[%s6422_s5 + $0x94] ss:$12 sps:$4 sm:$0xff]  }
  0xe6   :  { %v341_v2 = vpop.f32.mrf.mxu0  ;;  %v3304_v46 = vpop.f32.mrf.mxu1 }
  0xe7   :  { %v2976_v1 = vmul.f32 -1.442695, %v385_v51  ;;  %v396_v53 = vadd.f32 %v395_v49, %v340_v50  ;;  %v4552_v2 = vrot.slane %v123_v54, %v4549_v57  ;;  %v4560_v54 = vld [vmem:[%s6422_s5 + $0xa8] ss:$12 sps:$4 sm:$0xff]   ;;  %v4583_v51 = vld [vmem:[%s6422_s5 + $0x90] ss:$12 sps:$4 sm:$0xff]  }
  0xe8   :  { %v342_v48 = vpop.f32.mrf.mxu0  ;;  %v381_v44 = vpop.f32.mrf.mxu1 }
  0xe9   :  { %3865 = vpow2.f32 %v2976_v1  ;;  %v2977_v45 = vmul.f32 -1.442695, %v396_v53  ;;  %v379_v1 = vadd.f32 %v378_v47, %v4552_v2  ;;  %v406_v48 = vunpack.c.l.bf16 %v404_v60  ;;  %v4565_v47 = vld [vmem:[%s6422_s5 + $0xb0] ss:$12 sps:$4 sm:$0xff]  }
  0xea   :  { %v3305_v43 = vpop.f32.mrf.mxu1  ;;  %v4595_v60 = vld [vmem:[%s6422_s5 + $0x7c] ss:$12 sps:$4 sm:$0xff]  }
  0xeb   :  { %3867 = vpow2.f32 %v2977_v45 }
  0xf6   :  { %v3866_v59 = vpop.eup %3865 }
  0xf7   :  { %v389_v56 = vadd.f32 1.0, %v3866_v59  ;;  %v4588_v59 = vld [vmem:[%s6422_s5 + $0x98] ss:$12 sps:$4 sm:$0xff]  }
  0xf8   :  { %v3868_v58 = vpop.eup %3867 }
  0xf9   :  { %3869 = vrcp.f32 %v389_v56  ;;  %v400_v62 = vadd.f32 1.0, %v3868_v58  ;;  %v6593_v58 = vmov 0.0  }
  0xfb   :  { %3871 = vrcp.f32 %v400_v62  ;;  %v6594_v62 = vmov 0  }
 0x106   :  { %v3870_v49 = vpop.eup %3869 }
 0x107   :  { %v403_v46 = vmul.f32 %v3870_v49, %v379_v1  ;;  %v4605_v1 = vld [vmem:[%s6422_s5 + $0x78] ss:$12 sps:$4 sm:$0xff]  }
 0x108   :  { %v3872_v43 = vpop.eup %3871  ;;  %v4617_v49 = vld [vmem:[%s6422_s5 + $0x64] ss:$12 sps:$4 sm:$0xff]  }
 0x109   :  { %v407_v44 = vadd.f32 %v406_v48, %v403_v46  ;;  %v409_v45 = vsub.f32 1.0, %v3872_v43  ;;  %v411_v52 = vmul.f32 0.0, %v3872_v43  ;;  %v4610_v48 = vld [vmem:[%s6422_s5 + $0x80] ss:$12 sps:$4 sm:$0xff]  }
 0x10a   :  { %v4624_v46 = vld [vmem:[%s6422_s5 + $0x60] ss:$12 sps:$4 sm:$0xff]  }
 0x10b   :  { %3873 = vtanh.f32 %v407_v44  ;;  %v4629_v44 = vld [vmem:[%s6422_s5 + $0x68] ss:$12 sps:$4 sm:$0xff]   ;;  %v4636_v43 = vld [vmem:[%s6422_s5 + $0x4c] ss:$12 sps:$4 sm:$0xff]  }
 0x10c   :  { %6595 = vst [vmem:[#allocation29_spill] sm:$0xff] %v4636_v43 }
 0x118   :  { %v3874_v50 = vpop.eup %3873 }
 0x119   :  { %v410_v53 = vmul.f32 %v3874_v50, %v409_v45  ;;  %v4643_v45 = vld [vmem:[%s6422_s5 + $0x48] ss:$12 sps:$4 sm:$0xff]   ;;  %v4648_v50 = vld [vmem:[%s6422_s5 + $0x50] ss:$12 sps:$4 sm:$0xff]  }
 0x11a   :  { %6596 = vst [vmem:[#allocation30_spill] sm:$0xff] %v4643_v45  ;;  %6597 = vst [vmem:[#allocation31_spill] sm:$0xff] %v4648_v50 }
 0x11b   :  { %v4555_v56 = vadd.f32 %v411_v52, %v410_v53  ;;  %v4655_v53 = vld [vmem:[%s6422_s5 + $0x34] ss:$12 sps:$4 sm:$0xff]   ;;  %v4662_v52 = vld [vmem:[%s6422_s5 + $0x30] ss:$12 sps:$4 sm:$0xff]  }
 0x11c   :  { %6598 = vst [vmem:[#allocation32_spill] sm:$0xff] %v4655_v53  ;;  %6599 = vst [vmem:[#allocation33_spill] sm:$0xff] %v4662_v52 }
 0x11d   :  { %v4569_v55 = vpack.c.bf16 %v4555_v56, %v4555_v56 }
 0x11f   :  { %575 = vmatmul.mubr.bf16.vlgmr.msra.gmra.mxu0 %v4569_v55  ;;  %3323 = vmatmul.mubr.bf16.vlgmr.msra.gmra.mxu1 %v4569_v55 }
 0x120   :  { %752 = vmatpush1.bf16.msra.mxu0 %v4560_v54  ;;  %3327 = vmatpush3.bf16.msra.mxu1 %v4565_v47 }
 0x121   :  { %753 = vmatprep.subr.bf16.mxu0 %v4574_v63  ;;  %3328 = vmatprep.subr.bf16.mxu1 %v6593_v58 }
 0x122   :  { %783 = vmatprep.mubr.bf16.mxu0 %v6594_v62  ;;  %3342 = vmatprep.mubr.msk.bf16.mxu1 %vm4171_vm0, %v6593_v58 }
 0x124   :  { %754 = vmatpush1.bf16.msra.mxu0 %v4583_v51  ;;  %3329 = vmatpush3.bf16.msra.mxu1 %v4588_v59 }
 0x125   :  { %755 = vmatprep.subr.bf16.mxu0 %v4595_v60  ;;  %3330 = vmatprep.subr.bf16.mxu1 %v6593_v58 }
 0x128   :  { %756 = vmatpush1.bf16.msra.mxu0 %v4605_v1  ;;  %3331 = vmatpush3.bf16.msra.mxu1 %v4610_v48 }
 0x129   :  { %757 = vmatprep.subr.bf16.mxu0 %v4617_v49  ;;  %3332 = vmatprep.subr.bf16.mxu1 %v6593_v58 }
 0x12c   :  { %758 = vmatpush1.bf16.msra.mxu0 %v4624_v46  ;;  %3333 = vmatpush3.bf16.msra.mxu1 %v4629_v44 }
 0x12d   :  { %759 = vmatprep.subr.bf16.mxu0 %v4636_v43  ;;  %3334 = vmatprep.subr.bf16.mxu1 %v6593_v58  ;;  %v4667_v43 = vld [vmem:[%s6422_s5 + $0x38] ss:$12 sps:$4 sm:$0xff]  }
 0x12e   :  { %6600 = vst [vmem:[#allocation34_spill] sm:$0xff] %v4667_v43 }
 0x130   :  { %760 = vmatpush1.bf16.msra.mxu0 %v4643_v45  ;;  %3335 = vmatpush3.bf16.msra.mxu1 %v4648_v50  ;;  %v4674_v45 = vld [vmem:[%s6422_s5 + $0x1c] ss:$12 sps:$4 sm:$0xff]   ;;  %v4681_v50 = vld [vmem:[%s6422_s5 + $0x18] ss:$12 sps:$4 sm:$0xff]  }
 0x131   :  { %761 = vmatprep.subr.bf16.mxu0 %v4655_v53  ;;  %3336 = vmatprep.subr.bf16.mxu1 %v6593_v58  ;;  %6601 = vst [vmem:[#allocation35_spill] sm:$0xff] %v4674_v45  ;;  %v4686_v53 = vld [vmem:[%s6422_s5 + $0x20] ss:$12 sps:$4 sm:$0xff]  }
 0x134   :  { %762 = vmatpush1.bf16.msra.mxu0 %v4662_v52  ;;  %3337 = vmatpush3.bf16.msra.mxu1 %v4667_v43  ;;  %v4693_v52 = vld [vmem:[%s6422_s5 + $0x4] ss:$12 sps:$4 sm:$0xff]   ;;  %v4700_v43 = vld [vmem:[%s6422_s5] ss:$12 sps:$4 sm:$0xff]  }
 0x135   :  { %763 = vmatprep.subr.bf16.mxu0 %v4674_v45  ;;  %3338 = vmatprep.subr.bf16.mxu1 %v6593_v58  ;;  %v4705_v45 = vld [vmem:[%s6422_s5 + $0x8] ss:$12 sps:$4 sm:$0xff]  }
 0x138   :  { %764 = vmatpush1.bf16.msra.mxu0 %v4681_v50  ;;  %3339 = vmatpush3.bf16.msra.mxu1 %v4686_v53 }
 0x139   :  { %765 = vmatprep.subr.bf16.mxu0 %v4693_v52  ;;  %3340 = vmatprep.subr.bf16.mxu1 %v6593_v58 }
 0x13c   :  { %766 = vmatpush1.bf16.msra.mxu0 %v4700_v43  ;;  %3341 = vmatpush3.bf16.msra.mxu1 %v4705_v45 }
 0x13d   :  { %857 = vmatprep.subr.bf16.mxu0 %v4215_v0  ;;  %3346 = vmatprep.subr.bf16.mxu1 %v6593_v58  ;;  %v6602_v0 = vld [vmem:[#allocation18_spill] sm:$0xff] }
 0x13f   :  { %784 = vmatmul.mubr.bf16.vlgmr.msra.gmra.mxu0 %v6594_v62  ;;  %3343 = vmatmul.mubr.bf16.vlgmr.msra.gmra.mxu1 %v6594_v62 }
 0x140   :  { %858 = vmatpush1.bf16.msra.mxu0 %v4222_v3  ;;  %3347 = vmatpush3.bf16.msra.mxu1 %v4265_v10  ;;  %v6603_v3 = vld [vmem:[#allocation19_spill] sm:$0xff] }
 0x141   :  { %859 = vmatprep.subr.bf16.mxu0 %v4230_v4  ;;  %3348 = vmatprep.subr.bf16.mxu1 %v6593_v58  ;;  %v6604_v4 = vld [vmem:[#allocation20_spill] sm:$0xff] }
 0x142   :  { %889 = vmatprep.mubr.bf16.mxu0 %v6594_v62  ;;  %3362 = vmatprep.mubr.msk.bf16.mxu1 %vm4171_vm0, %v6593_v58 }
 0x144   :  { %860 = vmatpush1.bf16.msra.mxu0 %v4236_v5  ;;  %3349 = vmatpush3.bf16.msra.mxu1 %v4277_v12  ;;  %v6605_v5 = vld [vmem:[#allocation21_spill] sm:$0xff] }
 0x145   :  { %861 = vmatprep.subr.bf16.mxu0 %v4242_v6  ;;  %3350 = vmatprep.subr.bf16.mxu1 %v6593_v58  ;;  %v6606_v6 = vld [vmem:[#allocation22_spill] sm:$0xff] }
 0x148   :  { %862 = vmatpush1.bf16.msra.mxu0 %v4248_v7  ;;  %3351 = vmatpush3.bf16.msra.mxu1 %v4296_v15  ;;  %v6607_v7 = vld [vmem:[#allocation23_spill] sm:$0xff] }
 0x149   :  { %863 = vmatprep.subr.bf16.mxu0 %v4254_v8  ;;  %3352 = vmatprep.subr.bf16.mxu1 %v6593_v58  ;;  %v6608_v8 = vld [vmem:[#allocation24_spill] sm:$0xff] }
 0x14c   :  { %864 = vmatpush1.bf16.msra.mxu0 %v4259_v9  ;;  %3353 = vmatpush3.bf16.msra.mxu1 %v4315_v18  ;;  %v6609_v9 = vld [vmem:[#allocation25_spill] sm:$0xff] }
 0x14d   :  { %865 = vmatprep.subr.bf16.mxu0 %v4271_v11  ;;  %3354 = vmatprep.subr.bf16.mxu1 %v6593_v58 }
 0x150   :  { %866 = vmatpush1.bf16.msra.mxu0 %v4284_v13  ;;  %3355 = vmatpush3.bf16.msra.mxu1 %v4334_v21 }
 0x151   :  { %867 = vmatprep.subr.bf16.mxu0 %v4290_v14  ;;  %3356 = vmatprep.subr.bf16.mxu1 %v6593_v58 }
 0x154   :  { %868 = vmatpush1.bf16.msra.mxu0 %v4303_v16  ;;  %3357 = vmatpush3.bf16.msra.mxu1 %v4348_v23 }
 0x155   :  { %869 = vmatprep.subr.bf16.mxu0 %v4309_v17  ;;  %3358 = vmatprep.subr.bf16.mxu1 %v6593_v58 }
 0x158   :  { %870 = vmatpush1.bf16.msra.mxu0 %v4322_v19  ;;  %3359 = vmatpush3.bf16.msra.mxu1 %v4356_v24 }
 0x159   :  { %871 = vmatprep.subr.bf16.mxu0 %v4328_v20  ;;  %3360 = vmatprep.subr.bf16.mxu1 %v6593_v58 }
 0x15c   :  { %872 = vmatpush1.bf16.msra.mxu0 %v4341_v22  ;;  %3361 = vmatpush3.bf16.msra.mxu1 %v4365_v25 }
 0x15d   :  { %968 = vmatprep.subr.bf16.mxu0 %v4376_v26  ;;  %3366 = vmatprep.subr.bf16.mxu1 %v6593_v58 }
 0x15f   :  { %890 = vmatmul.mubr.bf16.vlgmr.msra.gmra.mxu0 %v4569_v55  ;;  %3363 = vmatmul.mubr.bf16.vlgmr.msra.gmra.mxu1 %v4569_v55 }
 0x160   :  { %969 = vmatpush1.bf16.msra.mxu0 %v4381_v27  ;;  %3367 = vmatpush3.bf16.msra.mxu1 %v4387_v28 }
 0x161   :  { %970 = vmatprep.subr.bf16.mxu0 %v4394_v29  ;;  %3368 = vmatprep.subr.bf16.mxu1 %v6593_v58 }
 0x162   :  { %1000 = vmatprep.mubr.bf16.mxu0 %v6594_v62  ;;  %3382 = vmatprep.mubr.msk.bf16.mxu1 %vm4171_vm0, %v6593_v58 }
 0x164   :  { %971 = vmatpush1.bf16.msra.mxu0 %v4400_v30  ;;  %3369 = vmatpush3.bf16.msra.mxu1 %v4405_v31 }
 0x165   :  { %972 = vmatprep.subr.bf16.mxu0 %v4413_v32  ;;  %3370 = vmatprep.subr.bf16.mxu1 %v6593_v58 }
 0x168   :  { %973 = vmatpush1.bf16.msra.mxu0 %v4419_v33  ;;  %3371 = vmatpush3.bf16.msra.mxu1 %v4424_v34 }
 0x169   :  { %974 = vmatprep.subr.bf16.mxu0 %v4432_v35  ;;  %3372 = vmatprep.subr.bf16.mxu1 %v6593_v58 }
 0x16c   :  { %975 = vmatpush1.bf16.msra.mxu0 %v4438_v36  ;;  %3373 = vmatpush3.bf16.msra.mxu1 %v4443_v37 }
 0x16d   :  { %976 = vmatprep.subr.bf16.mxu0 %v4450_v38  ;;  %3374 = vmatprep.subr.bf16.mxu1 %v6593_v58 }
 0x170   :  { %977 = vmatpush1.bf16.msra.mxu0 %v4455_v39  ;;  %3375 = vmatpush3.bf16.msra.mxu1 %v4461_v40 }
 0x171   :  { %978 = vmatprep.subr.bf16.mxu0 %v4466_v41  ;;  %3376 = vmatprep.subr.bf16.mxu1 %v6593_v58 }
 0x174   :  { %979 = vmatpush1.bf16.msra.mxu0 %v4473_v42  ;;  %3377 = vmatpush3.bf16.msra.mxu1 %v6602_v0 }
 0x175   :  { %980 = vmatprep.subr.bf16.mxu0 %v6603_v3  ;;  %3378 = vmatprep.subr.bf16.mxu1 %v6593_v58 }
 0x178   :  { %981 = vmatpush1.bf16.msra.mxu0 %v6604_v4  ;;  %3379 = vmatpush3.bf16.msra.mxu1 %v6605_v5 }
 0x179   :  { %982 = vmatprep.subr.bf16.mxu0 %v6606_v6  ;;  %3380 = vmatprep.subr.bf16.mxu1 %v6593_v58  ;;  %v140_v6 = vld [vmem:[%s6425_s4] sm:$0x7] }
 0x17c   :  { %983 = vmatpush1.bf16.msra.mxu0 %v6607_v7  ;;  %3381 = vmatpush3.bf16.msra.mxu1 %v6608_v8  ;;  %v157_v8 = vld [vmem:[%s6426_s6] sm:$0x7] }
 0x17d   :  { %1049 = vmatprep.subr.bf16.mxu0 %v6609_v9  ;;  %3386 = vmatprep.subr.bf16.mxu1 %v6593_v58  ;;  %v6610_v7 = vld [vmem:[#allocation26_spill] sm:$0xff] }
 0x17e   :  { %v4794_v9 = vrot.slane %v140_v6, %v6610_v7  ;;  %v4797_v40 = vrot.slane %v157_v8, %v6610_v7 }
 0x180   :  { %6611 = vst [vmem:[#allocation26_spill] sm:$0xff] %v4794_v9  ;;  %6612 = vst [vmem:[#allocation36_spill] sm:$0xff] %v4797_v40 }
 0x1df   :  { %v576_v11 = vpop.f32.mrf.mxu0  ;;  %v617_v55 = vpop.f32.mrf.mxu1 }
 0x1e1   :  { %v578_v3 = vpop.f32.mrf.mxu0  ;;  %v3324_v0 = vpop.f32.mrf.mxu1 }
 0x1e3   :  { %v580_v42 = vpop.f32.mrf.mxu0  ;;  %v620_v4 = vpop.f32.mrf.mxu1 }
 0x1e4   :  { %v577_v42 = vadd.f32 %v576_v11, %v4794_v9  ;;  %v6613_v4 = vld [vmem:[#allocation28_spill] sm:$0xff] }
 0x1e5   :  { %v581_v41 = vpop.f32.mrf.mxu0  ;;  %v3325_v5 = vpop.f32.mrf.mxu1  ;;  %v4805_v36 = vrot.slane %v140_v6, %v6613_v4 }
 0x1e6   :  { %v4802_v5 = vrot.slane %v157_v8, %v6613_v4 }
 0x1e7   :  { %6615 = vst [vmem:[#allocation37_spill] sm:$0xff] %v4805_v36  ;;  %v579_v11 = vadd.f32 %v578_v3, %v4805_v36 }
 0x1e8   :  { %6614 = vst [vmem:[#allocation28_spill] sm:$0xff] %v4802_v5 }
 0x1ff   :  { %v785_v39 = vpop.f32.mrf.mxu0  ;;  %v826_v0 = vpop.f32.mrf.mxu1 }
 0x200   :  { %v786_v41 = vadd.f32 %v785_v39, %v4797_v40 }
 0x201   :  { %v787_v38 = vpop.f32.mrf.mxu0  ;;  %v3344_v37 = vpop.f32.mrf.mxu1 }
 0x202   :  { %v832_v35 = vadd.f32 %v786_v41, %v577_v42  ;;  %v788_v7 = vadd.f32 %v787_v38, %v4802_v5  ;;  %v3028_v37 = vld [vmem:[%s6424_s0 + $0x3] sm:$0x7] }
 0x203   :  { %v789_v34 = vpop.f32.mrf.mxu0  ;;  %v829_v33 = vpop.f32.mrf.mxu1  ;;  %v947_v38 = vrot.slane %v3028_v37, 1 }
 0x204   :  { %v3026_v32 = vmul.f32 -1.442695, %v832_v35  ;;  %v839_v39 = vadd.f32 %v788_v7, %v579_v11  ;;  %v4813_v33 = vrot.slane %v157_v8, %v4549_v57  ;;  %v938_v35 = vunpack.c.l.bf16 %v3028_v37 }
 0x205   :  { %v790_v31 = vpop.f32.mrf.mxu0  ;;  %v3345_v30 = vpop.f32.mrf.mxu1  ;;  %v949_v11 = vunpack.c.l.bf16 %v947_v38 }
 0x206   :  { %3875 = vpow2.f32 %v3026_v32  ;;  %v3027_v40 = vmul.f32 -1.442695, %v839_v39  ;;  %v4816_v30 = vrot.slane %v140_v6, %v4549_v57 }
 0x208   :  { %3877 = vpow2.f32 %v3027_v40  ;;  %v827_v40 = vadd.f32 %v826_v0, %v4813_v33  ;;  %v618_v8 = vadd.f32 %v617_v55, %v4816_v30 }
 0x213   :  { %v3876_v9 = vpop.eup %3875 }
 0x214   :  { %v836_v29 = vadd.f32 1.0, %v3876_v9  ;;  %v6616_v9 = vld [vmem:[#allocation27_spill] sm:$0xff] }
 0x215   :  { %v3878_v34 = vpop.eup %3877 }
 0x216   :  { %3879 = vrcp.f32 %v836_v29  ;;  %v843_v3 = vadd.f32 1.0, %v3878_v34 }
 0x218   :  { %3881 = vrcp.f32 %v843_v3 }
 0x21f   :  { %v891_v31 = vpop.f32.mrf.mxu0  ;;  %v932_v32 = vpop.f32.mrf.mxu1 }
 0x220   :  { %v892_v29 = vadd.f32 %v891_v31, %v6616_v9 }
 0x221   :  { %v893_v42 = vpop.f32.mrf.mxu0  ;;  %v3364_v41 = vpop.f32.mrf.mxu1 }
 0x222   :  { %v939_v4 = vadd.f32 %v938_v35, %v892_v29  ;;  %v894_v5 = vadd.f32 %v893_v42, %v4546_v61 }
 0x223   :  { %v3880_v7 = vpop.eup %3879  ;;  %v895_v39 = vpop.f32.mrf.mxu0 }
 0x224   :  { %v935_v36 = vpop.f32.mrf.mxu1  ;;  %v846_v57 = vmul.f32 %v3880_v7, %v827_v40  ;;  %v3029_v6 = vmul.f32 -1.442695, %v939_v4  ;;  %v950_v0 = vadd.f32 %v949_v11, %v894_v5  ;;  %v958_v5 = vrot.slane %v3028_v37, 2 }
 0x225   :  { %v896_v28 = vpop.f32.mrf.mxu0  ;;  %v3882_v35 = vpop.eup %3881  ;;  %v933_v4 = vadd.f32 %v932_v32, %v4552_v2  ;;  %v6618_v32 = vld [vmem:[#allocation30_spill] sm:$0xff] }
 0x226   :  { %v3365_v34 = vpop.f32.mrf.mxu1  ;;  %v847_v27 = vadd.f32 %v846_v57, %v618_v8  ;;  %3883 = vpow2.f32 %v3029_v6  ;;  %v3030_v31 = vmul.f32 -1.442695, %v950_v0  ;;  %v849_v55 = vsub.f32 1.0, %v3882_v35 }
 0x227   :  { %v851_v3 = vmul.f32 0.0, %v3882_v35  ;;  %v960_v7 = vunpack.c.l.bf16 %v958_v5  ;;  %v4889_v5 = vld [vmem:[%s6420_s1 + $0x94] ss:$12 sps:$4 sm:$0xff]  }
 0x228   :  { %3885 = vtanh.f32 %v847_v27 }
 0x229   :  { %3887 = vpow2.f32 %v3030_v31 }
 0x233   :  { %v3884_v29 = vpop.eup %3883 }
 0x234   :  { %v943_v41 = vadd.f32 1.0, %v3884_v29  ;;  %v6619_v29 = vld [vmem:[#allocation31_spill] sm:$0xff] }
 0x235   :  { %v3886_v38 = vpop.eup %3885 }
 0x236   :  { %3889 = vrcp.f32 %v943_v41  ;;  %v850_v36 = vmul.f32 %v3886_v38, %v849_v55  ;;  %v3888_v27 = vpop.eup %3887  ;;  %v6620_v41 = vld [vmem:[#allocation32_spill] sm:$0xff]  ;;  %v6621_v55 = vld [vmem:[#allocation33_spill] sm:$0xff]  ;;  %v6622_v38 = vld [vmem:[#allocation34_spill] sm:$0xff] }
 0x237   :  { %v954_v42 = vadd.f32 1.0, %v3888_v27  ;;  %v4882_v27 = vld [vmem:[%s6420_s1 + $0xa8] ss:$12 sps:$4 sm:$0xff]  }
 0x238   :  { %v4822_v40 = vadd.f32 %v851_v3, %v850_v36  ;;  %v6623_v36 = vld [vmem:[#allocation35_spill] sm:$0xff] }
 0x239   :  { %3891 = vrcp.f32 %v954_v42  ;;  %v4875_v3 = vld [vmem:[%s6420_s1 + $0xac] ss:$12 sps:$4 sm:$0xff]  }
 0x23a   :  { %v853_v28 = vpack.c.bf16 %v4822_v40, %v4822_v40  ;;  %v4913_v42 = vld [vmem:[%s6420_s1 + $0x78] ss:$12 sps:$4 sm:$0xff]  }
 0x23c   :  { %854 = vst [vmem:[%s6427_s7] sm:$0x1] %v853_v28 }
 0x243   :  { %v3890_v8 = vpop.eup %3889 }
 0x244   :  { %v957_v11 = vmul.f32 %v3890_v8, %v933_v4  ;;  %v4927_v4 = vld [vmem:[%s6420_s1 + $0x60] ss:$12 sps:$4 sm:$0xff]   ;;  %v6639_v8 = vld [vmem:[#allocation16_spill] sm:$0xff] }
 0x246   :  { %v961_v39 = vadd.f32 %v960_v7, %v957_v11  ;;  %v3892_v57 = vpop.eup %3891  ;;  %v6638_v7 = vld [vmem:[#allocation15_spill] sm:$0xff]  ;;  %v6640_v11 = vld [vmem:[#allocation17_spill] sm:$0xff] }
 0x247   :  { %v963_v6 = vsub.f32 1.0, %v3892_v57  ;;  %v965_v31 = vmul.f32 %v3892_v57, %v4555_v56  ;;  %v6617_v56 = vld [vmem:[#allocation29_spill] sm:$0xff]  ;;  %v6642_v57 = vld [vmem:[#allocation19_spill] sm:$0xff] }
 0x248   :  { %3893 = vtanh.f32 %v961_v39  ;;  %v6641_v39 = vld [vmem:[#allocation18_spill] sm:$0xff] }
 0x255   :  { %v3894_v34 = vpop.eup %3893 }
 0x256   :  { %v964_v0 = vmul.f32 %v3894_v34, %v963_v6  ;;  %v6643_v6 = vld [vmem:[#allocation20_spill] sm:$0xff]  ;;  %v6644_v34 = vld [vmem:[#allocation21_spill] sm:$0xff] }
 0x258   :  { %v4831_v35 = vadd.f32 %v965_v31, %v964_v0  ;;  %v6645_v0 = vld [vmem:[#allocation22_spill] sm:$0xff]  ;;  %v6646_v31 = vld [vmem:[#allocation23_spill] sm:$0xff] }
 0x25a   :  { %v4835_v37 = vpack.c.bf16 %v4831_v35, %v4831_v35 }
 0x25c   :  { %1001 = vmatmul.mubr.bf16.vlgmr.msra.gmra.mxu0 %v4835_v37  ;;  %3383 = vmatmul.mubr.bf16.vlgmr.msra.gmra.mxu1 %v4835_v37 }
 0x25d   :  { %1050 = vmatpush1.bf16.msra.mxu0 %v4560_v54  ;;  %3387 = vmatpush3.bf16.msra.mxu1 %v4565_v47 }
 0x25e   :  { %1051 = vmatprep.subr.bf16.mxu0 %v4574_v63  ;;  %3388 = vmatprep.subr.bf16.mxu1 %v6593_v58 }
 0x25f   :  { %1081 = vmatprep.mubr.bf16.mxu0 %v6594_v62  ;;  %3402 = vmatprep.mubr.msk.bf16.mxu1 %vm4171_vm0, %v6593_v58 }
 0x261   :  { %1052 = vmatpush1.bf16.msra.mxu0 %v4583_v51  ;;  %3389 = vmatpush3.bf16.msra.mxu1 %v4588_v59 }
 0x262   :  { %1053 = vmatprep.subr.bf16.mxu0 %v4595_v60  ;;  %3390 = vmatprep.subr.bf16.mxu1 %v6593_v58 }
 0x265   :  { %1054 = vmatpush1.bf16.msra.mxu0 %v4605_v1  ;;  %3391 = vmatpush3.bf16.msra.mxu1 %v4610_v48 }
 0x266   :  { %1055 = vmatprep.subr.bf16.mxu0 %v4617_v49  ;;  %3392 = vmatprep.subr.bf16.mxu1 %v6593_v58 }
 0x269   :  { %1056 = vmatpush1.bf16.msra.mxu0 %v4624_v46  ;;  %3393 = vmatpush3.bf16.msra.mxu1 %v4629_v44 }
 0x26a   :  { %1057 = vmatprep.subr.bf16.mxu0 %v6617_v56  ;;  %3394 = vmatprep.subr.bf16.mxu1 %v6593_v58 }
 0x26d   :  { %1058 = vmatpush1.bf16.msra.mxu0 %v6618_v32  ;;  %3395 = vmatpush3.bf16.msra.mxu1 %v6619_v29 }
 0x26e   :  { %1059 = vmatprep.subr.bf16.mxu0 %v6620_v41  ;;  %3396 = vmatprep.subr.bf16.mxu1 %v6593_v58 }
 0x271   :  { %1060 = vmatpush1.bf16.msra.mxu0 %v6621_v55  ;;  %3397 = vmatpush3.bf16.msra.mxu1 %v6622_v38 }
 0x272   :  { %1061 = vmatprep.subr.bf16.mxu0 %v6623_v36  ;;  %3398 = vmatprep.subr.bf16.mxu1 %v6593_v58 }
 0x275   :  { %1062 = vmatpush1.bf16.msra.mxu0 %v4681_v50  ;;  %3399 = vmatpush3.bf16.msra.mxu1 %v4686_v53 }
 0x276   :  { %1063 = vmatprep.subr.bf16.mxu0 %v4693_v52  ;;  %3400 = vmatprep.subr.bf16.mxu1 %v6593_v58 }
 0x279   :  { %1064 = vmatpush1.bf16.msra.mxu0 %v4700_v43  ;;  %3401 = vmatpush3.bf16.msra.mxu1 %v4705_v45 }
 0x27a   :  { %1156 = vmatprep.subr.bf16.mxu0 %v4875_v3  ;;  %3406 = vmatprep.subr.bf16.mxu1 %v6593_v58 }
 0x27c   :  { %1082 = vmatmul.mubr.bf16.vlgmr.msra.gmra.mxu0 %v853_v28  ;;  %3403 = vmatmul.mubr.bf16.vlgmr.msra.gmra.mxu1 %v853_v28  ;;  %v4899_v28 = vld [vmem:[%s6420_s1 + $0x90] ss:$12 sps:$4 sm:$0xff]  }
 0x27d   :  { %1157 = vmatpush1.bf16.msra.mxu0 %v4882_v27  ;;  %3407 = vmatpush3.bf16.msra.mxu1 %v4265_v10  ;;  %v4906_v10 = vld [vmem:[%s6420_s1 + $0x7c] ss:$12 sps:$4 sm:$0xff]  }
 0x27e   :  { %1158 = vmatprep.subr.bf16.mxu0 %v4889_v5  ;;  %3408 = vmatprep.subr.bf16.mxu1 %v6593_v58 }
 0x27f   :  { %1188 = vmatprep.mubr.bf16.mxu0 %v6594_v62  ;;  %3422 = vmatprep.mubr.msk.bf16.mxu1 %vm4171_vm0, %v6593_v58 }
 0x281   :  { %1159 = vmatpush1.bf16.msra.mxu0 %v4899_v28  ;;  %3409 = vmatpush3.bf16.msra.mxu1 %v4277_v12  ;;  %v4920_v12 = vld [vmem:[%s6420_s1 + $0x64] ss:$12 sps:$4 sm:$0xff]  }
 0x282   :  { %1160 = vmatprep.subr.bf16.mxu0 %v4906_v10  ;;  %3410 = vmatprep.subr.bf16.mxu1 %v6593_v58 }
 0x285   :  { %1161 = vmatpush1.bf16.msra.mxu0 %v4913_v42  ;;  %3411 = vmatpush3.bf16.msra.mxu1 %v4296_v15  ;;  %v4934_v15 = vld [vmem:[%s6420_s1 + $0x4c] ss:$12 sps:$4 sm:$0xff]  }
 0x286   :  { %1162 = vmatprep.subr.bf16.mxu0 %v4920_v12  ;;  %3412 = vmatprep.subr.bf16.mxu1 %v6593_v58  ;;  %6624 = vst [vmem:[#allocation27_spill] sm:$0xff] %v4934_v15 }
 0x289   :  { %1163 = vmatpush1.bf16.msra.mxu0 %v4927_v4  ;;  %3413 = vmatpush3.bf16.msra.mxu1 %v4315_v18  ;;  %v6629_v18 = vld [vmem:[#allocation6_spill] sm:$0xff] }
 0x28a   :  { %1164 = vmatprep.subr.bf16.mxu0 %v4934_v15  ;;  %3414 = vmatprep.subr.bf16.mxu1 %v6593_v58 }
 0x28d   :  { %1165 = vmatpush1.bf16.msra.mxu0 %v4284_v13  ;;  %3415 = vmatpush3.bf16.msra.mxu1 %v4334_v21  ;;  %v6625_v13 = vld [vmem:[#allocation2_spill] sm:$0xff]  ;;  %v6632_v21 = vld [vmem:[#allocation9_spill] sm:$0xff] }
 0x28e   :  { %1166 = vmatprep.subr.bf16.mxu0 %v4290_v14  ;;  %3416 = vmatprep.subr.bf16.mxu1 %v6593_v58  ;;  %v6626_v14 = vld [vmem:[#allocation3_spill] sm:$0xff] }
 0x291   :  { %1167 = vmatpush1.bf16.msra.mxu0 %v4303_v16  ;;  %3417 = vmatpush3.bf16.msra.mxu1 %v4348_v23  ;;  %v6627_v16 = vld [vmem:[#allocation4_spill] sm:$0xff]  ;;  %v6634_v23 = vld [vmem:[#allocation11_spill] sm:$0xff] }
 0x292   :  { %1168 = vmatprep.subr.bf16.mxu0 %v4309_v17  ;;  %3418 = vmatprep.subr.bf16.mxu1 %v6593_v58  ;;  %v6628_v17 = vld [vmem:[#allocation5_spill] sm:$0xff] }
 0x295   :  { %1169 = vmatpush1.bf16.msra.mxu0 %v4322_v19  ;;  %3419 = vmatpush3.bf16.msra.mxu1 %v4356_v24  ;;  %v6630_v19 = vld [vmem:[#allocation7_spill] sm:$0xff]  ;;  %v6635_v24 = vld [vmem:[#allocation12_spill] sm:$0xff] }
 0x296   :  { %1170 = vmatprep.subr.bf16.mxu0 %v4328_v20  ;;  %3420 = vmatprep.subr.bf16.mxu1 %v6593_v58  ;;  %v6631_v20 = vld [vmem:[#allocation8_spill] sm:$0xff] }
 0x299   :  { %1171 = vmatpush1.bf16.msra.mxu0 %v4341_v22  ;;  %3421 = vmatpush3.bf16.msra.mxu1 %v4365_v25  ;;  %v6633_v22 = vld [vmem:[#allocation10_spill] sm:$0xff]  ;;  %v6636_v25 = vld [vmem:[#allocation13_spill] sm:$0xff] }
 0x29a   :  { %1267 = vmatprep.subr.bf16.mxu0 %v4376_v26  ;;  %3426 = vmatprep.subr.bf16.mxu1 %v6593_v58  ;;  %v6637_v26 = vld [vmem:[#allocation14_spill] sm:$0xff] }
 0x29c   :  { %1189 = vmatmul.mubr.bf16.vlgmr.msra.gmra.mxu0 %v4835_v37  ;;  %3423 = vmatmul.mubr.bf16.vlgmr.msra.gmra.mxu1 %v4835_v37  ;;  %v6647_v37 = vld [vmem:[#allocation24_spill] sm:$0xff] }
 0x29d   :  { %1268 = vmatpush1.bf16.msra.mxu0 %v6625_v13  ;;  %3427 = vmatpush3.bf16.msra.mxu1 %v6626_v14  ;;  %v6648_v13 = vld [vmem:[#allocation25_spill] sm:$0xff] }
 0x29e   :  { %1269 = vmatprep.subr.bf16.mxu0 %v6627_v16  ;;  %3428 = vmatprep.subr.bf16.mxu1 %v6593_v58 }
 0x29f   :  { %1299 = vmatprep.mubr.bf16.mxu0 %v6594_v62  ;;  %3442 = vmatprep.mubr.msk.bf16.mxu1 %vm4171_vm0, %v6593_v58 }
 0x2a1   :  { %1270 = vmatpush1.bf16.msra.mxu0 %v6628_v17  ;;  %3429 = vmatpush3.bf16.msra.mxu1 %v6629_v18 }
 0x2a2   :  { %1271 = vmatprep.subr.bf16.mxu0 %v6630_v19  ;;  %3430 = vmatprep.subr.bf16.mxu1 %v6593_v58 }
 0x2a5   :  { %1272 = vmatpush1.bf16.msra.mxu0 %v6631_v20  ;;  %3431 = vmatpush3.bf16.msra.mxu1 %v6632_v21 }
 0x2a6   :  { %1273 = vmatprep.subr.bf16.mxu0 %v6633_v22  ;;  %3432 = vmatprep.subr.bf16.mxu1 %v6593_v58 }
 0x2a9   :  { %1274 = vmatpush1.bf16.msra.mxu0 %v6634_v23  ;;  %3433 = vmatpush3.bf16.msra.mxu1 %v6635_v24 }
 0x2aa   :  { %1275 = vmatprep.subr.bf16.mxu0 %v6636_v25  ;;  %3434 = vmatprep.subr.bf16.mxu1 %v6593_v58  ;;  %v6649_v25 = vld [vmem:[#allocation26_spill] sm:$0xff] }
 0x2ad   :  { %1276 = vmatpush1.bf16.msra.mxu0 %v6637_v26  ;;  %3435 = vmatpush3.bf16.msra.mxu1 %v6638_v7  ;;  %v6650_v7 = vld [vmem:[#allocation36_spill] sm:$0xff] }
 0x2ae   :  { %1277 = vmatprep.subr.bf16.mxu0 %v6639_v8  ;;  %3436 = vmatprep.subr.bf16.mxu1 %v6593_v58 }
 0x2b1   :  { %1278 = vmatpush1.bf16.msra.mxu0 %v6640_v11  ;;  %3437 = vmatpush3.bf16.msra.mxu1 %v6641_v39 }
 0x2b2   :  { %1279 = vmatprep.subr.bf16.mxu0 %v6642_v57  ;;  %3438 = vmatprep.subr.bf16.mxu1 %v6593_v58 }
 0x2b5   :  { %1280 = vmatpush1.bf16.msra.mxu0 %v6643_v6  ;;  %3439 = vmatpush3.bf16.msra.mxu1 %v6644_v34 }
 0x2b6   :  { %1281 = vmatprep.subr.bf16.mxu0 %v6645_v0  ;;  %3440 = vmatprep.subr.bf16.mxu1 %v6593_v58 }
 0x2b9   :  { %1282 = vmatpush1.bf16.msra.mxu0 %v6646_v31  ;;  %3441 = vmatpush3.bf16.msra.mxu1 %v6647_v37  ;;  %v6651_v31 = vld [vmem:[#allocation28_spill] sm:$0xff] }
 0x2ba   :  { %1348 = vmatprep.subr.bf16.mxu0 %v6648_v13  ;;  %3446 = vmatprep.subr.bf16.mxu1 %v6593_v58 }
 0x31c   :  { %v1002_v14 = vpop.f32.mrf.mxu0  ;;  %v1043_v16 = vpop.f32.mrf.mxu1 }
 0x31d   :  { %v1003_v26 = vadd.f32 %v1002_v14, %v6649_v25 }
 0x31e   :  { %v1004_v17 = vpop.f32.mrf.mxu0  ;;  %v3384_v18 = vpop.f32.mrf.mxu1 }
 0x320   :  { %v1006_v19 = vpop.f32.mrf.mxu0  ;;  %v1046_v20 = vpop.f32.mrf.mxu1 }
 0x321   :  { %v6652_v19 = vld [vmem:[#allocation37_spill] sm:$0xff] }
 0x322   :  { %v1007_v21 = vpop.f32.mrf.mxu0  ;;  %v3385_v22 = vpop.f32.mrf.mxu1  ;;  %v1005_v20 = vadd.f32 %v1004_v17, %v6652_v19 }
 0x33c   :  { %v1083_v23 = vpop.f32.mrf.mxu0  ;;  %v1124_v24 = vpop.f32.mrf.mxu1 }
 0x33d   :  { %v1084_v8 = vadd.f32 %v1083_v23, %v6650_v7  ;;  %v3034_v23 = vld [vmem:[%s6424_s0 + $0x6] sm:$0x7] }
 0x33e   :  { %v1085_v11 = vpop.f32.mrf.mxu0  ;;  %v3404_v39 = vpop.f32.mrf.mxu1 }
 0x33f   :  { %v1130_v57 = vadd.f32 %v1084_v8, %v1003_v26  ;;  %v1086_v37 = vadd.f32 %v1085_v11, %v6651_v31  ;;  %v1237_v8 = vunpack.c.l.bf16 %v3034_v23  ;;  %v1246_v11 = vrot.slane %v3034_v23, 1 }
 0x340   :  { %v1087_v6 = vpop.f32.mrf.mxu0  ;;  %v1127_v34 = vpop.f32.mrf.mxu1 }
 0x341   :  { %v3031_v0 = vmul.f32 -1.442695, %v1130_v57  ;;  %v1137_v21 = vadd.f32 %v1086_v37, %v1005_v20  ;;  %v1125_v37 = vadd.f32 %v1124_v24, %v4813_v33  ;;  %v1248_v20 = vunpack.c.l.bf16 %v1246_v11 }
 0x342   :  { %v1088_v13 = vpop.f32.mrf.mxu0  ;;  %v3405_v18 = vpop.f32.mrf.mxu1 }
 0x343   :  { %3895 = vpow2.f32 %v3031_v0  ;;  %v3032_v22 = vmul.f32 -1.442695, %v1137_v21 }
 0x345   :  { %3897 = vpow2.f32 %v3032_v22 }
 0x350   :  { %v3896_v15 = vpop.eup %3895 }
 0x351   :  { %v1134_v14 = vadd.f32 1.0, %v3896_v15  ;;  %v1044_v15 = vadd.f32 %v1043_v16, %v4816_v30 }
 0x352   :  { %v3898_v26 = vpop.eup %3897 }
 0x353   :  { %3899 = vrcp.f32 %v1134_v14  ;;  %v1141_v6 = vadd.f32 1.0, %v3898_v26 }
 0x355   :  { %3901 = vrcp.f32 %v1141_v6 }
 0x35c   :  { %v1190_v39 = vpop.f32.mrf.mxu0  ;;  %v1231_v57 = vpop.f32.mrf.mxu1 }
 0x35d   :  { %v1191_v34 = vadd.f32 %v1190_v39, %v6616_v9 }
 0x35e   :  { %v1192_v17 = vpop.f32.mrf.mxu0  ;;  %v3424_v0 = vpop.f32.mrf.mxu1 }
 0x35f   :  { %v1238_v13 = vadd.f32 %v1237_v8, %v1191_v34  ;;  %v1193_v31 = vadd.f32 %v1192_v17, %v4546_v61  ;;  %v1232_v17 = vadd.f32 %v1231_v57, %v4552_v2  ;;  %v5222_v57 = vld [vmem:[%s6421_s3 + $0x80] ss:$12 sps:$4 sm:$0xff]  }
 0x360   :  { %v3900_v18 = vpop.eup %3899  ;;  %v1194_v21 = vpop.f32.mrf.mxu0  ;;  %6668 = vst [vmem:[#allocation9_spill] sm:$0xff] %v5222_v57 }
 0x361   :  { %v1234_v22 = vpop.f32.mrf.mxu1  ;;  %v1144_v14 = vmul.f32 %v3900_v18, %v1125_v37  ;;  %v3035_v19 = vmul.f32 -1.442695, %v1238_v13  ;;  %v1249_v39 = vadd.f32 %v1248_v20, %v1193_v31  ;;  %v1257_v31 = vrot.slane %v3034_v23, 2 }
 0x362   :  { %v1195_v7 = vpop.f32.mrf.mxu0  ;;  %v3902_v24 = vpop.eup %3901 }
 0x363   :  { %v3425_v26 = vpop.f32.mrf.mxu1  ;;  %v1145_v25 = vadd.f32 %v1144_v14, %v1044_v15  ;;  %3903 = vpow2.f32 %v3035_v19  ;;  %v3036_v0 = vmul.f32 -1.442695, %v1249_v39  ;;  %v1147_v16 = vsub.f32 1.0, %v3902_v24 }
 0x364   :  { %v1149_v6 = vmul.f32 %v3902_v24, %v4822_v40  ;;  %v1259_v13 = vunpack.c.l.bf16 %v1257_v31  ;;  %v5228_v24 = vld [vmem:[%s6421_s3 + $0x64] ss:$12 sps:$4 sm:$0xff]   ;;  %v5285_v31 = vld [vmem:[%s6421_s3 + $0x1c] ss:$12 sps:$4 sm:$0xff]  }
 0x365   :  { %3905 = vtanh.f32 %v1145_v25  ;;  %6669 = vst [vmem:[#allocation10_spill] sm:$0xff] %v5228_v24  ;;  %6678 = vst [vmem:[#allocation19_spill] sm:$0xff] %v5285_v31 }
 0x366   :  { %3907 = vpow2.f32 %v3036_v0 }
 0x370   :  { %v3904_v8 = vpop.eup %3903 }
 0x371   :  { %v1242_v34 = vadd.f32 1.0, %v3904_v8  ;;  %v5235_v8 = vld [vmem:[%s6421_s3 + $0x60] ss:$12 sps:$4 sm:$0xff]  }
 0x372   :  { %v3906_v11 = vpop.eup %3905  ;;  %6670 = vst [vmem:[#allocation11_spill] sm:$0xff] %v5235_v8 }
 0x373   :  { %3909 = vrcp.f32 %v1242_v34  ;;  %v1148_v21 = vmul.f32 %v3906_v11, %v1147_v16  ;;  %v3908_v25 = vpop.eup %3907  ;;  %v5241_v34 = vld [vmem:[%s6421_s3 + $0x68] ss:$12 sps:$4 sm:$0xff]   ;;  %v5247_v16 = vld [vmem:[%s6421_s3 + $0x4c] ss:$12 sps:$4 sm:$0xff]  }
 0x374   :  { %v1253_v19 = vadd.f32 1.0, %v3908_v25  ;;  %6671 = vst [vmem:[#allocation12_spill] sm:$0xff] %v5241_v34  ;;  %6672 = vst [vmem:[#allocation13_spill] sm:$0xff] %v5247_v16  ;;  %v5254_v11 = vld [vmem:[%s6421_s3 + $0x48] ss:$12 sps:$4 sm:$0xff]  }
 0x375   :  { %v5003_v37 = vadd.f32 %v1149_v6, %v1148_v21  ;;  %6673 = vst [vmem:[#allocation14_spill] sm:$0xff] %v5254_v11  ;;  %v5260_v21 = vld [vmem:[%s6421_s3 + $0x50] ss:$12 sps:$4 sm:$0xff]   ;;  %v5266_v6 = vld [vmem:[%s6421_s3 + $0x34] ss:$12 sps:$4 sm:$0xff]  }
 0x376   :  { %3911 = vrcp.f32 %v1253_v19  ;;  %6674 = vst [vmem:[#allocation15_spill] sm:$0xff] %v5260_v21  ;;  %6675 = vst [vmem:[#allocation16_spill] sm:$0xff] %v5266_v6  ;;  %v5279_v25 = vld [vmem:[%s6421_s3 + $0x38] ss:$12 sps:$4 sm:$0xff]  }
 0x377   :  { %v1151_v7 = vpack.c.bf16 %v5003_v37, %v5003_v37  ;;  %6677 = vst [vmem:[#allocation18_spill] sm:$0xff] %v5279_v25  ;;  %v5292_v19 = vld [vmem:[%s6421_s3 + $0x18] ss:$12 sps:$4 sm:$0xff]  }
 0x378   :  { %6679 = vst [vmem:[#allocation20_spill] sm:$0xff] %v5292_v19 }
 0x379   :  { %3033 = vst [vmem:[%s6427_s7 + $0x1] sm:$0x1] %v1151_v7 }
 0x380   :  { %v3910_v18 = vpop.eup %3909 }
 0x381   :  { %v1256_v15 = vmul.f32 %v3910_v18, %v1232_v17  ;;  %v5298_v17 = vld [vmem:[%s6421_s3 + $0x20] ss:$12 sps:$4 sm:$0xff]  }
 0x382   :  { %6680 = vst [vmem:[#allocation21_spill] sm:$0xff] %v5298_v17  ;;  %v5311_v18 = vld [vmem:[%s6421_s3] ss:$12 sps:$4 sm:$0xff]  }
 0x383   :  { %v1260_v20 = vadd.f32 %v1259_v13, %v1256_v15  ;;  %v3912_v40 = vpop.eup %3911  ;;  %v5304_v13 = vld [vmem:[%s6421_s3 + $0x4] ss:$12 sps:$4 sm:$0xff]   ;;  %6682 = vst [vmem:[#allocation23_spill] sm:$0xff] %v5311_v18  ;;  %v5317_v15 = vld [vmem:[%s6421_s3 + $0x8] ss:$12 sps:$4 sm:$0xff]  }
 0x384   :  { %v1262_v22 = vsub.f32 1.0, %v3912_v40  ;;  %v1264_v39 = vmul.f32 %v3912_v40, %v4831_v35  ;;  %v5166_v35 = vld [vmem:[%s6421_s3 + $0xac] ss:$12 sps:$4 sm:$0xff]   ;;  %6681 = vst [vmem:[#allocation22_spill] sm:$0xff] %v5304_v13  ;;  %6683 = vst [vmem:[#allocation24_spill] sm:$0xff] %v5317_v15 }
 0x385   :  { %3913 = vtanh.f32 %v1260_v20  ;;  %6660 = vst [vmem:[#allocation35_spill] sm:$0xff] %v5166_v35  ;;  %v5323_v20 = vld [vmem:[%s6422_s5 + $0xac] ss:$12 sps:$4 sm:$0xff]  }
 0x386   :  { %6684 = vst [vmem:[#allocation25_spill] sm:$0xff] %v5323_v20 }
 0x392   :  { %v3914_v14 = vpop.eup %3913 }
 0x393   :  { %v1263_v26 = vmul.f32 %v3914_v14, %v1262_v22 }
 0x395   :  { %v5012_v0 = vadd.f32 %v1264_v39, %v1263_v26 }
 0x397   :  { %v5016_v23 = vpack.c.bf16 %v5012_v0, %v5012_v0 }
 0x399   :  { %1300 = vmatmul.mubr.bf16.vlgmr.msra.gmra.mxu0 %v5016_v23  ;;  %3443 = vmatmul.mubr.bf16.vlgmr.msra.gmra.mxu1 %v5016_v23 }
 0x39a   :  { %1349 = vmatpush1.bf16.msra.mxu0 %v4560_v54  ;;  %3447 = vmatpush3.bf16.msra.mxu1 %v4565_v47  ;;  %v5059_v54 = vld [vmem:[%s6420_s1 + $0xb0] ss:$12 sps:$4 sm:$0xff]   ;;  %v5071_v47 = vld [vmem:[%s6420_s1 + $0x98] ss:$12 sps:$4 sm:$0xff]  }
 0x39b   :  { %1350 = vmatprep.subr.bf16.mxu0 %v4574_v63  ;;  %3448 = vmatprep.subr.bf16.mxu1 %v6593_v58  ;;  %v5080_v63 = vld [vmem:[%s6420_s1 + $0x80] ss:$12 sps:$4 sm:$0xff]  }
 0x39c   :  { %1380 = vmatprep.mubr.bf16.mxu0 %v6594_v62  ;;  %3462 = vmatprep.mubr.msk.bf16.mxu1 %vm4171_vm0, %v6593_v58 }
 0x39e   :  { %1351 = vmatpush1.bf16.msra.mxu0 %v4583_v51  ;;  %3449 = vmatpush3.bf16.msra.mxu1 %v4588_v59  ;;  %v5089_v51 = vld [vmem:[%s6420_s1 + $0x68] ss:$12 sps:$4 sm:$0xff]  }
 0x39f   :  { %1352 = vmatprep.subr.bf16.mxu0 %v4595_v60  ;;  %3450 = vmatprep.subr.bf16.mxu1 %v6593_v58  ;;  %v6653_v59 = vld [vmem:[#allocation27_spill] sm:$0xff] }
 0x3a0   :  { %v5097_v60 = vld [vmem:[%s6420_s1 + $0x48] ss:$12 sps:$4 sm:$0xff]  }
 0x3a2   :  { %1353 = vmatpush1.bf16.msra.mxu0 %v4605_v1  ;;  %3451 = vmatpush3.bf16.msra.mxu1 %v4610_v48  ;;  %v5103_v1 = vld [vmem:[%s6420_s1 + $0x50] ss:$12 sps:$4 sm:$0xff]   ;;  %v5109_v48 = vld [vmem:[%s6420_s1 + $0x34] ss:$12 sps:$4 sm:$0xff]  }
 0x3a3   :  { %1354 = vmatprep.subr.bf16.mxu0 %v4617_v49  ;;  %3452 = vmatprep.subr.bf16.mxu1 %v6593_v58  ;;  %v5116_v49 = vld [vmem:[%s6420_s1 + $0x30] ss:$12 sps:$4 sm:$0xff]  }
 0x3a6   :  { %1355 = vmatpush1.bf16.msra.mxu0 %v4624_v46  ;;  %3453 = vmatpush3.bf16.msra.mxu1 %v4629_v44  ;;  %v5122_v46 = vld [vmem:[%s6420_s1 + $0x38] ss:$12 sps:$4 sm:$0xff]   ;;  %v5128_v44 = vld [vmem:[%s6420_s1 + $0x1c] ss:$12 sps:$4 sm:$0xff]  }
 0x3a7   :  { %1356 = vmatprep.subr.bf16.mxu0 %v6617_v56  ;;  %3454 = vmatprep.subr.bf16.mxu1 %v6593_v58  ;;  %6654 = vst [vmem:[#allocation29_spill] sm:$0xff] %v5128_v44  ;;  %v5175_v56 = vld [vmem:[%s6421_s3 + $0xa8] ss:$12 sps:$4 sm:$0xff]  }
 0x3a8   :  { %6661 = vst [vmem:[#allocation2_spill] sm:$0xff] %v5175_v56 }
 0x3aa   :  { %1357 = vmatpush1.bf16.msra.mxu0 %v6618_v32  ;;  %3455 = vmatpush3.bf16.msra.mxu1 %v6619_v29  ;;  %v5181_v32 = vld [vmem:[%s6421_s3 + $0xb0] ss:$12 sps:$4 sm:$0xff]   ;;  %v5187_v29 = vld [vmem:[%s6421_s3 + $0x94] ss:$12 sps:$4 sm:$0xff]  }
 0x3ab   :  { %1358 = vmatprep.subr.bf16.mxu0 %v6620_v41  ;;  %3456 = vmatprep.subr.bf16.mxu1 %v6593_v58  ;;  %6662 = vst [vmem:[#allocation3_spill] sm:$0xff] %v5181_v32  ;;  %6663 = vst [vmem:[#allocation4_spill] sm:$0xff] %v5187_v29  ;;  %v5197_v41 = vld [vmem:[%s6421_s3 + $0x90] ss:$12 sps:$4 sm:$0xff]  }
 0x3ac   :  { %6664 = vst [vmem:[#allocation5_spill] sm:$0xff] %v5197_v41 }
 0x3ae   :  { %1359 = vmatpush1.bf16.msra.mxu0 %v6621_v55  ;;  %3457 = vmatpush3.bf16.msra.mxu1 %v6622_v38  ;;  %v5203_v55 = vld [vmem:[%s6421_s3 + $0x98] ss:$12 sps:$4 sm:$0xff]   ;;  %v5209_v38 = vld [vmem:[%s6421_s3 + $0x7c] ss:$12 sps:$4 sm:$0xff]  }
 0x3af   :  { %1360 = vmatprep.subr.bf16.mxu0 %v6623_v36  ;;  %3458 = vmatprep.subr.bf16.mxu1 %v6593_v58  ;;  %6665 = vst [vmem:[#allocation6_spill] sm:$0xff] %v5203_v55  ;;  %6666 = vst [vmem:[#allocation7_spill] sm:$0xff] %v5209_v38  ;;  %v5216_v36 = vld [vmem:[%s6421_s3 + $0x78] ss:$12 sps:$4 sm:$0xff]  }
 0x3b0   :  { %6667 = vst [vmem:[#allocation8_spill] sm:$0xff] %v5216_v36 }
 0x3b2   :  { %1361 = vmatpush1.bf16.msra.mxu0 %v4681_v50  ;;  %3459 = vmatpush3.bf16.msra.mxu1 %v4686_v53  ;;  %v5147_v50 = vld [vmem:[%s6420_s1 + $0x4] ss:$12 sps:$4 sm:$0xff]   ;;  %v5154_v53 = vld [vmem:[%s6420_s1] ss:$12 sps:$4 sm:$0xff]  }
 0x3b3   :  { %1362 = vmatprep.subr.bf16.mxu0 %v4693_v52  ;;  %3460 = vmatprep.subr.bf16.mxu1 %v6593_v58  ;;  %6657 = vst [vmem:[#allocation32_spill] sm:$0xff] %v5147_v50  ;;  %6658 = vst [vmem:[#allocation33_spill] sm:$0xff] %v5154_v53  ;;  %v5160_v52 = vld [vmem:[%s6420_s1 + $0x8] ss:$12 sps:$4 sm:$0xff]  }
 0x3b4   :  { %6659 = vst [vmem:[#allocation34_spill] sm:$0xff] %v5160_v52 }
 0x3b6   :  { %1363 = vmatpush1.bf16.msra.mxu0 %v4700_v43  ;;  %3461 = vmatpush3.bf16.msra.mxu1 %v4705_v45  ;;  %v5135_v43 = vld [vmem:[%s6420_s1 + $0x18] ss:$12 sps:$4 sm:$0xff]   ;;  %v5141_v45 = vld [vmem:[%s6420_s1 + $0x20] ss:$12 sps:$4 sm:$0xff]  }
 0x3b7   :  { %1455 = vmatprep.subr.bf16.mxu0 %v4875_v3  ;;  %3466 = vmatprep.subr.bf16.mxu1 %v6593_v58  ;;  %6655 = vst [vmem:[#allocation30_spill] sm:$0xff] %v5135_v43  ;;  %6656 = vst [vmem:[#allocation31_spill] sm:$0xff] %v5141_v45 }
 0x3b9   :  { %1381 = vmatmul.mubr.bf16.vlgmr.msra.gmra.mxu0 %v1151_v7  ;;  %3463 = vmatmul.mubr.bf16.vlgmr.msra.gmra.mxu1 %v1151_v7  ;;  %v5273_v7 = vld [vmem:[%s6421_s3 + $0x30] ss:$12 sps:$4 sm:$0xff]  }
 0x3ba   :  { %1456 = vmatpush1.bf16.msra.mxu0 %v4882_v27  ;;  %3467 = vmatpush3.bf16.msra.mxu1 %v5059_v54  ;;  %6676 = vst [vmem:[#allocation17_spill] sm:$0xff] %v5273_v7 }
 0x3bb   :  { %1457 = vmatprep.subr.bf16.mxu0 %v4889_v5  ;;  %3468 = vmatprep.subr.bf16.mxu1 %v6593_v58 }
 0x3bc   :  { %1487 = vmatprep.mubr.bf16.mxu0 %v6594_v62  ;;  %3482 = vmatprep.mubr.msk.bf16.mxu1 %vm4171_vm0, %v6593_v58 }
 0x3be   :  { %1458 = vmatpush1.bf16.msra.mxu0 %v4899_v28  ;;  %3469 = vmatpush3.bf16.msra.mxu1 %v5071_v47 }
 0x3bf   :  { %1459 = vmatprep.subr.bf16.mxu0 %v4906_v10  ;;  %3470 = vmatprep.subr.bf16.mxu1 %v6593_v58 }
 0x3c2   :  { %1460 = vmatpush1.bf16.msra.mxu0 %v4913_v42  ;;  %3471 = vmatpush3.bf16.msra.mxu1 %v5080_v63 }
 0x3c3   :  { %1461 = vmatprep.subr.bf16.mxu0 %v4920_v12  ;;  %3472 = vmatprep.subr.bf16.mxu1 %v6593_v58 }
 0x3c6   :  { %1462 = vmatpush1.bf16.msra.mxu0 %v4927_v4  ;;  %3473 = vmatpush3.bf16.msra.mxu1 %v5089_v51 }
 0x3c7   :  { %1463 = vmatprep.subr.bf16.mxu0 %v6653_v59  ;;  %3474 = vmatprep.subr.bf16.mxu1 %v6593_v58 }
 0x3ca   :  { %1464 = vmatpush1.bf16.msra.mxu0 %v5097_v60  ;;  %3475 = vmatpush3.bf16.msra.mxu1 %v5103_v1 }
 0x3cb   :  { %1465 = vmatprep.subr.bf16.mxu0 %v5109_v48  ;;  %3476 = vmatprep.subr.bf16.mxu1 %v6593_v58 }
 0x3ce   :  { %1466 = vmatpush1.bf16.msra.mxu0 %v5116_v49  ;;  %3477 = vmatpush3.bf16.msra.mxu1 %v5122_v46 }
 0x3cf   :  { %1467 = vmatprep.subr.bf16.mxu0 %v5128_v44  ;;  %3478 = vmatprep.subr.bf16.mxu1 %v6593_v58 }
 0x3d2   :  { %1468 = vmatpush1.bf16.msra.mxu0 %v5135_v43  ;;  %3479 = vmatpush3.bf16.msra.mxu1 %v5141_v45 }
 0x3d3   :  { %1469 = vmatprep.subr.bf16.mxu0 %v5147_v50  ;;  %3480 = vmatprep.subr.bf16.mxu1 %v6593_v58 }
 0x3d6   :  { %1470 = vmatpush1.bf16.msra.mxu0 %v5154_v53  ;;  %3481 = vmatpush3.bf16.msra.mxu1 %v5160_v52 }
 0x3d7   :  { %1566 = vmatprep.subr.bf16.mxu0 %v5166_v35  ;;  %3486 = vmatprep.subr.bf16.mxu1 %v6593_v58 }
 0x3d9   :  { %1488 = vmatmul.mubr.bf16.vlgmr.msra.gmra.mxu0 %v5016_v23  ;;  %3483 = vmatmul.mubr.bf16.vlgmr.msra.gmra.mxu1 %v5016_v23 }
 0x3da   :  { %1567 = vmatpush1.bf16.msra.mxu0 %v5175_v56  ;;  %3487 = vmatpush3.bf16.msra.mxu1 %v5181_v32 }
 0x3db   :  { %1568 = vmatprep.subr.bf16.mxu0 %v5187_v29  ;;  %3488 = vmatprep.subr.bf16.mxu1 %v6593_v58 }
 0x3dc   :  { %1598 = vmatprep.mubr.bf16.mxu0 %v6594_v62  ;;  %3502 = vmatprep.mubr.msk.bf16.mxu1 %vm4171_vm0, %v6593_v58 }
 0x3de   :  { %1569 = vmatpush1.bf16.msra.mxu0 %v5197_v41  ;;  %3489 = vmatpush3.bf16.msra.mxu1 %v5203_v55 }
 0x3df   :  { %1570 = vmatprep.subr.bf16.mxu0 %v5209_v38  ;;  %3490 = vmatprep.subr.bf16.mxu1 %v6593_v58 }
 0x3e2   :  { %1571 = vmatpush1.bf16.msra.mxu0 %v5216_v36  ;;  %3491 = vmatpush3.bf16.msra.mxu1 %v5222_v57 }
 0x3e3   :  { %1572 = vmatprep.subr.bf16.mxu0 %v5228_v24  ;;  %3492 = vmatprep.subr.bf16.mxu1 %v6593_v58 }
 0x3e6   :  { %1573 = vmatpush1.bf16.msra.mxu0 %v5235_v8  ;;  %3493 = vmatpush3.bf16.msra.mxu1 %v5241_v34  ;;  %v6687_v8 = vld [vmem:[#allocation28_spill] sm:$0xff] }
 0x3e7   :  { %1574 = vmatprep.subr.bf16.mxu0 %v5247_v16  ;;  %3494 = vmatprep.subr.bf16.mxu1 %v6593_v58 }
 0x3ea   :  { %1575 = vmatpush1.bf16.msra.mxu0 %v5254_v11  ;;  %3495 = vmatpush3.bf16.msra.mxu1 %v5260_v21 }
 0x3eb   :  { %1576 = vmatprep.subr.bf16.mxu0 %v5266_v6  ;;  %3496 = vmatprep.subr.bf16.mxu1 %v6593_v58 }
 0x3ee   :  { %1577 = vmatpush1.bf16.msra.mxu0 %v5273_v7  ;;  %3497 = vmatpush3.bf16.msra.mxu1 %v5279_v25  ;;  %v6686_v25 = vld [vmem:[#allocation36_spill] sm:$0xff] }
 0x3ef   :  { %1578 = vmatprep.subr.bf16.mxu0 %v5285_v31  ;;  %3498 = vmatprep.subr.bf16.mxu1 %v6593_v58 }
 0x3f2   :  { %1579 = vmatpush1.bf16.msra.mxu0 %v5292_v19  ;;  %3499 = vmatpush3.bf16.msra.mxu1 %v5298_v17 }
 0x3f3   :  { %1580 = vmatprep.subr.bf16.mxu0 %v5304_v13  ;;  %3500 = vmatprep.subr.bf16.mxu1 %v6593_v58 }
 0x3f6   :  { %1581 = vmatpush1.bf16.msra.mxu0 %v5311_v18  ;;  %3501 = vmatpush3.bf16.msra.mxu1 %v5317_v15  ;;  %v6685_v15 = vld [vmem:[#allocation26_spill] sm:$0xff] }
 0x3f7   :  { %1647 = vmatprep.subr.bf16.mxu0 %v5323_v20  ;;  %3506 = vmatprep.subr.bf16.mxu1 %v6593_v58 }
 0x459   :  { %v1301_v40 = vpop.f32.mrf.mxu0  ;;  %v1342_v22 = vpop.f32.mrf.mxu1 }
 0x45a   :  { %v1302_v31 = vadd.f32 %v1301_v40, %v6685_v15 }
 0x45b   :  { %v1303_v14 = vpop.f32.mrf.mxu0  ;;  %v3444_v26 = vpop.f32.mrf.mxu1 }
 0x45d   :  { %v1305_v39 = vpop.f32.mrf.mxu0  ;;  %v1345_v23 = vpop.f32.mrf.mxu1 }
 0x45e   :  { %v6688_v39 = vld [vmem:[#allocation37_spill] sm:$0xff] }
 0x45f   :  { %v1306_v18 = vpop.f32.mrf.mxu0  ;;  %v3445_v13 = vpop.f32.mrf.mxu1  ;;  %v1304_v23 = vadd.f32 %v1303_v14, %v6688_v39 }
 0x479   :  { %v1382_v17 = vpop.f32.mrf.mxu0  ;;  %v1423_v19 = vpop.f32.mrf.mxu1 }
 0x47a   :  { %v1383_v7 = vadd.f32 %v1382_v17, %v6686_v25 }
 0x47b   :  { %v1384_v6 = vpop.f32.mrf.mxu0  ;;  %v3464_v21 = vpop.f32.mrf.mxu1 }
 0x47c   :  { %v1429_v11 = vadd.f32 %v1383_v7, %v1302_v31  ;;  %v1385_v24 = vadd.f32 %v1384_v6, %v6687_v8  ;;  %v3040_v21 = vld [vmem:[%s6424_s0 + $0x9] sm:$0x7] }
 0x47d   :  { %v1386_v20 = vpop.f32.mrf.mxu0  ;;  %v1426_v16 = vpop.f32.mrf.mxu1  ;;  %v1545_v6 = vrot.slane %v3040_v21, 1 }
 0x47e   :  { %v3037_v34 = vmul.f32 -1.442695, %v1429_v11  ;;  %v1436_v13 = vadd.f32 %v1385_v24, %v1304_v23  ;;  %v1536_v16 = vunpack.c.l.bf16 %v3040_v21  ;;  %v1424_v24 = vadd.f32 %v1423_v19, %v4813_v33 }
 0x47f   :  { %v1387_v57 = vpop.f32.mrf.mxu0  ;;  %v3465_v26 = vpop.f32.mrf.mxu1  ;;  %v1547_v23 = vunpack.c.l.bf16 %v1545_v6 }
 0x480   :  { %3915 = vpow2.f32 %v3037_v34  ;;  %v3038_v18 = vmul.f32 -1.442695, %v1436_v13 }
 0x482   :  { %3917 = vpow2.f32 %v3038_v18 }
 0x48d   :  { %v3916_v36 = vpop.eup %3915 }
 0x48e   :  { %v1433_v40 = vadd.f32 1.0, %v3916_v36  ;;  %v1343_v36 = vadd.f32 %v1342_v22, %v4816_v30 }
 0x48f   :  { %v3918_v7 = vpop.eup %3917 }
 0x490   :  { %3919 = vrcp.f32 %v1433_v40  ;;  %v1440_v57 = vadd.f32 1.0, %v3918_v7 }
 0x492   :  { %3921 = vrcp.f32 %v1440_v57 }
 0x499   :  { %v1489_v11 = vpop.f32.mrf.mxu0  ;;  %v1530_v31 = vpop.f32.mrf.mxu1 }
 0x49a   :  { %v1490_v17 = vadd.f32 %v1489_v11, %v6616_v9 }
 0x49b   :  { %v1491_v20 = vpop.f32.mrf.mxu0  ;;  %v3484_v34 = vpop.f32.mrf.mxu1 }
 0x49c   :  { %v1537_v14 = vadd.f32 %v1536_v16, %v1490_v17  ;;  %v1492_v8 = vadd.f32 %v1491_v20, %v4546_v61  ;;  %v1531_v20 = vadd.f32 %v1530_v31, %v4552_v2  ;;  %v5362_v31 = vld [vmem:[%s6422_s5 + $0xa8] ss:$12 sps:$4 sm:$0xff]  }
 0x49d   :  { %v3920_v26 = vpop.eup %3919  ;;  %v1493_v13 = vpop.f32.mrf.mxu0 }
 0x49e   :  { %v1533_v18 = vpop.f32.mrf.mxu1  ;;  %v1443_v40 = vmul.f32 %v3920_v26, %v1424_v24  ;;  %v3041_v39 = vmul.f32 -1.442695, %v1537_v14  ;;  %v1548_v11 = vadd.f32 %v1547_v23, %v1492_v8 }
 0x49f   :  { %v1494_v25 = vpop.f32.mrf.mxu0  ;;  %v3922_v19 = vpop.eup %3921 }
 0x4a0   :  { %v3485_v7 = vpop.f32.mrf.mxu1  ;;  %v1444_v15 = vadd.f32 %v1443_v40, %v1343_v36  ;;  %3923 = vpow2.f32 %v3041_v39  ;;  %v3042_v34 = vmul.f32 -1.442695, %v1548_v11  ;;  %v1446_v22 = vsub.f32 1.0, %v3922_v19 }
 0x4a1   :  { %v1448_v57 = vmul.f32 %v3922_v19, %v5003_v37  ;;  %v5374_v19 = vld [vmem:[%s6422_s5 + $0x94] ss:$12 sps:$4 sm:$0xff]  }
 0x4a2   :  { %3925 = vtanh.f32 %v1444_v15  ;;  %v1556_v15 = vrot.slane %v3040_v21, 2 }
 0x4a3   :  { %3927 = vpow2.f32 %v3042_v34 }
 0x4a4   :  { %v1558_v14 = vunpack.c.l.bf16 %v1556_v15  ;;  %v5428_v15 = vld [vmem:[%s6422_s5 + $0x68] ss:$12 sps:$4 sm:$0xff]  }
 0x4ad   :  { %v3924_v16 = vpop.eup %3923 }
 0x4ae   :  { %v1541_v17 = vadd.f32 1.0, %v3924_v16  ;;  %v5384_v16 = vld [vmem:[%s6422_s5 + $0x90] ss:$12 sps:$4 sm:$0xff]  }
 0x4af   :  { %v3926_v6 = vpop.eup %3925 }
 0x4b0   :  { %3929 = vrcp.f32 %v1541_v17  ;;  %v1447_v13 = vmul.f32 %v3926_v6, %v1446_v22  ;;  %v3928_v8 = vpop.eup %3927  ;;  %v5390_v17 = vld [vmem:[%s6422_s5 + $0x98] ss:$12 sps:$4 sm:$0xff]   ;;  %v5396_v22 = vld [vmem:[%s6422_s5 + $0x7c] ss:$12 sps:$4 sm:$0xff]  }
 0x4b1   :  { %v1552_v39 = vadd.f32 1.0, %v3928_v8  ;;  %v5403_v6 = vld [vmem:[%s6422_s5 + $0x78] ss:$12 sps:$4 sm:$0xff]   ;;  %v5422_v8 = vld [vmem:[%s6422_s5 + $0x60] ss:$12 sps:$4 sm:$0xff]  }
 0x4b2   :  { %v5339_v24 = vadd.f32 %v1448_v57, %v1447_v13  ;;  %v5409_v13 = vld [vmem:[%s6422_s5 + $0x80] ss:$12 sps:$4 sm:$0xff]   ;;  %v5415_v57 = vld [vmem:[%s6422_s5 + $0x64] ss:$12 sps:$4 sm:$0xff]  }
 0x4b3   :  { %3931 = vrcp.f32 %v1552_v39  ;;  %v5434_v39 = vld [vmem:[%s6422_s5 + $0x4c] ss:$12 sps:$4 sm:$0xff]  }
 0x4b4   :  { %v5343_v25 = vpack.c.bf16 %v5339_v24, %v5339_v24 }
 0x4b6   :  { %3039 = vst [vmem:[%s6427_s7 + $0x2] sm:$0x1] %v5343_v25 }
 0x4bd   :  { %v3930_v26 = vpop.eup %3929 }
 0x4be   :  { %v1555_v36 = vmul.f32 %v3930_v26, %v1531_v20  ;;  %v5441_v20 = vld [vmem:[%s6422_s5 + $0x48] ss:$12 sps:$4 sm:$0xff]  }
 0x4bf   :  { %v5453_v26 = vld [vmem:[%s6422_s5 + $0x34] ss:$12 sps:$4 sm:$0xff]  }
 0x4c0   :  { %v1559_v37 = vadd.f32 %v1558_v14, %v1555_v36  ;;  %v3932_v23 = vpop.eup %3931  ;;  %v5447_v14 = vld [vmem:[%s6422_s5 + $0x50] ss:$12 sps:$4 sm:$0xff]  }
 0x4c1   :  { %v1561_v18 = vsub.f32 1.0, %v3932_v23  ;;  %v1563_v11 = vmul.f32 %v3932_v23, %v5012_v0  ;;  %v5368_v0 = vld [vmem:[%s6422_s5 + $0xb0] ss:$12 sps:$4 sm:$0xff]  }
 0x4c2   :  { %3933 = vtanh.f32 %v1559_v37  ;;  %v5460_v36 = vld [vmem:[%s6422_s5 + $0x30] ss:$12 sps:$4 sm:$0xff]   ;;  %v5466_v37 = vld [vmem:[%s6422_s5 + $0x38] ss:$12 sps:$4 sm:$0xff]  }
 0x4c3   :  { %v5472_v23 = vld [vmem:[%s6422_s5 + $0x1c] ss:$12 sps:$4 sm:$0xff]  }
 0x4cf   :  { %v3934_v40 = vpop.eup %3933 }
 0x4d0   :  { %v1562_v7 = vmul.f32 %v3934_v40, %v1561_v18  ;;  %v5479_v18 = vld [vmem:[%s6422_s5 + $0x18] ss:$12 sps:$4 sm:$0xff]   ;;  %v5485_v40 = vld [vmem:[%s6422_s5 + $0x20] ss:$12 sps:$4 sm:$0xff]  }
 0x4d1   :  { %6689 = vst [vmem:[#allocation27_spill] sm:$0xff] %v5485_v40 }
 0x4d2   :  { %v5351_v34 = vadd.f32 %v1563_v11, %v1562_v7  ;;  %v5491_v7 = vld [vmem:[%s6422_s5 + $0x4] ss:$12 sps:$4 sm:$0xff]   ;;  %v5498_v11 = vld [vmem:[%s6422_s5] ss:$12 sps:$4 sm:$0xff]  }
 0x4d4   :  { %v5355_v21 = vpack.c.bf16 %v5351_v34, %v5351_v34 }
 0x4d6   :  { %1599 = vmatmul.mubr.bf16.vlgmr.msra.gmra.mxu0 %v5355_v21  ;;  %3503 = vmatmul.mubr.bf16.vlgmr.msra.gmra.mxu1 %v5355_v21 }
 0x4d7   :  { %1648 = vmatpush1.bf16.msra.mxu0 %v5362_v31  ;;  %3507 = vmatpush3.bf16.msra.mxu1 %v5368_v0 }
 0x4d8   :  { %1649 = vmatprep.subr.bf16.mxu0 %v5374_v19  ;;  %3508 = vmatprep.subr.bf16.mxu1 %v6593_v58 }
 0x4d9   :  { %1679 = vmatprep.mubr.bf16.mxu0 %v6594_v62  ;;  %3522 = vmatprep.mubr.msk.bf16.mxu1 %vm4171_vm0, %v6593_v58 }
 0x4db   :  { %1650 = vmatpush1.bf16.msra.mxu0 %v5384_v16  ;;  %3509 = vmatpush3.bf16.msra.mxu1 %v5390_v17 }
 0x4dc   :  { %1651 = vmatprep.subr.bf16.mxu0 %v5396_v22  ;;  %3510 = vmatprep.subr.bf16.mxu1 %v6593_v58 }
 0x4df   :  { %1652 = vmatpush1.bf16.msra.mxu0 %v5403_v6  ;;  %3511 = vmatpush3.bf16.msra.mxu1 %v5409_v13 }
 0x4e0   :  { %1653 = vmatprep.subr.bf16.mxu0 %v5415_v57  ;;  %3512 = vmatprep.subr.bf16.mxu1 %v6593_v58 }
 0x4e3   :  { %1654 = vmatpush1.bf16.msra.mxu0 %v5422_v8  ;;  %3513 = vmatpush3.bf16.msra.mxu1 %v5428_v15 }
 0x4e4   :  { %1655 = vmatprep.subr.bf16.mxu0 %v5434_v39  ;;  %3514 = vmatprep.subr.bf16.mxu1 %v6593_v58 }
 0x4e7   :  { %1656 = vmatpush1.bf16.msra.mxu0 %v5441_v20  ;;  %3515 = vmatpush3.bf16.msra.mxu1 %v5447_v14 }
 0x4e8   :  { %1657 = vmatprep.subr.bf16.mxu0 %v5453_v26  ;;  %3516 = vmatprep.subr.bf16.mxu1 %v6593_v58 }
 0x4eb   :  { %1658 = vmatpush1.bf16.msra.mxu0 %v5460_v36  ;;  %3517 = vmatpush3.bf16.msra.mxu1 %v5466_v37 }
 0x4ec   :  { %1659 = vmatprep.subr.bf16.mxu0 %v5472_v23  ;;  %3518 = vmatprep.subr.bf16.mxu1 %v6593_v58 }
 0x4ef   :  { %1660 = vmatpush1.bf16.msra.mxu0 %v5479_v18  ;;  %3519 = vmatpush3.bf16.msra.mxu1 %v5485_v40  ;;  %v5504_v40 = vld [vmem:[%s6422_s5 + $0x8] ss:$12 sps:$4 sm:$0xff]  }
 0x4f0   :  { %1661 = vmatprep.subr.bf16.mxu0 %v5491_v7  ;;  %3520 = vmatprep.subr.bf16.mxu1 %v6593_v58 }
 0x4f3   :  { %1662 = vmatpush1.bf16.msra.mxu0 %v5498_v11  ;;  %3521 = vmatpush3.bf16.msra.mxu1 %v5504_v40 }
 0x4f4   :  { %1754 = vmatprep.subr.bf16.mxu0 %v4875_v3  ;;  %3526 = vmatprep.subr.bf16.mxu1 %v6593_v58  ;;  %v6690_v3 = vld [vmem:[#allocation8_spill] sm:$0xff] }
 0x4f6   :  { %1680 = vmatmul.mubr.bf16.vlgmr.msra.gmra.mxu0 %v5343_v25  ;;  %3523 = vmatmul.mubr.bf16.vlgmr.msra.gmra.mxu1 %v5343_v25  ;;  %v6699_v25 = vld [vmem:[#allocation17_spill] sm:$0xff] }
 0x4f7   :  { %1755 = vmatpush1.bf16.msra.mxu0 %v4882_v27  ;;  %3527 = vmatpush3.bf16.msra.mxu1 %v5059_v54  ;;  %v6691_v27 = vld [vmem:[#allocation9_spill] sm:$0xff] }
 0x4f8   :  { %1756 = vmatprep.subr.bf16.mxu0 %v4889_v5  ;;  %3528 = vmatprep.subr.bf16.mxu1 %v6593_v58  ;;  %v6692_v5 = vld [vmem:[#allocation10_spill] sm:$0xff] }
 0x4f9   :  { %1786 = vmatprep.mubr.bf16.mxu0 %v6594_v62  ;;  %3542 = vmatprep.mubr.msk.bf16.mxu1 %vm4171_vm0, %v6593_v58 }
 0x4fb   :  { %1757 = vmatpush1.bf16.msra.mxu0 %v4899_v28  ;;  %3529 = vmatpush3.bf16.msra.mxu1 %v5071_v47  ;;  %v6693_v28 = vld [vmem:[#allocation11_spill] sm:$0xff] }
 0x4fc   :  { %1758 = vmatprep.subr.bf16.mxu0 %v4906_v10  ;;  %3530 = vmatprep.subr.bf16.mxu1 %v6593_v58  ;;  %v6694_v10 = vld [vmem:[#allocation12_spill] sm:$0xff] }
 0x4ff   :  { %1759 = vmatpush1.bf16.msra.mxu0 %v4913_v42  ;;  %3531 = vmatpush3.bf16.msra.mxu1 %v5080_v63  ;;  %v6695_v42 = vld [vmem:[#allocation13_spill] sm:$0xff] }
 0x500   :  { %1760 = vmatprep.subr.bf16.mxu0 %v4920_v12  ;;  %3532 = vmatprep.subr.bf16.mxu1 %v6593_v58  ;;  %v6696_v12 = vld [vmem:[#allocation14_spill] sm:$0xff] }
 0x503   :  { %1761 = vmatpush1.bf16.msra.mxu0 %v4927_v4  ;;  %3533 = vmatpush3.bf16.msra.mxu1 %v5089_v51  ;;  %v6697_v4 = vld [vmem:[#allocation15_spill] sm:$0xff] }
 0x504   :  { %1762 = vmatprep.subr.bf16.mxu0 %v6653_v59  ;;  %3534 = vmatprep.subr.bf16.mxu1 %v6593_v58  ;;  %v6698_v59 = vld [vmem:[#allocation16_spill] sm:$0xff] }
 0x507   :  { %1763 = vmatpush1.bf16.msra.mxu0 %v5097_v60  ;;  %3535 = vmatpush3.bf16.msra.mxu1 %v5103_v1 }
 0x508   :  { %1764 = vmatprep.subr.bf16.mxu0 %v5109_v48  ;;  %3536 = vmatprep.subr.bf16.mxu1 %v6593_v58 }
 0x50b   :  { %1765 = vmatpush1.bf16.msra.mxu0 %v5116_v49  ;;  %3537 = vmatpush3.bf16.msra.mxu1 %v5122_v46 }
 0x50c   :  { %1766 = vmatprep.subr.bf16.mxu0 %v5128_v44  ;;  %3538 = vmatprep.subr.bf16.mxu1 %v6593_v58 }
 0x50f   :  { %1767 = vmatpush1.bf16.msra.mxu0 %v5135_v43  ;;  %3539 = vmatpush3.bf16.msra.mxu1 %v5141_v45 }
 0x510   :  { %1768 = vmatprep.subr.bf16.mxu0 %v5147_v50  ;;  %3540 = vmatprep.subr.bf16.mxu1 %v6593_v58  ;;  %v6710_v50 = vld [vmem:[#allocation28_spill] sm:$0xff] }
 0x513   :  { %1769 = vmatpush1.bf16.msra.mxu0 %v5154_v53  ;;  %3541 = vmatpush3.bf16.msra.mxu1 %v5160_v52 }
 0x514   :  { %1865 = vmatprep.subr.bf16.mxu0 %v5166_v35  ;;  %3546 = vmatprep.subr.bf16.mxu1 %v6593_v58 }
 0x516   :  { %1787 = vmatmul.mubr.bf16.vlgmr.msra.gmra.mxu0 %v5355_v21  ;;  %3543 = vmatmul.mubr.bf16.vlgmr.msra.gmra.mxu1 %v5355_v21  ;;  %v6700_v21 = vld [vmem:[#allocation18_spill] sm:$0xff] }
 0x517   :  { %1866 = vmatpush1.bf16.msra.mxu0 %v5175_v56  ;;  %3547 = vmatpush3.bf16.msra.mxu1 %v5181_v32  ;;  %v6709_v32 = vld [vmem:[#allocation36_spill] sm:$0xff] }
 0x518   :  { %1867 = vmatprep.subr.bf16.mxu0 %v5187_v29  ;;  %3548 = vmatprep.subr.bf16.mxu1 %v6593_v58 }
 0x519   :  { %1897 = vmatprep.mubr.bf16.mxu0 %v6594_v62  ;;  %3562 = vmatprep.mubr.msk.bf16.mxu1 %vm4171_vm0, %v6593_v58 }
 0x51b   :  { %1868 = vmatpush1.bf16.msra.mxu0 %v5197_v41  ;;  %3549 = vmatpush3.bf16.msra.mxu1 %v5203_v55  ;;  %v6708_v41 = vld [vmem:[#allocation26_spill] sm:$0xff] }
 0x51c   :  { %1869 = vmatprep.subr.bf16.mxu0 %v5209_v38  ;;  %3550 = vmatprep.subr.bf16.mxu1 %v6593_v58 }
 0x51f   :  { %1870 = vmatpush1.bf16.msra.mxu0 %v6690_v3  ;;  %3551 = vmatpush3.bf16.msra.mxu1 %v6691_v27 }
 0x520   :  { %1871 = vmatprep.subr.bf16.mxu0 %v6692_v5  ;;  %3552 = vmatprep.subr.bf16.mxu1 %v6593_v58  ;;  %v6701_v5 = vld [vmem:[#allocation19_spill] sm:$0xff] }
 0x523   :  { %1872 = vmatpush1.bf16.msra.mxu0 %v6693_v28  ;;  %3553 = vmatpush3.bf16.msra.mxu1 %v6694_v10  ;;  %v6702_v10 = vld [vmem:[#allocation20_spill] sm:$0xff]  ;;  %v6704_v28 = vld [vmem:[#allocation22_spill] sm:$0xff] }
 0x524   :  { %1873 = vmatprep.subr.bf16.mxu0 %v6695_v42  ;;  %3554 = vmatprep.subr.bf16.mxu1 %v6593_v58  ;;  %v6703_v42 = vld [vmem:[#allocation21_spill] sm:$0xff] }
 0x527   :  { %1874 = vmatpush1.bf16.msra.mxu0 %v6696_v12  ;;  %3555 = vmatpush3.bf16.msra.mxu1 %v6697_v4  ;;  %v6705_v4 = vld [vmem:[#allocation23_spill] sm:$0xff]  ;;  %v6707_v12 = vld [vmem:[#allocation25_spill] sm:$0xff] }
 0x528   :  { %1875 = vmatprep.subr.bf16.mxu0 %v6698_v59  ;;  %3556 = vmatprep.subr.bf16.mxu1 %v6593_v58  ;;  %v6706_v59 = vld [vmem:[#allocation24_spill] sm:$0xff] }
 0x52b   :  { %1876 = vmatpush1.bf16.msra.mxu0 %v6699_v25  ;;  %3557 = vmatpush3.bf16.msra.mxu1 %v6700_v21 }
 0x52c   :  { %1877 = vmatprep.subr.bf16.mxu0 %v6701_v5  ;;  %3558 = vmatprep.subr.bf16.mxu1 %v6593_v58 }
 0x52f   :  { %1878 = vmatpush1.bf16.msra.mxu0 %v6702_v10  ;;  %3559 = vmatpush3.bf16.msra.mxu1 %v6703_v42 }
 0x530   :  { %1879 = vmatprep.subr.bf16.mxu0 %v6704_v28  ;;  %3560 = vmatprep.subr.bf16.mxu1 %v6593_v58 }
 0x533   :  { %1880 = vmatpush1.bf16.msra.mxu0 %v6705_v4  ;;  %3561 = vmatpush3.bf16.msra.mxu1 %v6706_v59 }
 0x534   :  { %1946 = vmatprep.subr.bf16.mxu0 %v6707_v12  ;;  %3566 = vmatprep.subr.bf16.mxu1 %v6593_v58 }
 0x596   :  { %v1600_v21 = vpop.f32.mrf.mxu0  ;;  %v1641_v5 = vpop.f32.mrf.mxu1 }
 0x597   :  { %v1601_v29 = vadd.f32 %v1600_v21, %v6708_v41 }
 0x598   :  { %v1602_v25 = vpop.f32.mrf.mxu0  ;;  %v3504_v27 = vpop.f32.mrf.mxu1 }
 0x59a   :  { %v1604_v3 = vpop.f32.mrf.mxu0  ;;  %v1644_v10 = vpop.f32.mrf.mxu1 }
 0x59b   :  { %v6711_v3 = vld [vmem:[#allocation37_spill] sm:$0xff] }
 0x59c   :  { %v1605_v38 = vpop.f32.mrf.mxu0  ;;  %v3505_v42 = vpop.f32.mrf.mxu1  ;;  %v1603_v10 = vadd.f32 %v1602_v25, %v6711_v3 }
 0x5b6   :  { %v1681_v55 = vpop.f32.mrf.mxu0  ;;  %v1722_v28 = vpop.f32.mrf.mxu1 }
 0x5b7   :  { %v1682_v4 = vadd.f32 %v1681_v55, %v6709_v32 }
 0x5b8   :  { %v1683_v56 = vpop.f32.mrf.mxu0  ;;  %v3524_v59 = vpop.f32.mrf.mxu1 }
 0x5b9   :  { %v1728_v35 = vadd.f32 %v1682_v4, %v1601_v29  ;;  %v1684_v45 = vadd.f32 %v1683_v56, %v6710_v50  ;;  %v3046_v29 = vld [vmem:[%s6424_s0 + $0xc] sm:$0x7] }
 0x5ba   :  { %v1685_v12 = vpop.f32.mrf.mxu0  ;;  %v1725_v52 = vpop.f32.mrf.mxu1  ;;  %v1844_v56 = vrot.slane %v3046_v29, 1 }
 0x5bb   :  { %v3043_v53 = vmul.f32 -1.442695, %v1728_v35  ;;  %v1735_v38 = vadd.f32 %v1684_v45, %v1603_v10  ;;  %v1835_v52 = vunpack.c.l.bf16 %v3046_v29  ;;  %v1723_v45 = vadd.f32 %v1722_v28, %v4813_v33 }
 0x5bc   :  { %v1686_v43 = vpop.f32.mrf.mxu0  ;;  %v3525_v27 = vpop.f32.mrf.mxu1  ;;  %v1846_v10 = vunpack.c.l.bf16 %v1844_v56 }
 0x5bd   :  { %3935 = vpow2.f32 %v3043_v53  ;;  %v3044_v42 = vmul.f32 -1.442695, %v1735_v38 }
 0x5bf   :  { %3937 = vpow2.f32 %v3044_v42 }
 0x5ca   :  { %v3936_v44 = vpop.eup %3935 }
 0x5cb   :  { %v1732_v21 = vadd.f32 1.0, %v3936_v44  ;;  %v1642_v44 = vadd.f32 %v1641_v5, %v4816_v30 }
 0x5cc   :  { %v3938_v55 = vpop.eup %3937 }
 0x5cd   :  { %3939 = vrcp.f32 %v1732_v21  ;;  %v1739_v43 = vadd.f32 1.0, %v3938_v55 }
 0x5cf   :  { %3941 = vrcp.f32 %v1739_v43 }
 0x5d6   :  { %v1788_v35 = vpop.f32.mrf.mxu0  ;;  %v1829_v12 = vpop.f32.mrf.mxu1 }
 0x5d7   :  { %v1789_v4 = vadd.f32 %v1788_v35, %v6616_v9 }
 0x5d8   :  { %v1790_v59 = vpop.f32.mrf.mxu0  ;;  %v3544_v53 = vpop.f32.mrf.mxu1 }
 0x5d9   :  { %v1836_v25 = vadd.f32 %v1835_v52, %v1789_v4  ;;  %v1791_v50 = vadd.f32 %v1790_v59, %v4546_v61  ;;  %v1830_v59 = vadd.f32 %v1829_v12, %v4552_v2  ;;  %v5648_v12 = vld [vmem:[%s6420_s1 + $0xac] ss:$12 sps:$4 sm:$0xff]  }
 0x5da   :  { %v3940_v27 = vpop.eup %3939  ;;  %v1792_v38 = vpop.f32.mrf.mxu0 }
 0x5db   :  { %v1832_v42 = vpop.f32.mrf.mxu1  ;;  %v1742_v21 = vmul.f32 %v3940_v27, %v1723_v45  ;;  %v3047_v3 = vmul.f32 -1.442695, %v1836_v25  ;;  %v1847_v35 = vadd.f32 %v1846_v10, %v1791_v50 }
 0x5dc   :  { %v1793_v32 = vpop.f32.mrf.mxu0  ;;  %v3942_v28 = vpop.eup %3941 }
 0x5dd   :  { %v3545_v55 = vpop.f32.mrf.mxu1  ;;  %v1743_v41 = vadd.f32 %v1742_v21, %v1642_v44  ;;  %3943 = vpow2.f32 %v3047_v3  ;;  %v3048_v53 = vmul.f32 -1.442695, %v1847_v35  ;;  %v1745_v5 = vsub.f32 1.0, %v3942_v28 }
 0x5de   :  { %v1747_v43 = vmul.f32 %v3942_v28, %v5339_v24  ;;  %v5655_v28 = vld [vmem:[%s6420_s1 + $0xa8] ss:$12 sps:$4 sm:$0xff]  }
 0x5df   :  { %3945 = vtanh.f32 %v1743_v41  ;;  %v1855_v41 = vrot.slane %v3046_v29, 2 }
 0x5e0   :  { %3947 = vpow2.f32 %v3048_v53 }
 0x5e1   :  { %v1857_v25 = vunpack.c.l.bf16 %v1855_v41  ;;  %v6724_v41 = vld [vmem:[#allocation5_spill] sm:$0xff] }
 0x5ea   :  { %v3944_v52 = vpop.eup %3943 }
 0x5eb   :  { %v1840_v4 = vadd.f32 1.0, %v3944_v52  ;;  %v5662_v52 = vld [vmem:[%s6420_s1 + $0x94] ss:$12 sps:$4 sm:$0xff]  }
 0x5ec   :  { %v3946_v56 = vpop.eup %3945 }
 0x5ed   :  { %3949 = vrcp.f32 %v1840_v4  ;;  %v1746_v38 = vmul.f32 %v3946_v56, %v1745_v5  ;;  %v3948_v50 = vpop.eup %3947  ;;  %v5672_v4 = vld [vmem:[%s6420_s1 + $0x90] ss:$12 sps:$4 sm:$0xff]   ;;  %v5686_v5 = vld [vmem:[%s6420_s1 + $0x78] ss:$12 sps:$4 sm:$0xff]   ;;  %v5700_v56 = vld [vmem:[%s6420_s1 + $0x60] ss:$12 sps:$4 sm:$0xff]  }
 0x5ee   :  { %v1851_v3 = vadd.f32 1.0, %v3948_v50  ;;  %v6723_v50 = vld [vmem:[#allocation4_spill] sm:$0xff] }
 0x5ef   :  { %v5595_v45 = vadd.f32 %v1747_v43, %v1746_v38  ;;  %v6715_v38 = vld [vmem:[#allocation30_spill] sm:$0xff]  ;;  %v6716_v43 = vld [vmem:[#allocation31_spill] sm:$0xff] }
 0x5f0   :  { %3951 = vrcp.f32 %v1851_v3  ;;  %v6725_v3 = vld [vmem:[#allocation6_spill] sm:$0xff] }
 0x5f1   :  { %v1749_v32 = vpack.c.bf16 %v5595_v45, %v5595_v45 }
 0x5f3   :  { %3045 = vst [vmem:[%s6427_s7 + $0x3] sm:$0x1] %v1749_v32 }
 0x5fa   :  { %v3950_v27 = vpop.eup %3949 }
 0x5fb   :  { %v1854_v44 = vmul.f32 %v3950_v27, %v1830_v59  ;;  %v6726_v59 = vld [vmem:[#allocation7_spill] sm:$0xff]  ;;  %v6728_v27 = vld [vmem:[#allocation9_spill] sm:$0xff] }
 0x5fd   :  { %v1858_v10 = vadd.f32 %v1857_v25, %v1854_v44  ;;  %v3952_v24 = vpop.eup %3951  ;;  %v6727_v25 = vld [vmem:[#allocation8_spill] sm:$0xff]  ;;  %v6729_v44 = vld [vmem:[#allocation10_spill] sm:$0xff] }
 0x5fe   :  { %v1860_v42 = vsub.f32 1.0, %v3952_v24  ;;  %v1862_v35 = vmul.f32 %v3952_v24, %v5351_v34  ;;  %v6712_v34 = vld [vmem:[#allocation27_spill] sm:$0xff]  ;;  %v6731_v24 = vld [vmem:[#allocation12_spill] sm:$0xff] }
 0x5ff   :  { %3953 = vtanh.f32 %v1858_v10  ;;  %v6730_v10 = vld [vmem:[#allocation11_spill] sm:$0xff] }
 0x60c   :  { %v3954_v21 = vpop.eup %3953 }
 0x60d   :  { %v1861_v55 = vmul.f32 %v3954_v21, %v1860_v42  ;;  %v6732_v42 = vld [vmem:[#allocation13_spill] sm:$0xff]  ;;  %v6733_v21 = vld [vmem:[#allocation14_spill] sm:$0xff] }
 0x60f   :  { %v5604_v53 = vadd.f32 %v1862_v35, %v1861_v55  ;;  %v6734_v55 = vld [vmem:[#allocation15_spill] sm:$0xff]  ;;  %v6735_v35 = vld [vmem:[#allocation16_spill] sm:$0xff] }
 0x611   :  { %v5608_v29 = vpack.c.bf16 %v5604_v53, %v5604_v53 }
 0x613   :  { %1898 = vmatmul.mubr.bf16.vlgmr.msra.gmra.mxu0 %v5608_v29  ;;  %3563 = vmatmul.mubr.bf16.vlgmr.msra.gmra.mxu1 %v5608_v29 }
 0x614   :  { %1947 = vmatpush1.bf16.msra.mxu0 %v5362_v31  ;;  %3567 = vmatpush3.bf16.msra.mxu1 %v5368_v0 }
 0x615   :  { %1948 = vmatprep.subr.bf16.mxu0 %v5374_v19  ;;  %3568 = vmatprep.subr.bf16.mxu1 %v6593_v58 }
 0x616   :  { %1978 = vmatprep.mubr.bf16.mxu0 %v6594_v62  ;;  %3582 = vmatprep.mubr.msk.bf16.mxu1 %vm4171_vm0, %v6593_v58 }
 0x618   :  { %1949 = vmatpush1.bf16.msra.mxu0 %v5384_v16  ;;  %3569 = vmatpush3.bf16.msra.mxu1 %v5390_v17 }
 0x619   :  { %1950 = vmatprep.subr.bf16.mxu0 %v5396_v22  ;;  %3570 = vmatprep.subr.bf16.mxu1 %v6593_v58 }
 0x61c   :  { %1951 = vmatpush1.bf16.msra.mxu0 %v5403_v6  ;;  %3571 = vmatpush3.bf16.msra.mxu1 %v5409_v13 }
 0x61d   :  { %1952 = vmatprep.subr.bf16.mxu0 %v5415_v57  ;;  %3572 = vmatprep.subr.bf16.mxu1 %v6593_v58 }
 0x620   :  { %1953 = vmatpush1.bf16.msra.mxu0 %v5422_v8  ;;  %3573 = vmatpush3.bf16.msra.mxu1 %v5428_v15 }
 0x621   :  { %1954 = vmatprep.subr.bf16.mxu0 %v5434_v39  ;;  %3574 = vmatprep.subr.bf16.mxu1 %v6593_v58 }
 0x624   :  { %1955 = vmatpush1.bf16.msra.mxu0 %v5441_v20  ;;  %3575 = vmatpush3.bf16.msra.mxu1 %v5447_v14 }
 0x625   :  { %1956 = vmatprep.subr.bf16.mxu0 %v5453_v26  ;;  %3576 = vmatprep.subr.bf16.mxu1 %v6593_v58 }
 0x628   :  { %1957 = vmatpush1.bf16.msra.mxu0 %v5460_v36  ;;  %3577 = vmatpush3.bf16.msra.mxu1 %v5466_v37 }
 0x629   :  { %1958 = vmatprep.subr.bf16.mxu0 %v5472_v23  ;;  %3578 = vmatprep.subr.bf16.mxu1 %v6593_v58 }
 0x62c   :  { %1959 = vmatpush1.bf16.msra.mxu0 %v5479_v18  ;;  %3579 = vmatpush3.bf16.msra.mxu1 %v6712_v34 }
 0x62d   :  { %1960 = vmatprep.subr.bf16.mxu0 %v5491_v7  ;;  %3580 = vmatprep.subr.bf16.mxu1 %v6593_v58 }
 0x630   :  { %1961 = vmatpush1.bf16.msra.mxu0 %v5498_v11  ;;  %3581 = vmatpush3.bf16.msra.mxu1 %v5504_v40 }
 0x631   :  { %2053 = vmatprep.subr.bf16.mxu0 %v5648_v12  ;;  %3586 = vmatprep.subr.bf16.mxu1 %v6593_v58 }
 0x633   :  { %1979 = vmatmul.mubr.bf16.vlgmr.msra.gmra.mxu0 %v1749_v32  ;;  %3583 = vmatmul.mubr.bf16.vlgmr.msra.gmra.mxu1 %v1749_v32  ;;  %v6717_v32 = vld [vmem:[#allocation32_spill] sm:$0xff] }
 0x634   :  { %2054 = vmatpush1.bf16.msra.mxu0 %v5655_v28  ;;  %3587 = vmatpush3.bf16.msra.mxu1 %v5059_v54  ;;  %v5679_v54 = vld [vmem:[%s6420_s1 + $0x7c] ss:$12 sps:$4 sm:$0xff]  }
 0x635   :  { %2055 = vmatprep.subr.bf16.mxu0 %v5662_v52  ;;  %3588 = vmatprep.subr.bf16.mxu1 %v6593_v58 }
 0x636   :  { %2085 = vmatprep.mubr.bf16.mxu0 %v6594_v62  ;;  %3602 = vmatprep.mubr.msk.bf16.mxu1 %vm4171_vm0, %v6593_v58 }
 0x638   :  { %2056 = vmatpush1.bf16.msra.mxu0 %v5672_v4  ;;  %3589 = vmatpush3.bf16.msra.mxu1 %v5071_v47  ;;  %v5693_v47 = vld [vmem:[%s6420_s1 + $0x64] ss:$12 sps:$4 sm:$0xff]  }
 0x639   :  { %2057 = vmatprep.subr.bf16.mxu0 %v5679_v54  ;;  %3590 = vmatprep.subr.bf16.mxu1 %v6593_v58 }
 0x63c   :  { %2058 = vmatpush1.bf16.msra.mxu0 %v5686_v5  ;;  %3591 = vmatpush3.bf16.msra.mxu1 %v5080_v63  ;;  %v5707_v63 = vld [vmem:[%s6420_s1 + $0x4c] ss:$12 sps:$4 sm:$0xff]  }
 0x63d   :  { %2059 = vmatprep.subr.bf16.mxu0 %v5693_v47  ;;  %3592 = vmatprep.subr.bf16.mxu1 %v6593_v58  ;;  %6713 = vst [vmem:[#allocation27_spill] sm:$0xff] %v5707_v63 }
 0x640   :  { %2060 = vmatpush1.bf16.msra.mxu0 %v5700_v56  ;;  %3593 = vmatpush3.bf16.msra.mxu1 %v5089_v51  ;;  %v6714_v51 = vld [vmem:[#allocation29_spill] sm:$0xff] }
 0x641   :  { %2061 = vmatprep.subr.bf16.mxu0 %v5707_v63  ;;  %3594 = vmatprep.subr.bf16.mxu1 %v6593_v58 }
 0x644   :  { %2062 = vmatpush1.bf16.msra.mxu0 %v5097_v60  ;;  %3595 = vmatpush3.bf16.msra.mxu1 %v5103_v1  ;;  %v6718_v60 = vld [vmem:[#allocation33_spill] sm:$0xff]  ;;  %v6719_v1 = vld [vmem:[#allocation34_spill] sm:$0xff] }
 0x645   :  { %2063 = vmatprep.subr.bf16.mxu0 %v5109_v48  ;;  %3596 = vmatprep.subr.bf16.mxu1 %v6593_v58  ;;  %v6720_v48 = vld [vmem:[#allocation35_spill] sm:$0xff] }
 0x648   :  { %2064 = vmatpush1.bf16.msra.mxu0 %v5116_v49  ;;  %3597 = vmatpush3.bf16.msra.mxu1 %v5122_v46  ;;  %v6721_v49 = vld [vmem:[#allocation2_spill] sm:$0xff]  ;;  %v6722_v46 = vld [vmem:[#allocation3_spill] sm:$0xff] }
 0x649   :  { %2065 = vmatprep.subr.bf16.mxu0 %v6714_v51  ;;  %3598 = vmatprep.subr.bf16.mxu1 %v6593_v58  ;;  %v6737_v51 = vld [vmem:[#allocation18_spill] sm:$0xff] }
 0x64c   :  { %2066 = vmatpush1.bf16.msra.mxu0 %v6715_v38  ;;  %3599 = vmatpush3.bf16.msra.mxu1 %v6716_v43  ;;  %v6738_v38 = vld [vmem:[#allocation19_spill] sm:$0xff]  ;;  %v6739_v43 = vld [vmem:[#allocation20_spill] sm:$0xff] }
 0x64d   :  { %2067 = vmatprep.subr.bf16.mxu0 %v6717_v32  ;;  %3600 = vmatprep.subr.bf16.mxu1 %v6593_v58  ;;  %v6740_v32 = vld [vmem:[#allocation21_spill] sm:$0xff] }
 0x650   :  { %2068 = vmatpush1.bf16.msra.mxu0 %v6718_v60  ;;  %3601 = vmatpush3.bf16.msra.mxu1 %v6719_v1  ;;  %v6741_v60 = vld [vmem:[#allocation22_spill] sm:$0xff]  ;;  %v6742_v1 = vld [vmem:[#allocation23_spill] sm:$0xff] }
 0x651   :  { %2164 = vmatprep.subr.bf16.mxu0 %v6720_v48  ;;  %3606 = vmatprep.subr.bf16.mxu1 %v6593_v58  ;;  %v6743_v48 = vld [vmem:[#allocation24_spill] sm:$0xff] }
 0x653   :  { %2086 = vmatmul.mubr.bf16.vlgmr.msra.gmra.mxu0 %v5608_v29  ;;  %3603 = vmatmul.mubr.bf16.vlgmr.msra.gmra.mxu1 %v5608_v29  ;;  %v6736_v29 = vld [vmem:[#allocation17_spill] sm:$0xff] }
 0x654   :  { %2165 = vmatpush1.bf16.msra.mxu0 %v6721_v49  ;;  %3607 = vmatpush3.bf16.msra.mxu1 %v6722_v46  ;;  %v6744_v49 = vld [vmem:[#allocation25_spill] sm:$0xff] }
 0x655   :  { %2166 = vmatprep.subr.bf16.mxu0 %v6723_v50  ;;  %3608 = vmatprep.subr.bf16.mxu1 %v6593_v58 }
 0x656   :  { %2196 = vmatprep.mubr.bf16.mxu0 %v6594_v62  ;;  %3622 = vmatprep.mubr.msk.bf16.mxu1 %vm4171_vm0, %v6593_v58 }
 0x658   :  { %2167 = vmatpush1.bf16.msra.mxu0 %v6724_v41  ;;  %3609 = vmatpush3.bf16.msra.mxu1 %v6725_v3 }
 0x659   :  { %2168 = vmatprep.subr.bf16.mxu0 %v6726_v59  ;;  %3610 = vmatprep.subr.bf16.mxu1 %v6593_v58 }
 0x65c   :  { %2169 = vmatpush1.bf16.msra.mxu0 %v6727_v25  ;;  %3611 = vmatpush3.bf16.msra.mxu1 %v6728_v27 }
 0x65d   :  { %2170 = vmatprep.subr.bf16.mxu0 %v6729_v44  ;;  %3612 = vmatprep.subr.bf16.mxu1 %v6593_v58 }
 0x660   :  { %2171 = vmatpush1.bf16.msra.mxu0 %v6730_v10  ;;  %3613 = vmatpush3.bf16.msra.mxu1 %v6731_v24 }
 0x661   :  { %2172 = vmatprep.subr.bf16.mxu0 %v6732_v42  ;;  %3614 = vmatprep.subr.bf16.mxu1 %v6593_v58  ;;  %v6745_v42 = vld [vmem:[#allocation26_spill] sm:$0xff] }
 0x664   :  { %2173 = vmatpush1.bf16.msra.mxu0 %v6733_v21  ;;  %3615 = vmatpush3.bf16.msra.mxu1 %v6734_v55  ;;  %v6746_v55 = vld [vmem:[#allocation36_spill] sm:$0xff] }
 0x665   :  { %2174 = vmatprep.subr.bf16.mxu0 %v6735_v35  ;;  %3616 = vmatprep.subr.bf16.mxu1 %v6593_v58 }
 0x668   :  { %2175 = vmatpush1.bf16.msra.mxu0 %v6736_v29  ;;  %3617 = vmatpush3.bf16.msra.mxu1 %v6737_v51 }
 0x669   :  { %2176 = vmatprep.subr.bf16.mxu0 %v6738_v38  ;;  %3618 = vmatprep.subr.bf16.mxu1 %v6593_v58 }
 0x66c   :  { %2177 = vmatpush1.bf16.msra.mxu0 %v6739_v43  ;;  %3619 = vmatpush3.bf16.msra.mxu1 %v6740_v32 }
 0x66d   :  { %2178 = vmatprep.subr.bf16.mxu0 %v6741_v60  ;;  %3620 = vmatprep.subr.bf16.mxu1 %v6593_v58 }
 0x670   :  { %2179 = vmatpush1.bf16.msra.mxu0 %v6742_v1  ;;  %3621 = vmatpush3.bf16.msra.mxu1 %v6743_v48  ;;  %v6747_v1 = vld [vmem:[#allocation28_spill] sm:$0xff] }
 0x671   :  { %2245 = vmatprep.subr.bf16.mxu0 %v6744_v49  ;;  %3626 = vmatprep.subr.bf16.mxu1 %v6593_v58 }
 0x6d3   :  { %v1899_v46 = vpop.f32.mrf.mxu0  ;;  %v1940_v50 = vpop.f32.mrf.mxu1 }
 0x6d4   :  { %v1900_v21 = vadd.f32 %v1899_v46, %v6745_v42 }
 0x6d5   :  { %v1901_v41 = vpop.f32.mrf.mxu0  ;;  %v3564_v3 = vpop.f32.mrf.mxu1 }
 0x6d7   :  { %v1903_v59 = vpop.f32.mrf.mxu0  ;;  %v1943_v25 = vpop.f32.mrf.mxu1 }
 0x6d8   :  { %v6748_v59 = vld [vmem:[#allocation37_spill] sm:$0xff] }
 0x6d9   :  { %v1904_v27 = vpop.f32.mrf.mxu0  ;;  %v3565_v44 = vpop.f32.mrf.mxu1  ;;  %v1902_v25 = vadd.f32 %v1901_v41, %v6748_v59 }
 0x6f3   :  { %v1980_v10 = vpop.f32.mrf.mxu0  ;;  %v2021_v24 = vpop.f32.mrf.mxu1 }
 0x6f4   :  { %v1981_v35 = vadd.f32 %v1980_v10, %v6746_v55  ;;  %v3052_v10 = vld [vmem:[%s6424_s0 + $0xf] sm:$0x7] }
 0x6f5   :  { %v1982_v29 = vpop.f32.mrf.mxu0  ;;  %v3584_v51 = vpop.f32.mrf.mxu1 }
 0x6f6   :  { %v2027_v38 = vadd.f32 %v1981_v35, %v1900_v21  ;;  %v1983_v48 = vadd.f32 %v1982_v29, %v6747_v1  ;;  %v2134_v35 = vunpack.c.l.bf16 %v3052_v10  ;;  %v2143_v29 = vrot.slane %v3052_v10, 1 }
 0x6f7   :  { %v1984_v43 = vpop.f32.mrf.mxu0  ;;  %v2024_v32 = vpop.f32.mrf.mxu1 }
 0x6f8   :  { %v3049_v60 = vmul.f32 -1.442695, %v2027_v38  ;;  %v2034_v27 = vadd.f32 %v1983_v48, %v1902_v25  ;;  %v2022_v48 = vadd.f32 %v2021_v24, %v4813_v33  ;;  %v2145_v25 = vunpack.c.l.bf16 %v2143_v29 }
 0x6f9   :  { %v1985_v49 = vpop.f32.mrf.mxu0  ;;  %v3585_v3 = vpop.f32.mrf.mxu1 }
 0x6fa   :  { %3955 = vpow2.f32 %v3049_v60  ;;  %v3050_v44 = vmul.f32 -1.442695, %v2034_v27 }
 0x6fc   :  { %3957 = vpow2.f32 %v3050_v44 }
 0x707   :  { %v3956_v63 = vpop.eup %3955 }
 0x708   :  { %v2031_v46 = vadd.f32 1.0, %v3956_v63  ;;  %v1941_v63 = vadd.f32 %v1940_v50, %v4816_v30 }
 0x709   :  { %v3958_v21 = vpop.eup %3957 }
 0x70a   :  { %3959 = vrcp.f32 %v2031_v46  ;;  %v2038_v43 = vadd.f32 1.0, %v3958_v21 }
 0x70c   :  { %3961 = vrcp.f32 %v2038_v43 }
 0x713   :  { %v2087_v51 = vpop.f32.mrf.mxu0  ;;  %v2128_v38 = vpop.f32.mrf.mxu1 }
 0x714   :  { %v2088_v32 = vadd.f32 %v2087_v51, %v6616_v9 }
 0x715   :  { %v2089_v41 = vpop.f32.mrf.mxu0  ;;  %v3604_v60 = vpop.f32.mrf.mxu1 }
 0x716   :  { %v2135_v49 = vadd.f32 %v2134_v35, %v2088_v32  ;;  %v2090_v1 = vadd.f32 %v2089_v41, %v4546_v61  ;;  %v2129_v41 = vadd.f32 %v2128_v38, %v4552_v2  ;;  %v5995_v38 = vld [vmem:[%s6421_s3 + $0x80] ss:$12 sps:$4 sm:$0xff]  }
 0x717   :  { %v3960_v3 = vpop.eup %3959  ;;  %v2091_v27 = vpop.f32.mrf.mxu0  ;;  %6751 = vst [vmem:[#allocation30_spill] sm:$0xff] %v5995_v38 }
 0x718   :  { %v2131_v44 = vpop.f32.mrf.mxu1  ;;  %v2041_v46 = vmul.f32 %v3960_v3, %v2022_v48  ;;  %v3053_v59 = vmul.f32 -1.442695, %v2135_v49  ;;  %v2146_v51 = vadd.f32 %v2145_v25, %v2090_v1  ;;  %v2154_v1 = vrot.slane %v3052_v10, 2 }
 0x719   :  { %v2092_v55 = vpop.f32.mrf.mxu0  ;;  %v3962_v24 = vpop.eup %3961 }
 0x71a   :  { %v3605_v21 = vpop.f32.mrf.mxu1  ;;  %v2042_v42 = vadd.f32 %v2041_v46, %v1941_v63  ;;  %3963 = vpow2.f32 %v3053_v59  ;;  %v3054_v60 = vmul.f32 -1.442695, %v2146_v51  ;;  %v2044_v50 = vsub.f32 1.0, %v3962_v24 }
 0x71b   :  { %v2046_v43 = vmul.f32 %v3962_v24, %v5595_v45  ;;  %v2156_v49 = vunpack.c.l.bf16 %v2154_v1  ;;  %v6001_v24 = vld [vmem:[%s6421_s3 + $0x64] ss:$12 sps:$4 sm:$0xff]   ;;  %v6058_v1 = vld [vmem:[%s6421_s3 + $0x1c] ss:$12 sps:$4 sm:$0xff]  }
 0x71c   :  { %3965 = vtanh.f32 %v2042_v42  ;;  %6752 = vst [vmem:[#allocation31_spill] sm:$0xff] %v6001_v24  ;;  %6761 = vst [vmem:[#allocation6_spill] sm:$0xff] %v6058_v1 }
 0x71d   :  { %3967 = vpow2.f32 %v3054_v60 }
 0x727   :  { %v3964_v35 = vpop.eup %3963 }
 0x728   :  { %v2139_v32 = vadd.f32 1.0, %v3964_v35  ;;  %v6008_v35 = vld [vmem:[%s6421_s3 + $0x60] ss:$12 sps:$4 sm:$0xff]  }
 0x729   :  { %v3966_v29 = vpop.eup %3965  ;;  %6753 = vst [vmem:[#allocation32_spill] sm:$0xff] %v6008_v35 }
 0x72a   :  { %3969 = vrcp.f32 %v2139_v32  ;;  %v2045_v27 = vmul.f32 %v3966_v29, %v2044_v50  ;;  %v3968_v42 = vpop.eup %3967  ;;  %v6014_v32 = vld [vmem:[%s6421_s3 + $0x68] ss:$12 sps:$4 sm:$0xff]   ;;  %v6020_v50 = vld [vmem:[%s6421_s3 + $0x4c] ss:$12 sps:$4 sm:$0xff]  }
 0x72b   :  { %v2150_v59 = vadd.f32 1.0, %v3968_v42  ;;  %6754 = vst [vmem:[#allocation33_spill] sm:$0xff] %v6014_v32  ;;  %6755 = vst [vmem:[#allocation34_spill] sm:$0xff] %v6020_v50  ;;  %v6027_v29 = vld [vmem:[%s6421_s3 + $0x48] ss:$12 sps:$4 sm:$0xff]  }
 0x72c   :  { %v5776_v48 = vadd.f32 %v2046_v43, %v2045_v27  ;;  %6756 = vst [vmem:[#allocation35_spill] sm:$0xff] %v6027_v29  ;;  %v6033_v27 = vld [vmem:[%s6421_s3 + $0x50] ss:$12 sps:$4 sm:$0xff]   ;;  %v6039_v43 = vld [vmem:[%s6421_s3 + $0x34] ss:$12 sps:$4 sm:$0xff]  }
 0x72d   :  { %3971 = vrcp.f32 %v2150_v59  ;;  %6757 = vst [vmem:[#allocation2_spill] sm:$0xff] %v6033_v27  ;;  %6758 = vst [vmem:[#allocation3_spill] sm:$0xff] %v6039_v43  ;;  %v6052_v42 = vld [vmem:[%s6421_s3 + $0x38] ss:$12 sps:$4 sm:$0xff]  }
 0x72e   :  { %v2048_v55 = vpack.c.bf16 %v5776_v48, %v5776_v48  ;;  %6760 = vst [vmem:[#allocation5_spill] sm:$0xff] %v6052_v42  ;;  %v6065_v59 = vld [vmem:[%s6421_s3 + $0x18] ss:$12 sps:$4 sm:$0xff]  }
 0x72f   :  { %6762 = vst [vmem:[#allocation7_spill] sm:$0xff] %v6065_v59 }
 0x730   :  { %3051 = vst [vmem:[%s6427_s7 + $0x4] sm:$0x1] %v2048_v55 }
 0x737   :  { %v3970_v3 = vpop.eup %3969 }
 0x738   :  { %v2153_v63 = vmul.f32 %v3970_v3, %v2129_v41  ;;  %v6071_v41 = vld [vmem:[%s6421_s3 + $0x20] ss:$12 sps:$4 sm:$0xff]  }
 0x739   :  { %6763 = vst [vmem:[#allocation8_spill] sm:$0xff] %v6071_v41  ;;  %v6084_v3 = vld [vmem:[%s6421_s3] ss:$12 sps:$4 sm:$0xff]  }
 0x73a   :  { %v2157_v25 = vadd.f32 %v2156_v49, %v2153_v63  ;;  %v3972_v45 = vpop.eup %3971  ;;  %v6077_v49 = vld [vmem:[%s6421_s3 + $0x4] ss:$12 sps:$4 sm:$0xff]   ;;  %6765 = vst [vmem:[#allocation10_spill] sm:$0xff] %v6084_v3  ;;  %v6090_v63 = vld [vmem:[%s6421_s3 + $0x8] ss:$12 sps:$4 sm:$0xff]  }
 0x73b   :  { %v2159_v44 = vsub.f32 1.0, %v3972_v45  ;;  %v2161_v51 = vmul.f32 %v3972_v45, %v5604_v53  ;;  %v5982_v53 = vld [vmem:[%s6421_s3 + $0x7c] ss:$12 sps:$4 sm:$0xff]   ;;  %6764 = vst [vmem:[#allocation9_spill] sm:$0xff] %v6077_v49  ;;  %6766 = vst [vmem:[#allocation11_spill] sm:$0xff] %v6090_v63 }
 0x73c   :  { %3973 = vtanh.f32 %v2157_v25  ;;  %v6096_v25 = vld [vmem:[%s6422_s5 + $0xac] ss:$12 sps:$4 sm:$0xff]  }
 0x73d   :  { %6767 = vst [vmem:[#allocation12_spill] sm:$0xff] %v6096_v25 }
 0x749   :  { %v3974_v46 = vpop.eup %3973 }
 0x74a   :  { %v2160_v21 = vmul.f32 %v3974_v46, %v2159_v44 }
 0x74c   :  { %v5785_v60 = vadd.f32 %v2161_v51, %v2160_v21 }
 0x74e   :  { %v5789_v10 = vpack.c.bf16 %v5785_v60, %v5785_v60 }
 0x750   :  { %2197 = vmatmul.mubr.bf16.vlgmr.msra.gmra.mxu0 %v5789_v10  ;;  %3623 = vmatmul.mubr.bf16.vlgmr.msra.gmra.mxu1 %v5789_v10 }
 0x751   :  { %2246 = vmatpush1.bf16.msra.mxu0 %v5362_v31  ;;  %3627 = vmatpush3.bf16.msra.mxu1 %v5368_v0  ;;  %v5832_v31 = vld [vmem:[%s6420_s1 + $0xb0] ss:$12 sps:$4 sm:$0xff]   ;;  %v5844_v0 = vld [vmem:[%s6420_s1 + $0x98] ss:$12 sps:$4 sm:$0xff]  }
 0x752   :  { %2247 = vmatprep.subr.bf16.mxu0 %v5374_v19  ;;  %3628 = vmatprep.subr.bf16.mxu1 %v6593_v58  ;;  %v5853_v19 = vld [vmem:[%s6420_s1 + $0x80] ss:$12 sps:$4 sm:$0xff]  }
 0x753   :  { %2277 = vmatprep.mubr.bf16.mxu0 %v6594_v62  ;;  %3642 = vmatprep.mubr.msk.bf16.mxu1 %vm4171_vm0, %v6593_v58 }
 0x755   :  { %2248 = vmatpush1.bf16.msra.mxu0 %v5384_v16  ;;  %3629 = vmatpush3.bf16.msra.mxu1 %v5390_v17  ;;  %v5862_v16 = vld [vmem:[%s6420_s1 + $0x68] ss:$12 sps:$4 sm:$0xff]  }
 0x756   :  { %2249 = vmatprep.subr.bf16.mxu0 %v5396_v22  ;;  %3630 = vmatprep.subr.bf16.mxu1 %v6593_v58  ;;  %v6749_v17 = vld [vmem:[#allocation27_spill] sm:$0xff] }
 0x757   :  { %v5870_v22 = vld [vmem:[%s6420_s1 + $0x48] ss:$12 sps:$4 sm:$0xff]  }
 0x759   :  { %2250 = vmatpush1.bf16.msra.mxu0 %v5403_v6  ;;  %3631 = vmatpush3.bf16.msra.mxu1 %v5409_v13  ;;  %v5876_v6 = vld [vmem:[%s6420_s1 + $0x50] ss:$12 sps:$4 sm:$0xff]   ;;  %v5882_v13 = vld [vmem:[%s6420_s1 + $0x34] ss:$12 sps:$4 sm:$0xff]  }
 0x75a   :  { %2251 = vmatprep.subr.bf16.mxu0 %v5415_v57  ;;  %3632 = vmatprep.subr.bf16.mxu1 %v6593_v58  ;;  %v5889_v57 = vld [vmem:[%s6420_s1 + $0x30] ss:$12 sps:$4 sm:$0xff]  }
 0x75d   :  { %2252 = vmatpush1.bf16.msra.mxu0 %v5422_v8  ;;  %3633 = vmatpush3.bf16.msra.mxu1 %v5428_v15  ;;  %v5895_v8 = vld [vmem:[%s6420_s1 + $0x38] ss:$12 sps:$4 sm:$0xff]   ;;  %v5901_v15 = vld [vmem:[%s6420_s1 + $0x1c] ss:$12 sps:$4 sm:$0xff]  }
 0x75e   :  { %2253 = vmatprep.subr.bf16.mxu0 %v5434_v39  ;;  %3634 = vmatprep.subr.bf16.mxu1 %v6593_v58  ;;  %v5908_v39 = vld [vmem:[%s6420_s1 + $0x18] ss:$12 sps:$4 sm:$0xff]  }
 0x761   :  { %2254 = vmatpush1.bf16.msra.mxu0 %v5441_v20  ;;  %3635 = vmatpush3.bf16.msra.mxu1 %v5447_v14  ;;  %v5914_v20 = vld [vmem:[%s6420_s1 + $0x20] ss:$12 sps:$4 sm:$0xff]   ;;  %v5920_v14 = vld [vmem:[%s6420_s1 + $0x4] ss:$12 sps:$4 sm:$0xff]  }
 0x762   :  { %2255 = vmatprep.subr.bf16.mxu0 %v5453_v26  ;;  %3636 = vmatprep.subr.bf16.mxu1 %v6593_v58  ;;  %v5927_v26 = vld [vmem:[%s6420_s1] ss:$12 sps:$4 sm:$0xff]  }
 0x765   :  { %2256 = vmatpush1.bf16.msra.mxu0 %v5460_v36  ;;  %3637 = vmatpush3.bf16.msra.mxu1 %v5466_v37  ;;  %v5933_v36 = vld [vmem:[%s6420_s1 + $0x8] ss:$12 sps:$4 sm:$0xff]   ;;  %v5939_v37 = vld [vmem:[%s6421_s3 + $0xac] ss:$12 sps:$4 sm:$0xff]  }
 0x766   :  { %2257 = vmatprep.subr.bf16.mxu0 %v5472_v23  ;;  %3638 = vmatprep.subr.bf16.mxu1 %v6593_v58  ;;  %v5948_v23 = vld [vmem:[%s6421_s3 + $0xa8] ss:$12 sps:$4 sm:$0xff]  }
 0x769   :  { %2258 = vmatpush1.bf16.msra.mxu0 %v5479_v18  ;;  %3639 = vmatpush3.bf16.msra.mxu1 %v6712_v34  ;;  %v5954_v18 = vld [vmem:[%s6421_s3 + $0xb0] ss:$12 sps:$4 sm:$0xff]   ;;  %v5989_v34 = vld [vmem:[%s6421_s3 + $0x78] ss:$12 sps:$4 sm:$0xff]  }
 0x76a   :  { %2259 = vmatprep.subr.bf16.mxu0 %v5491_v7  ;;  %3640 = vmatprep.subr.bf16.mxu1 %v6593_v58  ;;  %v5970_v7 = vld [vmem:[%s6421_s3 + $0x90] ss:$12 sps:$4 sm:$0xff]   ;;  %6750 = vst [vmem:[#allocation29_spill] sm:$0xff] %v5989_v34 }
 0x76d   :  { %2260 = vmatpush1.bf16.msra.mxu0 %v5498_v11  ;;  %3641 = vmatpush3.bf16.msra.mxu1 %v5504_v40  ;;  %v5960_v40 = vld [vmem:[%s6421_s3 + $0x94] ss:$12 sps:$4 sm:$0xff]   ;;  %v5976_v11 = vld [vmem:[%s6421_s3 + $0x98] ss:$12 sps:$4 sm:$0xff]  }
 0x76e   :  { %2352 = vmatprep.subr.bf16.mxu0 %v5648_v12  ;;  %3646 = vmatprep.subr.bf16.mxu1 %v6593_v58 }
 0x770   :  { %2278 = vmatmul.mubr.bf16.vlgmr.msra.gmra.mxu0 %v2048_v55  ;;  %3643 = vmatmul.mubr.bf16.vlgmr.msra.gmra.mxu1 %v2048_v55  ;;  %v6046_v55 = vld [vmem:[%s6421_s3 + $0x30] ss:$12 sps:$4 sm:$0xff]  }
 0x771   :  { %2353 = vmatpush1.bf16.msra.mxu0 %v5655_v28  ;;  %3647 = vmatpush3.bf16.msra.mxu1 %v5832_v31  ;;  %6759 = vst [vmem:[#allocation4_spill] sm:$0xff] %v6046_v55 }
 0x772   :  { %2354 = vmatprep.subr.bf16.mxu0 %v5662_v52  ;;  %3648 = vmatprep.subr.bf16.mxu1 %v6593_v58 }
 0x773   :  { %2384 = vmatprep.mubr.bf16.mxu0 %v6594_v62  ;;  %3662 = vmatprep.mubr.msk.bf16.mxu1 %vm4171_vm0, %v6593_v58 }
 0x775   :  { %2355 = vmatpush1.bf16.msra.mxu0 %v5672_v4  ;;  %3649 = vmatpush3.bf16.msra.mxu1 %v5844_v0 }
 0x776   :  { %2356 = vmatprep.subr.bf16.mxu0 %v5679_v54  ;;  %3650 = vmatprep.subr.bf16.mxu1 %v6593_v58 }
 0x779   :  { %2357 = vmatpush1.bf16.msra.mxu0 %v5686_v5  ;;  %3651 = vmatpush3.bf16.msra.mxu1 %v5853_v19 }
 0x77a   :  { %2358 = vmatprep.subr.bf16.mxu0 %v5693_v47  ;;  %3652 = vmatprep.subr.bf16.mxu1 %v6593_v58 }
 0x77d   :  { %2359 = vmatpush1.bf16.msra.mxu0 %v5700_v56  ;;  %3653 = vmatpush3.bf16.msra.mxu1 %v5862_v16 }
 0x77e   :  { %2360 = vmatprep.subr.bf16.mxu0 %v6749_v17  ;;  %3654 = vmatprep.subr.bf16.mxu1 %v6593_v58 }
 0x781   :  { %2361 = vmatpush1.bf16.msra.mxu0 %v5870_v22  ;;  %3655 = vmatpush3.bf16.msra.mxu1 %v5876_v6 }
 0x782   :  { %2362 = vmatprep.subr.bf16.mxu0 %v5882_v13  ;;  %3656 = vmatprep.subr.bf16.mxu1 %v6593_v58 }
 0x785   :  { %2363 = vmatpush1.bf16.msra.mxu0 %v5889_v57  ;;  %3657 = vmatpush3.bf16.msra.mxu1 %v5895_v8 }
 0x786   :  { %2364 = vmatprep.subr.bf16.mxu0 %v5901_v15  ;;  %3658 = vmatprep.subr.bf16.mxu1 %v6593_v58 }
 0x789   :  { %2365 = vmatpush1.bf16.msra.mxu0 %v5908_v39  ;;  %3659 = vmatpush3.bf16.msra.mxu1 %v5914_v20 }
 0x78a   :  { %2366 = vmatprep.subr.bf16.mxu0 %v5920_v14  ;;  %3660 = vmatprep.subr.bf16.mxu1 %v6593_v58 }
 0x78d   :  { %2367 = vmatpush1.bf16.msra.mxu0 %v5927_v26  ;;  %3661 = vmatpush3.bf16.msra.mxu1 %v5933_v36 }
 0x78e   :  { %2463 = vmatprep.subr.bf16.mxu0 %v5939_v37  ;;  %3666 = vmatprep.subr.bf16.mxu1 %v6593_v58 }
 0x790   :  { %2385 = vmatmul.mubr.bf16.vlgmr.msra.gmra.mxu0 %v5789_v10  ;;  %3663 = vmatmul.mubr.bf16.vlgmr.msra.gmra.mxu1 %v5789_v10 }
 0x791   :  { %2464 = vmatpush1.bf16.msra.mxu0 %v5948_v23  ;;  %3667 = vmatpush3.bf16.msra.mxu1 %v5954_v18 }
 0x792   :  { %2465 = vmatprep.subr.bf16.mxu0 %v5960_v40  ;;  %3668 = vmatprep.subr.bf16.mxu1 %v6593_v58 }
 0x793   :  { %2495 = vmatprep.mubr.bf16.mxu0 %v6594_v62  ;;  %3682 = vmatprep.mubr.msk.bf16.mxu1 %vm4171_vm0, %v6593_v58 }
 0x795   :  { %2466 = vmatpush1.bf16.msra.mxu0 %v5970_v7  ;;  %3669 = vmatpush3.bf16.msra.mxu1 %v5976_v11 }
 0x796   :  { %2467 = vmatprep.subr.bf16.mxu0 %v5982_v53  ;;  %3670 = vmatprep.subr.bf16.mxu1 %v6593_v58 }
 0x799   :  { %2468 = vmatpush1.bf16.msra.mxu0 %v5989_v34  ;;  %3671 = vmatpush3.bf16.msra.mxu1 %v5995_v38 }
 0x79a   :  { %2469 = vmatprep.subr.bf16.mxu0 %v6001_v24  ;;  %3672 = vmatprep.subr.bf16.mxu1 %v6593_v58 }
 0x79d   :  { %2470 = vmatpush1.bf16.msra.mxu0 %v6008_v35  ;;  %3673 = vmatpush3.bf16.msra.mxu1 %v6014_v32  ;;  %v6770_v35 = vld [vmem:[#allocation28_spill] sm:$0xff] }
 0x79e   :  { %2471 = vmatprep.subr.bf16.mxu0 %v6020_v50  ;;  %3674 = vmatprep.subr.bf16.mxu1 %v6593_v58 }
 0x7a1   :  { %2472 = vmatpush1.bf16.msra.mxu0 %v6027_v29  ;;  %3675 = vmatpush3.bf16.msra.mxu1 %v6033_v27 }
 0x7a2   :  { %2473 = vmatprep.subr.bf16.mxu0 %v6039_v43  ;;  %3676 = vmatprep.subr.bf16.mxu1 %v6593_v58 }
 0x7a5   :  { %2474 = vmatpush1.bf16.msra.mxu0 %v6046_v55  ;;  %3677 = vmatpush3.bf16.msra.mxu1 %v6052_v42  ;;  %v6769_v42 = vld [vmem:[#allocation36_spill] sm:$0xff] }
 0x7a6   :  { %2475 = vmatprep.subr.bf16.mxu0 %v6058_v1  ;;  %3678 = vmatprep.subr.bf16.mxu1 %v6593_v58 }
 0x7a9   :  { %2476 = vmatpush1.bf16.msra.mxu0 %v6065_v59  ;;  %3679 = vmatpush3.bf16.msra.mxu1 %v6071_v41 }
 0x7aa   :  { %2477 = vmatprep.subr.bf16.mxu0 %v6077_v49  ;;  %3680 = vmatprep.subr.bf16.mxu1 %v6593_v58 }
 0x7ad   :  { %2478 = vmatpush1.bf16.msra.mxu0 %v6084_v3  ;;  %3681 = vmatpush3.bf16.msra.mxu1 %v6090_v63  ;;  %v6768_v63 = vld [vmem:[#allocation26_spill] sm:$0xff] }
 0x7ae   :  { %2544 = vmatprep.subr.bf16.mxu0 %v6096_v25  ;;  %3686 = vmatprep.subr.bf16.mxu1 %v6593_v58 }
 0x810   :  { %v2198_v45 = vpop.f32.mrf.mxu0  ;;  %v2239_v44 = vpop.f32.mrf.mxu1 }
 0x811   :  { %v2199_v1 = vadd.f32 %v2198_v45, %v6768_v63 }
 0x812   :  { %v2200_v46 = vpop.f32.mrf.mxu0  ;;  %v3624_v21 = vpop.f32.mrf.mxu1 }
 0x814   :  { %v2202_v51 = vpop.f32.mrf.mxu0  ;;  %v2242_v10 = vpop.f32.mrf.mxu1 }
 0x815   :  { %v6771_v51 = vld [vmem:[#allocation37_spill] sm:$0xff] }
 0x816   :  { %v2203_v3 = vpop.f32.mrf.mxu0  ;;  %v3625_v49 = vpop.f32.mrf.mxu1  ;;  %v2201_v10 = vadd.f32 %v2200_v46, %v6771_v51 }
 0x830   :  { %v2279_v41 = vpop.f32.mrf.mxu0  ;;  %v2320_v59 = vpop.f32.mrf.mxu1 }
 0x831   :  { %v2280_v55 = vadd.f32 %v2279_v41, %v6769_v42 }
 0x832   :  { %v2281_v43 = vpop.f32.mrf.mxu0  ;;  %v3644_v27 = vpop.f32.mrf.mxu1 }
 0x833   :  { %v2326_v29 = vadd.f32 %v2280_v55, %v2199_v1  ;;  %v2282_v24 = vadd.f32 %v2281_v43, %v6770_v35  ;;  %v3058_v27 = vld [vmem:[%s6424_s0 + $0x12] sm:$0x7] }
 0x834   :  { %v2283_v25 = vpop.f32.mrf.mxu0  ;;  %v2323_v50 = vpop.f32.mrf.mxu1  ;;  %v2442_v43 = vrot.slane %v3058_v27, 1 }
 0x835   :  { %v3055_v32 = vmul.f32 -1.442695, %v2326_v29  ;;  %v2333_v49 = vadd.f32 %v2282_v24, %v2201_v10  ;;  %v2433_v50 = vunpack.c.l.bf16 %v3058_v27  ;;  %v2321_v24 = vadd.f32 %v2320_v59, %v4813_v33 }
 0x836   :  { %v2284_v38 = vpop.f32.mrf.mxu0  ;;  %v3645_v21 = vpop.f32.mrf.mxu1  ;;  %v2444_v10 = vunpack.c.l.bf16 %v2442_v43 }
 0x837   :  { %3975 = vpow2.f32 %v3055_v32  ;;  %v3056_v3 = vmul.f32 -1.442695, %v2333_v49 }
 0x839   :  { %3977 = vpow2.f32 %v3056_v3 }
 0x844   :  { %v3976_v34 = vpop.eup %3975 }
 0x845   :  { %v2330_v45 = vadd.f32 1.0, %v3976_v34  ;;  %v2240_v34 = vadd.f32 %v2239_v44, %v4816_v30 }
 0x846   :  { %v3978_v55 = vpop.eup %3977 }
 0x847   :  { %3979 = vrcp.f32 %v2330_v45  ;;  %v2337_v38 = vadd.f32 1.0, %v3978_v55 }
 0x849   :  { %3981 = vrcp.f32 %v2337_v38 }
 0x850   :  { %v2386_v29 = vpop.f32.mrf.mxu0  ;;  %v2427_v1 = vpop.f32.mrf.mxu1 }
 0x851   :  { %v2387_v41 = vadd.f32 %v2386_v29, %v6616_v9 }
 0x852   :  { %v2388_v25 = vpop.f32.mrf.mxu0  ;;  %v3664_v32 = vpop.f32.mrf.mxu1 }
 0x853   :  { %v2434_v46 = vadd.f32 %v2433_v50, %v2387_v41  ;;  %v2389_v35 = vadd.f32 %v2388_v25, %v4546_v61  ;;  %v2428_v25 = vadd.f32 %v2427_v1, %v4552_v2  ;;  %v6135_v1 = vld [vmem:[%s6422_s5 + $0xa8] ss:$12 sps:$4 sm:$0xff]  }
 0x854   :  { %v3980_v21 = vpop.eup %3979  ;;  %v2390_v49 = vpop.f32.mrf.mxu0 }
 0x855   :  { %v2430_v3 = vpop.f32.mrf.mxu1  ;;  %v2340_v45 = vmul.f32 %v3980_v21, %v2321_v24  ;;  %v3059_v51 = vmul.f32 -1.442695, %v2434_v46  ;;  %v2445_v29 = vadd.f32 %v2444_v10, %v2389_v35 }
 0x856   :  { %v2391_v42 = vpop.f32.mrf.mxu0  ;;  %v3982_v59 = vpop.eup %3981 }
 0x857   :  { %v3665_v55 = vpop.f32.mrf.mxu1  ;;  %v2341_v63 = vadd.f32 %v2340_v45, %v2240_v34  ;;  %3983 = vpow2.f32 %v3059_v51  ;;  %v3060_v32 = vmul.f32 -1.442695, %v2445_v29  ;;  %v2343_v44 = vsub.f32 1.0, %v3982_v59 }
 0x858   :  { %v2345_v38 = vmul.f32 %v3982_v59, %v5776_v48  ;;  %v6147_v59 = vld [vmem:[%s6422_s5 + $0x94] ss:$12 sps:$4 sm:$0xff]  }
 0x859   :  { %3985 = vtanh.f32 %v2341_v63  ;;  %v2453_v63 = vrot.slane %v3058_v27, 2 }
 0x85a   :  { %3987 = vpow2.f32 %v3060_v32 }
 0x85b   :  { %v2455_v46 = vunpack.c.l.bf16 %v2453_v63  ;;  %v6201_v63 = vld [vmem:[%s6422_s5 + $0x68] ss:$12 sps:$4 sm:$0xff]  }
 0x864   :  { %v3984_v50 = vpop.eup %3983 }
 0x865   :  { %v2438_v41 = vadd.f32 1.0, %v3984_v50  ;;  %v6157_v50 = vld [vmem:[%s6422_s5 + $0x90] ss:$12 sps:$4 sm:$0xff]  }
 0x866   :  { %v3986_v43 = vpop.eup %3985 }
 0x867   :  { %3989 = vrcp.f32 %v2438_v41  ;;  %v2344_v49 = vmul.f32 %v3986_v43, %v2343_v44  ;;  %v3988_v35 = vpop.eup %3987  ;;  %v6163_v41 = vld [vmem:[%s6422_s5 + $0x98] ss:$12 sps:$4 sm:$0xff]   ;;  %v6169_v44 = vld [vmem:[%s6422_s5 + $0x7c] ss:$12 sps:$4 sm:$0xff]  }
 0x868   :  { %v2449_v51 = vadd.f32 1.0, %v3988_v35  ;;  %v6176_v43 = vld [vmem:[%s6422_s5 + $0x78] ss:$12 sps:$4 sm:$0xff]   ;;  %v6195_v35 = vld [vmem:[%s6422_s5 + $0x60] ss:$12 sps:$4 sm:$0xff]  }
 0x869   :  { %v6112_v24 = vadd.f32 %v2345_v38, %v2344_v49  ;;  %v6182_v49 = vld [vmem:[%s6422_s5 + $0x80] ss:$12 sps:$4 sm:$0xff]   ;;  %v6188_v38 = vld [vmem:[%s6422_s5 + $0x64] ss:$12 sps:$4 sm:$0xff]  }
 0x86a   :  { %3991 = vrcp.f32 %v2449_v51  ;;  %v6207_v51 = vld [vmem:[%s6422_s5 + $0x4c] ss:$12 sps:$4 sm:$0xff]  }
 0x86b   :  { %v6116_v42 = vpack.c.bf16 %v6112_v24, %v6112_v24 }
 0x86d   :  { %3057 = vst [vmem:[%s6427_s7 + $0x5] sm:$0x1] %v6116_v42 }
 0x874   :  { %v3990_v21 = vpop.eup %3989 }
 0x875   :  { %v2452_v34 = vmul.f32 %v3990_v21, %v2428_v25  ;;  %v6214_v25 = vld [vmem:[%s6422_s5 + $0x48] ss:$12 sps:$4 sm:$0xff]  }
 0x876   :  { %v6226_v21 = vld [vmem:[%s6422_s5 + $0x34] ss:$12 sps:$4 sm:$0xff]  }
 0x877   :  { %v2456_v48 = vadd.f32 %v2455_v46, %v2452_v34  ;;  %v3992_v10 = vpop.eup %3991  ;;  %v6220_v46 = vld [vmem:[%s6422_s5 + $0x50] ss:$12 sps:$4 sm:$0xff]  }
 0x878   :  { %v2458_v3 = vsub.f32 1.0, %v3992_v10  ;;  %v2460_v29 = vmul.f32 %v3992_v10, %v5785_v60  ;;  %v6141_v60 = vld [vmem:[%s6422_s5 + $0xb0] ss:$12 sps:$4 sm:$0xff]  }
 0x879   :  { %3993 = vtanh.f32 %v2456_v48  ;;  %v6233_v34 = vld [vmem:[%s6422_s5 + $0x30] ss:$12 sps:$4 sm:$0xff]   ;;  %v6239_v48 = vld [vmem:[%s6422_s5 + $0x38] ss:$12 sps:$4 sm:$0xff]  }
 0x87a   :  { %v6245_v10 = vld [vmem:[%s6422_s5 + $0x1c] ss:$12 sps:$4 sm:$0xff]  }
 0x886   :  { %v3994_v45 = vpop.eup %3993 }
 0x887   :  { %v2459_v55 = vmul.f32 %v3994_v45, %v2458_v3  ;;  %v6252_v3 = vld [vmem:[%s6422_s5 + $0x18] ss:$12 sps:$4 sm:$0xff]   ;;  %v6258_v45 = vld [vmem:[%s6422_s5 + $0x20] ss:$12 sps:$4 sm:$0xff]  }
 0x888   :  { %6772 = vst [vmem:[#allocation13_spill] sm:$0xff] %v6258_v45 }
 0x889   :  { %v6124_v32 = vadd.f32 %v2460_v29, %v2459_v55  ;;  %v6264_v55 = vld [vmem:[%s6422_s5 + $0x4] ss:$12 sps:$4 sm:$0xff]   ;;  %v6271_v29 = vld [vmem:[%s6422_s5] ss:$12 sps:$4 sm:$0xff]  }
 0x88b   :  { %v6128_v27 = vpack.c.bf16 %v6124_v32, %v6124_v32 }
 0x88d   :  { %2496 = vmatmul.mubr.bf16.vlgmr.msra.gmra.mxu0 %v6128_v27  ;;  %3683 = vmatmul.mubr.bf16.vlgmr.msra.gmra.mxu1 %v6128_v27 }
 0x88e   :  { %2545 = vmatpush1.bf16.msra.mxu0 %v6135_v1  ;;  %3687 = vmatpush3.bf16.msra.mxu1 %v6141_v60 }
 0x88f   :  { %2546 = vmatprep.subr.bf16.mxu0 %v6147_v59  ;;  %3688 = vmatprep.subr.bf16.mxu1 %v6593_v58 }
 0x890   :  { %2576 = vmatprep.mubr.bf16.mxu0 %v6594_v62  ;;  %3702 = vmatprep.mubr.msk.bf16.mxu1 %vm4171_vm0, %v6593_v58 }
 0x892   :  { %2547 = vmatpush1.bf16.msra.mxu0 %v6157_v50  ;;  %3689 = vmatpush3.bf16.msra.mxu1 %v6163_v41 }
 0x893   :  { %2548 = vmatprep.subr.bf16.mxu0 %v6169_v44  ;;  %3690 = vmatprep.subr.bf16.mxu1 %v6593_v58 }
 0x896   :  { %2549 = vmatpush1.bf16.msra.mxu0 %v6176_v43  ;;  %3691 = vmatpush3.bf16.msra.mxu1 %v6182_v49 }
 0x897   :  { %2550 = vmatprep.subr.bf16.mxu0 %v6188_v38  ;;  %3692 = vmatprep.subr.bf16.mxu1 %v6593_v58 }
 0x89a   :  { %2551 = vmatpush1.bf16.msra.mxu0 %v6195_v35  ;;  %3693 = vmatpush3.bf16.msra.mxu1 %v6201_v63 }
 0x89b   :  { %2552 = vmatprep.subr.bf16.mxu0 %v6207_v51  ;;  %3694 = vmatprep.subr.bf16.mxu1 %v6593_v58 }
 0x89e   :  { %2553 = vmatpush1.bf16.msra.mxu0 %v6214_v25  ;;  %3695 = vmatpush3.bf16.msra.mxu1 %v6220_v46 }
 0x89f   :  { %2554 = vmatprep.subr.bf16.mxu0 %v6226_v21  ;;  %3696 = vmatprep.subr.bf16.mxu1 %v6593_v58 }
 0x8a2   :  { %2555 = vmatpush1.bf16.msra.mxu0 %v6233_v34  ;;  %3697 = vmatpush3.bf16.msra.mxu1 %v6239_v48 }
 0x8a3   :  { %2556 = vmatprep.subr.bf16.mxu0 %v6245_v10  ;;  %3698 = vmatprep.subr.bf16.mxu1 %v6593_v58 }
 0x8a6   :  { %2557 = vmatpush1.bf16.msra.mxu0 %v6252_v3  ;;  %3699 = vmatpush3.bf16.msra.mxu1 %v6258_v45  ;;  %v6277_v45 = vld [vmem:[%s6422_s5 + $0x8] ss:$12 sps:$4 sm:$0xff]  }
 0x8a7   :  { %2558 = vmatprep.subr.bf16.mxu0 %v6264_v55  ;;  %3700 = vmatprep.subr.bf16.mxu1 %v6593_v58 }
 0x8aa   :  { %2559 = vmatpush1.bf16.msra.mxu0 %v6271_v29  ;;  %3701 = vmatpush3.bf16.msra.mxu1 %v6277_v45 }
 0x8ab   :  { %2651 = vmatprep.subr.bf16.mxu0 %v5648_v12  ;;  %3706 = vmatprep.subr.bf16.mxu1 %v6593_v58  ;;  %v6773_v12 = vld [vmem:[#allocation29_spill] sm:$0xff] }
 0x8ad   :  { %2577 = vmatmul.mubr.bf16.vlgmr.msra.gmra.mxu0 %v6116_v42  ;;  %3703 = vmatmul.mubr.bf16.vlgmr.msra.gmra.mxu1 %v6116_v42 }
 0x8ae   :  { %2652 = vmatpush1.bf16.msra.mxu0 %v5655_v28  ;;  %3707 = vmatpush3.bf16.msra.mxu1 %v5832_v31  ;;  %v6774_v28 = vld [vmem:[#allocation30_spill] sm:$0xff]  ;;  %v6781_v31 = vld [vmem:[#allocation3_spill] sm:$0xff] }
 0x8af   :  { %2653 = vmatprep.subr.bf16.mxu0 %v5662_v52  ;;  %3708 = vmatprep.subr.bf16.mxu1 %v6593_v58  ;;  %v6775_v52 = vld [vmem:[#allocation31_spill] sm:$0xff] }
 0x8b0   :  { %2683 = vmatprep.mubr.bf16.mxu0 %v6594_v62  ;;  %3722 = vmatprep.mubr.msk.bf16.mxu1 %vm4171_vm0, %v6593_v58 }
 0x8b2   :  { %2654 = vmatpush1.bf16.msra.mxu0 %v5672_v4  ;;  %3709 = vmatpush3.bf16.msra.mxu1 %v5844_v0  ;;  %v6776_v4 = vld [vmem:[#allocation32_spill] sm:$0xff] }
 0x8b3   :  { %2655 = vmatprep.subr.bf16.mxu0 %v5679_v54  ;;  %3710 = vmatprep.subr.bf16.mxu1 %v6593_v58  ;;  %v6777_v54 = vld [vmem:[#allocation33_spill] sm:$0xff]  ;;  %v6782_v0 = vld [vmem:[#allocation4_spill] sm:$0xff] }
 0x8b6   :  { %2656 = vmatpush1.bf16.msra.mxu0 %v5686_v5  ;;  %3711 = vmatpush3.bf16.msra.mxu1 %v5853_v19  ;;  %v6778_v5 = vld [vmem:[#allocation34_spill] sm:$0xff]  ;;  %v6783_v19 = vld [vmem:[#allocation5_spill] sm:$0xff] }
 0x8b7   :  { %2657 = vmatprep.subr.bf16.mxu0 %v5693_v47  ;;  %3712 = vmatprep.subr.bf16.mxu1 %v6593_v58  ;;  %v6779_v47 = vld [vmem:[#allocation35_spill] sm:$0xff] }
 0x8ba   :  { %2658 = vmatpush1.bf16.msra.mxu0 %v5700_v56  ;;  %3713 = vmatpush3.bf16.msra.mxu1 %v5862_v16  ;;  %v6780_v56 = vld [vmem:[#allocation2_spill] sm:$0xff] }
 0x8bb   :  { %2659 = vmatprep.subr.bf16.mxu0 %v6749_v17  ;;  %3714 = vmatprep.subr.bf16.mxu1 %v6593_v58  ;;  %v6784_v16 = vld [vmem:[#allocation6_spill] sm:$0xff]  ;;  %v6785_v17 = vld [vmem:[#allocation7_spill] sm:$0xff] }
 0x8be   :  { %2660 = vmatpush1.bf16.msra.mxu0 %v5870_v22  ;;  %3715 = vmatpush3.bf16.msra.mxu1 %v5876_v6  ;;  %v6786_v22 = vld [vmem:[#allocation8_spill] sm:$0xff]  ;;  %v6787_v6 = vld [vmem:[#allocation9_spill] sm:$0xff] }
 0x8bf   :  { %2661 = vmatprep.subr.bf16.mxu0 %v5882_v13  ;;  %3716 = vmatprep.subr.bf16.mxu1 %v6593_v58  ;;  %v6788_v13 = vld [vmem:[#allocation10_spill] sm:$0xff] }
 0x8c2   :  { %2662 = vmatpush1.bf16.msra.mxu0 %v5889_v57  ;;  %3717 = vmatpush3.bf16.msra.mxu1 %v5895_v8  ;;  %v6789_v57 = vld [vmem:[#allocation11_spill] sm:$0xff]  ;;  %v6790_v8 = vld [vmem:[#allocation12_spill] sm:$0xff] }
 0x8c3   :  { %2663 = vmatprep.subr.bf16.mxu0 %v5901_v15  ;;  %3718 = vmatprep.subr.bf16.mxu1 %v6593_v58 }
 0x8c6   :  { %2664 = vmatpush1.bf16.msra.mxu0 %v5908_v39  ;;  %3719 = vmatpush3.bf16.msra.mxu1 %v5914_v20 }
 0x8c7   :  { %2665 = vmatprep.subr.bf16.mxu0 %v5920_v14  ;;  %3720 = vmatprep.subr.bf16.mxu1 %v6593_v58 }
 0x8ca   :  { %2666 = vmatpush1.bf16.msra.mxu0 %v5927_v26  ;;  %3721 = vmatpush3.bf16.msra.mxu1 %v5933_v36 }
 0x8cb   :  { %2762 = vmatprep.subr.bf16.mxu0 %v5939_v37  ;;  %3726 = vmatprep.subr.bf16.mxu1 %v6593_v58 }
 0x8cd   :  { %2684 = vmatmul.mubr.bf16.vlgmr.msra.gmra.mxu0 %v6128_v27  ;;  %3723 = vmatmul.mubr.bf16.vlgmr.msra.gmra.mxu1 %v6128_v27 }
 0x8ce   :  { %2763 = vmatpush1.bf16.msra.mxu0 %v5948_v23  ;;  %3727 = vmatpush3.bf16.msra.mxu1 %v5954_v18 }
 0x8cf   :  { %2764 = vmatprep.subr.bf16.mxu0 %v5960_v40  ;;  %3728 = vmatprep.subr.bf16.mxu1 %v6593_v58 }
 0x8d0   :  { %2794 = vmatprep.mubr.bf16.mxu0 %v6594_v62  ;;  %3742 = vmatprep.mubr.msk.bf16.mxu1 %vm4171_vm0, %v6593_v58 }
 0x8d2   :  { %2765 = vmatpush1.bf16.msra.mxu0 %v5970_v7  ;;  %3729 = vmatpush3.bf16.msra.mxu1 %v5976_v11  ;;  %v6791_v7 = vld [vmem:[#allocation26_spill] sm:$0xff] }
 0x8d3   :  { %2766 = vmatprep.subr.bf16.mxu0 %v5982_v53  ;;  %3730 = vmatprep.subr.bf16.mxu1 %v6593_v58  ;;  %v6792_v53 = vld [vmem:[#allocation36_spill] sm:$0xff] }
 0x8d6   :  { %2767 = vmatpush1.bf16.msra.mxu0 %v6773_v12  ;;  %3731 = vmatpush3.bf16.msra.mxu1 %v6774_v28 }
 0x8d7   :  { %2768 = vmatprep.subr.bf16.mxu0 %v6775_v52  ;;  %3732 = vmatprep.subr.bf16.mxu1 %v6593_v58 }
 0x8da   :  { %2769 = vmatpush1.bf16.msra.mxu0 %v6776_v4  ;;  %3733 = vmatpush3.bf16.msra.mxu1 %v6777_v54 }
 0x8db   :  { %2770 = vmatprep.subr.bf16.mxu0 %v6778_v5  ;;  %3734 = vmatprep.subr.bf16.mxu1 %v6593_v58  ;;  %v6793_v5 = vld [vmem:[#allocation28_spill] sm:$0xff] }
 0x8de   :  { %2771 = vmatpush1.bf16.msra.mxu0 %v6779_v47  ;;  %3735 = vmatpush3.bf16.msra.mxu1 %v6780_v56 }
 0x8df   :  { %2772 = vmatprep.subr.bf16.mxu0 %v6781_v31  ;;  %3736 = vmatprep.subr.bf16.mxu1 %v6593_v58 }
 0x8e2   :  { %2773 = vmatpush1.bf16.msra.mxu0 %v6782_v0  ;;  %3737 = vmatpush3.bf16.msra.mxu1 %v6783_v19  ;;  %v6794_v0 = vld [vmem:[#allocation37_spill] sm:$0xff] }
 0x8e3   :  { %2774 = vmatprep.subr.bf16.mxu0 %v6784_v16  ;;  %3738 = vmatprep.subr.bf16.mxu1 %v6593_v58 }
 0x8e6   :  { %2775 = vmatpush1.bf16.msra.mxu0 %v6785_v17  ;;  %3739 = vmatpush3.bf16.msra.mxu1 %v6786_v22 }
 0x8e7   :  { %2776 = vmatprep.subr.bf16.mxu0 %v6787_v6  ;;  %3740 = vmatprep.subr.bf16.mxu1 %v6593_v58 }
 0x8ea   :  { %2777 = vmatpush1.bf16.msra.mxu0 %v6788_v13  ;;  %3741 = vmatpush3.bf16.msra.mxu1 %v6789_v57  ;;  %v3064_v13 = vld [vmem:[%s6424_s0 + $0x15] sm:$0x7] }
 0x8eb   :  { %2843 = vmatprep.subr.bf16.mxu0 %v6790_v8  ;;  %3746 = vmatprep.subr.bf16.mxu1 %v6593_v58  ;;  %v2732_v8 = vunpack.c.l.bf16 %v3064_v13 }
 0x94d   :  { %v2497_v15 = vpop.f32.mrf.mxu0  ;;  %v2538_v39 = vpop.f32.mrf.mxu1 }
 0x94e   :  { %v2498_v11 = vadd.f32 %v2497_v15, %v6791_v7 }
 0x94f   :  { %v2499_v20 = vpop.f32.mrf.mxu0  ;;  %v3684_v14 = vpop.f32.mrf.mxu1 }
 0x950   :  { %v2500_v19 = vadd.f32 %v2499_v20, %v6794_v0 }
 0x951   :  { %v2501_v26 = vpop.f32.mrf.mxu0  ;;  %v2541_v36 = vpop.f32.mrf.mxu1 }
 0x952   :  { %v2741_v26 = vrot.slane %v3064_v13, 1 }
 0x953   :  { %v2502_v37 = vpop.f32.mrf.mxu0  ;;  %v3685_v23 = vpop.f32.mrf.mxu1 }
 0x96d   :  { %v2578_v18 = vpop.f32.mrf.mxu0  ;;  %v2619_v40 = vpop.f32.mrf.mxu1 }
 0x96e   :  { %v2579_v42 = vadd.f32 %v2578_v18, %v6792_v53  ;;  %v2620_v18 = vadd.f32 %v2619_v40, %v4813_v33 }
 0x96f   :  { %v2580_v27 = vpop.f32.mrf.mxu0  ;;  %v3704_v12 = vpop.f32.mrf.mxu1 }
 0x970   :  { %v2625_v28 = vadd.f32 %v2579_v42, %v2498_v11  ;;  %v2581_v47 = vadd.f32 %v2580_v27, %v6793_v5  ;;  %v2539_v27 = vadd.f32 %v2538_v39, %v4816_v30  ;;  %v2743_v12 = vunpack.c.l.bf16 %v2741_v26 }
 0x971   :  { %v2582_v52 = vpop.f32.mrf.mxu0  ;;  %v2622_v4 = vpop.f32.mrf.mxu1 }
 0x972   :  { %v3061_v54 = vmul.f32 -1.442695, %v2625_v28  ;;  %v2632_v16 = vadd.f32 %v2581_v47, %v2500_v19 }
 0x973   :  { %v2583_v56 = vpop.f32.mrf.mxu0  ;;  %v3705_v31 = vpop.f32.mrf.mxu1 }
 0x974   :  { %3995 = vpow2.f32 %v3061_v54  ;;  %v3062_v17 = vmul.f32 -1.442695, %v2632_v16 }
 0x976   :  { %3997 = vpow2.f32 %v3062_v17 }
 0x981   :  { %v3996_v22 = vpop.eup %3995 }
 0x982   :  { %v2629_v6 = vadd.f32 1.0, %v3996_v22 }
 0x983   :  { %v3998_v57 = vpop.eup %3997 }
 0x984   :  { %3999 = vrcp.f32 %v2629_v6  ;;  %v2636_v36 = vadd.f32 1.0, %v3998_v57 }
 0x986   :  { %4001 = vrcp.f32 %v2636_v36  ;;  %v2752_v36 = vrot.slane %v3064_v13, 2 }
 0x98d   :  { %v2685_v15 = vpop.f32.mrf.mxu0  ;;  %v2726_v14 = vpop.f32.mrf.mxu1 }
 0x98e   :  { %v2686_v37 = vadd.f32 %v2685_v15, %v6616_v9 }
 0x98f   :  { %v2687_v20 = vpop.f32.mrf.mxu0  ;;  %v3724_v23 = vpop.f32.mrf.mxu1 }
 0x990   :  { %v2733_v11 = vadd.f32 %v2732_v8, %v2686_v37  ;;  %v2688_v47 = vadd.f32 %v2687_v20, %v4546_v61  ;;  %v2727_v20 = vadd.f32 %v2726_v14, %v4552_v2  ;;  %v2754_v23 = vunpack.c.l.bf16 %v2752_v36  ;;  %v6795_v2 = vld [vmem:[#allocation13_spill] sm:$0xff] }
 0x991   :  { %v4000_v42 = vpop.eup %3999  ;;  %v2689_v28 = vpop.f32.mrf.mxu0 }
 0x992   :  { %v2729_v52 = vpop.f32.mrf.mxu1  ;;  %v2639_v4 = vmul.f32 %v4000_v42, %v2620_v18  ;;  %v3065_v54 = vmul.f32 -1.442695, %v2733_v11  ;;  %v2744_v9 = vadd.f32 %v2743_v12, %v2688_v47 }
 0x993   :  { %v2690_v56 = vpop.f32.mrf.mxu0  ;;  %v4002_v40 = vpop.eup %4001 }
 0x994   :  { %v3725_v31 = vpop.f32.mrf.mxu1  ;;  %v2640_v19 = vadd.f32 %v2639_v4, %v2539_v27  ;;  %4003 = vpow2.f32 %v3065_v54  ;;  %v3066_v16 = vmul.f32 -1.442695, %v2744_v9  ;;  %v2642_v39 = vsub.f32 1.0, %v4002_v40 }
 0x995   :  { %v2644_v8 = vmul.f32 %v4002_v40, %v6112_v24 }
 0x996   :  { %4005 = vtanh.f32 %v2640_v19 }
 0x997   :  { %4007 = vpow2.f32 %v3066_v16 }
 0x9a1   :  { %v4004_v17 = vpop.eup %4003 }
 0x9a2   :  { %v2737_v22 = vadd.f32 1.0, %v4004_v17 }
 0x9a3   :  { %v4006_v6 = vpop.eup %4005 }
 0x9a4   :  { %4009 = vrcp.f32 %v2737_v22  ;;  %v2643_v57 = vmul.f32 %v4006_v6, %v2642_v39  ;;  %v4008_v26 = vpop.eup %4007 }
 0x9a5   :  { %v2748_v37 = vadd.f32 1.0, %v4008_v26 }
 0x9a6   :  { %v6368_v15 = vadd.f32 %v2644_v8, %v2643_v57 }
 0x9a7   :  { %4011 = vrcp.f32 %v2748_v37 }
 0x9a8   :  { %v2646_v61 = vpack.c.bf16 %v6368_v15, %v6368_v15 }
 0x9aa   :  { %3063 = vst [vmem:[%s6427_s7 + $0x6] sm:$0x1] %v2646_v61 }
 0x9b1   :  { %v4010_v18 = vpop.eup %4009 }
 0x9b2   :  { %v2751_v11 = vmul.f32 %v4010_v18, %v2727_v20 }
 0x9b4   :  { %v2755_v42 = vadd.f32 %v2754_v23, %v2751_v11  ;;  %v4012_v24 = vpop.eup %4011 }
 0x9b5   :  { %v2757_v27 = vsub.f32 1.0, %v4012_v24  ;;  %v2759_v52 = vmul.f32 %v4012_v24, %v6124_v32 }
 0x9b6   :  { %4013 = vtanh.f32 %v2755_v42 }
 0x9c3   :  { %v4014_v12 = vpop.eup %4013 }
 0x9c4   :  { %v2758_v28 = vmul.f32 %v4014_v12, %v2757_v27 }
 0x9c6   :  { %v2760_v4 = vadd.f32 %v2759_v52, %v2758_v28 }
 0x9c8   :  { %v2761_v54 = vpack.c.bf16 %v2760_v4, %v2760_v4 }
 0x9ca   :  { %2795 = vmatmul.mubr.bf16.vlgmr.msra.gmra.mxu0 %v2761_v54  ;;  %3743 = vmatmul.mubr.bf16.vlgmr.msra.gmra.mxu1 %v2761_v54 }
 0x9cb   :  { %2844 = vmatpush1.bf16.msra.mxu0 %v6135_v1  ;;  %3747 = vmatpush3.bf16.msra.mxu1 %v6141_v60 }
 0x9cc   :  { %2845 = vmatprep.subr.bf16.mxu0 %v6147_v59  ;;  %3748 = vmatprep.subr.bf16.mxu1 %v6593_v58 }
 0x9cd   :  { %2875 = vmatprep.mubr.bf16.mxu0 %v6594_v62  ;;  %3762 = vmatprep.mubr.msk.bf16.mxu1 %vm4171_vm0, %v6593_v58 }
 0x9cf   :  { %2846 = vmatpush1.bf16.msra.mxu0 %v6157_v50  ;;  %3749 = vmatpush3.bf16.msra.mxu1 %v6163_v41 }
 0x9d0   :  { %2847 = vmatprep.subr.bf16.mxu0 %v6169_v44  ;;  %3750 = vmatprep.subr.bf16.mxu1 %v6593_v58 }
 0x9d3   :  { %2848 = vmatpush1.bf16.msra.mxu0 %v6176_v43  ;;  %3751 = vmatpush3.bf16.msra.mxu1 %v6182_v49 }
 0x9d4   :  { %2849 = vmatprep.subr.bf16.mxu0 %v6188_v38  ;;  %3752 = vmatprep.subr.bf16.mxu1 %v6593_v58 }
 0x9d7   :  { %2850 = vmatpush1.bf16.msra.mxu0 %v6195_v35  ;;  %3753 = vmatpush3.bf16.msra.mxu1 %v6201_v63 }
 0x9d8   :  { %2851 = vmatprep.subr.bf16.mxu0 %v6207_v51  ;;  %3754 = vmatprep.subr.bf16.mxu1 %v6593_v58 }
 0x9db   :  { %2852 = vmatpush1.bf16.msra.mxu0 %v6214_v25  ;;  %3755 = vmatpush3.bf16.msra.mxu1 %v6220_v46 }
 0x9dc   :  { %2853 = vmatprep.subr.bf16.mxu0 %v6226_v21  ;;  %3756 = vmatprep.subr.bf16.mxu1 %v6593_v58 }
 0x9df   :  { %2854 = vmatpush1.bf16.msra.mxu0 %v6233_v34  ;;  %3757 = vmatpush3.bf16.msra.mxu1 %v6239_v48 }
 0x9e0   :  { %2855 = vmatprep.subr.bf16.mxu0 %v6245_v10  ;;  %3758 = vmatprep.subr.bf16.mxu1 %v6593_v58 }
 0x9e3   :  { %2856 = vmatpush1.bf16.msra.mxu0 %v6252_v3  ;;  %3759 = vmatpush3.bf16.msra.mxu1 %v6795_v2 }
 0x9e4   :  { %2857 = vmatprep.subr.bf16.mxu0 %v6264_v55  ;;  %3760 = vmatprep.subr.bf16.mxu1 %v6593_v58 }
 0x9e7   :  { %2858 = vmatpush1.bf16.msra.mxu0 %v6271_v29  ;;  %3761 = vmatpush3.bf16.msra.mxu1 %v6277_v45 }
 0x9ea   :  { %2876 = vmatmul.mubr.bf16.vlgmr.msra.gmra.mxu0 %v2646_v61  ;;  %3763 = vmatmul.mubr.bf16.vlgmr.msra.gmra.mxu1 %v2646_v61 }
 0xa8a   :  { %v2796_v62 = vpop.f32.mrf.mxu0  ;;  %v2837_v32 = vpop.f32.mrf.mxu1 }
 0xa8b   :  { %v2797_v38 = vadd.f32 %v2796_v62, %v6791_v7  ;;  %v2838_v56 = vadd.f32 %v2837_v32, %v4816_v30 }
 0xa8c   :  { %v2798_v1 = vpop.f32.mrf.mxu0  ;;  %v3744_v60 = vpop.f32.mrf.mxu1 }
 0xa8d   :  { %v2799_v3 = vadd.f32 %v2798_v1, %v6794_v0 }
 0xa8e   :  { %v2800_v59 = vpop.f32.mrf.mxu0  ;;  %v2840_v50 = vpop.f32.mrf.mxu1 }
 0xa90   :  { %v2801_v41 = vpop.f32.mrf.mxu0  ;;  %v3745_v44 = vpop.f32.mrf.mxu1 }
 0xaaa   :  { %v2877_v43 = vpop.f32.mrf.mxu0  ;;  %v2918_v49 = vpop.f32.mrf.mxu1 }
 0xaab   :  { %v2878_v58 = vadd.f32 %v2877_v43, %v6792_v53  ;;  %v2919_v14 = vadd.f32 %v2918_v49, %v4813_v33 }
 0xaac   :  { %v2879_v35 = vpop.f32.mrf.mxu0  ;;  %v3764_v63 = vpop.f32.mrf.mxu1 }
 0xaad   :  { %v2924_v51 = vadd.f32 %v2878_v58, %v2797_v38  ;;  %v2880_v34 = vadd.f32 %v2879_v35, %v6793_v5 }
 0xaae   :  { %v2881_v25 = vpop.f32.mrf.mxu0  ;;  %v2921_v46 = vpop.f32.mrf.mxu1 }
 0xaaf   :  { %v3067_v21 = vmul.f32 -1.442695, %v2924_v51  ;;  %v2931_v45 = vadd.f32 %v2880_v34, %v2799_v3 }
 0xab0   :  { %v2882_v48 = vpop.f32.mrf.mxu0  ;;  %v3765_v10 = vpop.f32.mrf.mxu1 }
 0xab1   :  { %4015 = vpow2.f32 %v3067_v21  ;;  %v3068_v55 = vmul.f32 -1.442695, %v2931_v45 }
 0xab3   :  { %4017 = vpow2.f32 %v3068_v55 }
 0xabe   :  { %v4016_v29 = vpop.eup %4015 }
 0xabf   :  { %v2928_v7 = vadd.f32 1.0, %v4016_v29 }
 0xac0   :  { %v4018_v53 = vpop.eup %4017 }
 0xac1   :  { %4019 = vrcp.f32 %v2928_v7  ;;  %v2935_v13 = vadd.f32 1.0, %v4018_v53 }
 0xac3   :  { %4021 = vrcp.f32 %v2935_v13 }
 0xace   :  { %v4020_v47 = vpop.eup %4019 }
 0xacf   :  { %v2938_v31 = vmul.f32 %v4020_v47, %v2919_v14 }
 0xad0   :  { %v4022_v19 = vpop.eup %4021 }
 0xad1   :  { %v2939_v5 = vadd.f32 %v2938_v31, %v2838_v56  ;;  %v2941_v0 = vsub.f32 1.0, %v4022_v19  ;;  %v2943_v40 = vmul.f32 %v4022_v19, %v6368_v15 }
 0xad3   :  { %4023 = vtanh.f32 %v2939_v5 }
 0xae0   :  { %v4024_v9 = vpop.eup %4023 }
 0xae1   :  { %v2942_v16 = vmul.f32 %v4024_v9, %v2941_v0 }
 0xae3   :  { %v2944_v17 = vadd.f32 %v2943_v40, %v2942_v16 }
 0xae5   :  { %v2945_v22 = vpack.c.bf16 %v2944_v17, %v2944_v17 }
 0xae7   :  { %3069 = vst [vmem:[%s6427_s7 + $0x7] sm:$0x1] %v2945_v22 }

</bundles_post_ra>
